<compile_context>
chip_gen: v7x
topology: tpu7x:2x2x1
jax: 0.10.0
libtpu: 0.0.40
codegen_flags: <defaults>
</compile_context>

<pallas_src>
import functools
import numpy as np

import jax
import jax.numpy as jnp
from jax import lax
from jax.experimental import pallas as pl
from jax.experimental.pallas import tpu as pltpu


# ---------------------------------------------------------------------------
# Fused forward kernel
# ---------------------------------------------------------------------------
def fused_ezgi_kernel(x_ref, pe_ref, w_in_ref,
                      wqkv_ref, bqkv_ref, wo_ref, bo_ref,
                      ln1w_ref, ln1b_ref, w1_ref, b1_ref, w2_ref, b2_ref,
                      ln2w_ref, ln2b_ref,
                      wh1_ref, bh1_ref, wh2_ref, bh2_ref,
                      hmask_ref, hmask_t_ref,
                      o_ref, *, batch, seq, num_heads, num_layers, eps=1e-5):
    B, S, H, L = batch, seq, num_heads, num_layers
    M = B * S
    D = w_in_ref.shape[1]

    def mm(a, b):
        # bf16 MXU matmul, f32 accumulation
        return jnp.dot(a.astype(jnp.bfloat16), b.astype(jnp.bfloat16),
                       preferred_element_type=jnp.float32)

    def layer_norm(v, w, b):
        mu = jnp.mean(v, axis=-1, keepdims=True)
        var = jnp.mean((v - mu) ** 2, axis=-1, keepdims=True)
        return (v - mu) * lax.rsqrt(var + eps) * w + b

    hmask = hmask_ref[...]        # (D, H) 0/1 bf16: column h selects head-h lanes
    hmask_t = hmask_t_ref[...]    # (H, D) 0/1 bf16

    # ---- input projection + (bias + positional encoding), broadcast over B --
    h = mm(x_ref[...], w_in_ref[...])                                  # (M, D) f32
    h = (h.reshape(B, S, D) + pe_ref[...]).reshape(M, D)

    # ---- transformer encoder layers (post-norm, ReLU FFN) -------------------
    for l in range(L):
        # fused Q/K/V projection; 1/sqrt(dh) already folded into Q weights/bias
        qkv = mm(h, wqkv_ref[l]) + bqkv_ref[l]                         # (M, 3D) f32
        q = qkv[:, 0:D].reshape(B, S, D)
        k = qkv[:, D:2 * D].reshape(B, S, D)
        v = qkv[:, 2 * D:3 * D].reshape(B, S, D)

        # per-head scores with no head slicing / transpose:
        # outer product over (query, key) rows, then 0/1 head-mask matmul
        prod = q[:, :, None, :] * k[:, None, :, :]                     # (B, Sq, Sk, D) f32
        s = mm(prod.reshape(M * S, D), hmask).reshape(B, S, S, H)      # per-head scores

        # softmax over the key axis (axis=2, sublane reduction), f32
        s = s - jnp.max(s, axis=2, keepdims=True)
        p = jnp.exp(s)
        p = p * pl.reciprocal(jnp.sum(p, axis=2, keepdims=True), approx=True)

        # expand per-head probs back to D lanes and contract against V
        p_exp = mm(p.reshape(M * S, H), hmask_t).reshape(B, S, S, D)
        ctx = jnp.sum(p_exp * v[:, None, :, :], axis=2)                # (B, S, D) f32
        attn = mm(ctx.reshape(M, D), wo_ref[l]) + bo_ref[l]            # (M, D)

        # residual + LayerNorm1 (PyTorch default norm_first=False)
        y = layer_norm(h + attn, ln1w_ref[l], ln1b_ref[l])

        # feed-forward (ReLU, dim_feedforward=2048); w2 pre-transposed to (FF, D)
        h1 = jnp.maximum(mm(y, w1_ref[l]) + b1_ref[l], 0.0)            # (M, FF)
        f = mm(h1, w2_ref[l]) + b2_ref[l]                              # (M, D)

        # residual + LayerNorm2
        h = layer_norm(y + f, ln2w_ref[l], ln2b_ref[l])

    # ---- mean pool over sequence (AdaptiveAvgPool1d(1)) + classifier head ---
    pooled = jnp.mean(h.reshape(B, S, D), axis=1)                      # (B, D)
    g = jnp.maximum(mm(pooled, wh1_ref[...]) + bh1_ref[...], 0.0)      # (B, 256)
    out = mm(g, wh2_ref[...]) + bh2_ref[...]                           # (B, C)
    o_ref[...] = out.astype(o_ref.dtype)


# ---------------------------------------------------------------------------
# Wrapper: single fused pallas_call, parallel batch-group grid (v7x: 2 TCs)
# ---------------------------------------------------------------------------
def _tensorcores_per_chip():
    # v7x has 2 TensorCores per chip; v5e/v6e have 1.
    try:
        kind = jax.devices()[0].device_kind.lower()
        return 2 if "v7" in kind else 1
    except Exception:
        return 1


def ezgi_transformer_forward(x, params, num_heads, num_groups=None):
    B, S, Din = x.shape
    D = params["w_in"].shape[1]
    L = params["wqkv"].shape[0]
    C = params["wh2"].shape[1]

    if num_groups is None:
        num_groups = 2 if (_tensorcores_per_chip() >= 2 and B % 2 == 0) else 1
    G = num_groups
    Bg = B // G

    x3 = x.reshape(G, Bg * S, Din)               # fold (batch-group, rows) layout

    kernel = functools.partial(fused_ezgi_kernel, batch=Bg, seq=S,
                               num_heads=num_heads, num_layers=L)

    weight_ops = (params["pe_bias"], params["w_in"],
                  params["wqkv"], params["bqkv"], params["wo"], params["bo"],
                  params["ln1w"], params["ln1b"], params["w1"], params["b1"],
                  params["w2"], params["b2"], params["ln2w"], params["ln2b"],
                  params["wh1"], params["bh1"], params["wh2"], params["bh2"],
                  params["hmask"], params["hmask_t"])

    def const_spec(a):
        nd = a.ndim
        return pl.BlockSpec(a.shape, lambda g, _nd=nd: (0,) * _nd)

    in_specs = ([pl.BlockSpec((None, Bg * S, Din), lambda g: (g, 0, 0))]
                + [const_spec(a) for a in weight_ops])

    out = pl.pallas_call(
        kernel,
        out_shape=jax.ShapeDtypeStruct((G, Bg, C), jnp.float32),
        grid=(G,),
        in_specs=in_specs,
        out_specs=pl.BlockSpec((None, Bg, C), lambda g: (g, 0, 0)),
        compiler_params=pltpu.CompilerParams(
            dimension_semantics=("parallel",)),
    )(x3, *weight_ops)
    return out.reshape(B, C)


# ---------------------------------------------------------------------------
# Parameter init (deterministic, synthetic) + positional encoding buffer
# ---------------------------------------------------------------------------
def positional_encoding(seq, d):
    pos = np.arange(seq, dtype=np.float32)[:, None]
    div = np.exp(np.arange(0, d, 2, dtype=np.float32) * (-np.log(10000.0) / d))
    pe = np.zeros((seq, d), np.float32)
    pe[:, 0::2] = np.sin(pos * div)
    pe[:, 1::2] = np.cos(pos * div)
    return jnp.asarray(pe)


def init_params(key, din, d, n_classes, n_layers, n_heads, seq,
                ff=2048, head_hidden=256):
    wdt = jnp.bfloat16   # matmul weights in bf16 (f32 accumulation in-kernel)
    dh = d // n_heads
    keys = iter(jax.random.split(key, 16))

    def nrm(shape, dtype=jnp.float32, scale=0.05):
        return (scale * jax.random.normal(next(keys), shape, jnp.float32)).astype(dtype)

    w_in = nrm((din, d))                               # giris_donusum.weight.T
    b_in = nrm((1, d))
    wqkv = nrm((n_layers, d, 3 * d))                   # fused q|k|v (in, 3*out)
    bqkv = nrm((n_layers, 1, 3 * d))

    # fold 1/sqrt(dh) attention scale into the Q block of the QKV projection
    qs = np.ones((3 * d,), np.float32)
    qs[:d] = 1.0 / np.sqrt(dh)
    qs = jnp.asarray(qs)
    wqkv = (wqkv * qs).astype(wdt)
    bqkv = bqkv * qs

    # fold input-projection bias into the positional-encoding table: one (S, D) add
    pe_bias = positional_encoding(seq, d) + b_in

    # 0/1 head-selection masks (exact in bf16): hmask[d, h] = (d // dh == h)
    hm = np.zeros((d, n_heads), np.float32)
    hm[np.arange(d), np.arange(d) // dh] = 1.0

    return {
        "w_in": w_in.astype(wdt),
        "pe_bias": pe_bias,                            # (S, D) f32: b_in + PE
        "wqkv": wqkv,                                  # (L, D, 3D) bf16, Q pre-scaled
        "bqkv": bqkv,                                  # (L, 1, 3D) f32, Q pre-scaled
        "wo":   nrm((n_layers, d, d), wdt),            # out_proj.weight.T
        "bo":   nrm((n_layers, 1, d)),
        "ln1w": jnp.ones((n_layers, 1, d), jnp.float32),
        "ln1b": jnp.zeros((n_layers, 1, d), jnp.float32),
        "w1":   nrm((n_layers, d, ff), wdt),           # linear1.weight.T
        "b1":   nrm((n_layers, 1, ff)),
        "w2":   nrm((n_layers, ff, d), wdt),           # linear2.weight.T (pre-transposed: plain K,N dot)
        "b2":   nrm((n_layers, 1, d)),
        "ln2w": jnp.ones((n_layers, 1, d), jnp.float32),
        "ln2b": jnp.zeros((n_layers, 1, d), jnp.float32),
        "wh1":  nrm((d, head_hidden), wdt),            # head linear1.weight.T
        "bh1":  nrm((1, head_hidden)),
        "wh2":  nrm((head_hidden, n_classes), wdt),    # head linear2.weight.T
        "bh2":  nrm((1, n_classes)),
        "hmask":   jnp.asarray(hm, dtype=jnp.bfloat16),    # (D, H)
        "hmask_t": jnp.asarray(hm.T, dtype=jnp.bfloat16),  # (H, D)
    }


# ---------------------------------------------------------------------------
if __name__ == "__main__":
    B, S = 2, 8
    GIRDI, GIZIL = 16, 32
    HEADS, LAYERS, SINIF = 4, 2, 5

    key = jax.random.PRNGKey(0)
    k_x, k_p = jax.random.split(key)
    x = jax.random.normal(k_x, (B, S, GIRDI), dtype=jnp.float32)

    params = init_params(k_p, GIRDI, GIZIL, SINIF, LAYERS, HEADS, S)

    out = ezgi_transformer_forward(x, params, HEADS)
    out = jax.block_until_ready(out)
    assert out.shape == (B, SINIF), out.shape
    print("KERNEL_OK")
</pallas_src>

<mosaic_0001>
module attributes {stable_mosaic.version = 11 : i64} {
  func.func @fused_ezgi_kernel(%arg0: i32, %arg1: memref<1x16x16xf32, #tpu.memory_space<vmem>>, %arg2: memref<8x32xf32, #tpu.memory_space<vmem>>, %arg3: memref<16x32xbf16, #tpu.memory_space<vmem>>, %arg4: memref<2x32x96xbf16, #tpu.memory_space<vmem>>, %arg5: memref<2x1x96xf32, #tpu.memory_space<vmem>>, %arg6: memref<2x32x32xbf16, #tpu.memory_space<vmem>>, %arg7: memref<2x1x32xf32, #tpu.memory_space<vmem>>, %arg8: memref<2x1x32xf32, #tpu.memory_space<vmem>>, %arg9: memref<2x1x32xf32, #tpu.memory_space<vmem>>, %arg10: memref<2x32x2048xbf16, #tpu.memory_space<vmem>>, %arg11: memref<2x1x2048xf32, #tpu.memory_space<vmem>>, %arg12: memref<2x2048x32xbf16, #tpu.memory_space<vmem>>, %arg13: memref<2x1x32xf32, #tpu.memory_space<vmem>>, %arg14: memref<2x1x32xf32, #tpu.memory_space<vmem>>, %arg15: memref<2x1x32xf32, #tpu.memory_space<vmem>>, %arg16: memref<32x256xbf16, #tpu.memory_space<vmem>>, %arg17: memref<1x256xf32, #tpu.memory_space<vmem>>, %arg18: memref<256x5xbf16, #tpu.memory_space<vmem>>, %arg19: memref<1x5xf32, #tpu.memory_space<vmem>>, %arg20: memref<32x4xbf16, #tpu.memory_space<vmem>>, %arg21: memref<4x32xbf16, #tpu.memory_space<vmem>>, %arg22: memref<1x2x5xf32, #tpu.memory_space<vmem>>) attributes {dimension_semantics = [#tpu.dimension_semantics<parallel>], iteration_bounds = array<i64: 1>, scalar_prefetch = 0 : i64, scratch_operands = 0 : i64, tpu.core_type = #tpu.core_type<tc>, window_params = [{transform_indices = @transform_0, window_bounds = array<i64: 1, 16, 16>}, {pipeline_mode = #tpu.pipeline_mode<synchronous>, transform_indices = @transform_1, window_bounds = array<i64: 8, 32>}, {pipeline_mode = #tpu.pipeline_mode<synchronous>, transform_indices = @transform_2, window_bounds = array<i64: 16, 32>}, {pipeline_mode = #tpu.pipeline_mode<synchronous>, transform_indices = @transform_3, window_bounds = array<i64: 2, 32, 96>}, {pipeline_mode = #tpu.pipeline_mode<synchronous>, transform_indices = @transform_4, window_bounds = array<i64: 2, 1, 96>}, {pipeline_mode = #tpu.pipeline_mode<synchronous>, transform_indices = @transform_5, window_bounds = array<i64: 2, 32, 32>}, {pipeline_mode = #tpu.pipeline_mode<synchronous>, transform_indices = @transform_6, window_bounds = array<i64: 2, 1, 32>}, {pipeline_mode = #tpu.pipeline_mode<synchronous>, transform_indices = @transform_7, window_bounds = array<i64: 2, 1, 32>}, {pipeline_mode = #tpu.pipeline_mode<synchronous>, transform_indices = @transform_8, window_bounds = array<i64: 2, 1, 32>}, {pipeline_mode = #tpu.pipeline_mode<synchronous>, transform_indices = @transform_9, window_bounds = array<i64: 2, 32, 2048>}, {pipeline_mode = #tpu.pipeline_mode<synchronous>, transform_indices = @transform_10, window_bounds = array<i64: 2, 1, 2048>}, {pipeline_mode = #tpu.pipeline_mode<synchronous>, transform_indices = @transform_11, window_bounds = array<i64: 2, 2048, 32>}, {pipeline_mode = #tpu.pipeline_mode<synchronous>, transform_indices = @transform_12, window_bounds = array<i64: 2, 1, 32>}, {pipeline_mode = #tpu.pipeline_mode<synchronous>, transform_indices = @transform_13, window_bounds = array<i64: 2, 1, 32>}, {pipeline_mode = #tpu.pipeline_mode<synchronous>, transform_indices = @transform_14, window_bounds = array<i64: 2, 1, 32>}, {pipeline_mode = #tpu.pipeline_mode<synchronous>, transform_indices = @transform_15, window_bounds = array<i64: 32, 256>}, {pipeline_mode = #tpu.pipeline_mode<synchronous>, transform_indices = @transform_16, window_bounds = array<i64: 1, 256>}, {pipeline_mode = #tpu.pipeline_mode<synchronous>, transform_indices = @transform_17, window_bounds = array<i64: 256, 5>}, {pipeline_mode = #tpu.pipeline_mode<synchronous>, transform_indices = @transform_18, window_bounds = array<i64: 1, 5>}, {pipeline_mode = #tpu.pipeline_mode<synchronous>, transform_indices = @transform_19, window_bounds = array<i64: 32, 4>}, {pipeline_mode = #tpu.pipeline_mode<synchronous>, transform_indices = @transform_20, window_bounds = array<i64: 4, 32>}, {transform_indices = @transform_21, window_bounds = array<i64: 1, 2, 5>}]} {
    %c0 = arith.constant 0 : index
    %c0_0 = arith.constant 0 : index
    %0 = vector.load %arg20[%c0, %c0_0] : memref<32x4xbf16, #tpu.memory_space<vmem>>, vector<32x4xbf16>
    %c0_1 = arith.constant 0 : index
    %c0_2 = arith.constant 0 : index
    %1 = vector.load %arg21[%c0_1, %c0_2] : memref<4x32xbf16, #tpu.memory_space<vmem>>, vector<4x32xbf16>
    %c0_3 = arith.constant 0 : index
    %c0_4 = arith.constant 0 : index
    %c0_5 = arith.constant 0 : index
    %2 = vector.load %arg1[%c0_3, %c0_4, %c0_5] : memref<1x16x16xf32, #tpu.memory_space<vmem>>, vector<1x16x16xf32>
    %3 = vector.shape_cast %2 : vector<1x16x16xf32> to vector<16x16xf32>
    %c0_6 = arith.constant 0 : index
    %c0_7 = arith.constant 0 : index
    %4 = vector.load %arg3[%c0_6, %c0_7] : memref<16x32xbf16, #tpu.memory_space<vmem>>, vector<16x32xbf16>
    %5 = arith.truncf %3 : vector<16x16xf32> to vector<16x16xbf16>
    %cst = arith.constant dense<0.000000e+00> : vector<16x32xf32>
    %6 = tpu.matmul %5, %4, %cst {dimension_numbers = #tpu.dot_dimension_numbers<[1], [0], [0], [1], [0, 0, 1, 1], [], []>} : vector<16x16xbf16>, vector<16x32xbf16>, vector<16x32xf32> -> vector<16x32xf32>
    %7 = vector.shape_cast %6 : vector<16x32xf32> to vector<2x8x32xf32>
    %c0_8 = arith.constant 0 : index
    %c0_9 = arith.constant 0 : index
    %8 = vector.load %arg2[%c0_8, %c0_9] : memref<8x32xf32, #tpu.memory_space<vmem>>, vector<8x32xf32>
    %9 = vector.shape_cast %8 : vector<8x32xf32> to vector<1x8x32xf32>
    %10 = vector.broadcast %9 : vector<1x8x32xf32> to vector<2x8x32xf32>
    %11 = arith.addf %7, %10 : vector<2x8x32xf32>
    %12 = vector.shape_cast %11 : vector<2x8x32xf32> to vector<16x32xf32>
    %c0_10 = arith.constant 0 : index
    %c0_11 = arith.constant 0 : index
    %c0_12 = arith.constant 0 : index
    %13 = vector.load %arg4[%c0_10, %c0_11, %c0_12] : memref<2x32x96xbf16, #tpu.memory_space<vmem>>, vector<1x32x96xbf16>
    %14 = vector.shape_cast %13 : vector<1x32x96xbf16> to vector<32x96xbf16>
    %15 = arith.truncf %12 : vector<16x32xf32> to vector<16x32xbf16>
    %cst_13 = arith.constant dense<0.000000e+00> : vector<16x96xf32>
    %16 = tpu.matmul %15, %14, %cst_13 {dimension_numbers = #tpu.dot_dimension_numbers<[1], [0], [0], [1], [0, 0, 1, 1], [], []>} : vector<16x32xbf16>, vector<32x96xbf16>, vector<16x96xf32> -> vector<16x96xf32>
    %c0_14 = arith.constant 0 : index
    %c0_15 = arith.constant 0 : index
    %c0_16 = arith.constant 0 : index
    %17 = vector.load %arg5[%c0_14, %c0_15, %c0_16] : memref<2x1x96xf32, #tpu.memory_space<vmem>>, vector<1x1x96xf32>
    %18 = vector.shape_cast %17 : vector<1x1x96xf32> to vector<1x96xf32>
    %19 = vector.broadcast %18 : vector<1x96xf32> to vector<16x96xf32>
    %20 = arith.addf %16, %19 : vector<16x96xf32>
    %21 = vector.extract_strided_slice %20 {offsets = [0, 0], sizes = [16, 32], strides = [1, 1]} : vector<16x96xf32> to vector<16x32xf32>
    %22 = vector.shape_cast %21 : vector<16x32xf32> to vector<2x8x32xf32>
    %23 = vector.extract_strided_slice %20 {offsets = [0, 32], sizes = [16, 32], strides = [1, 1]} : vector<16x96xf32> to vector<16x32xf32>
    %24 = vector.shape_cast %23 : vector<16x32xf32> to vector<2x8x32xf32>
    %25 = vector.extract_strided_slice %20 {offsets = [0, 64], sizes = [16, 32], strides = [1, 1]} : vector<16x96xf32> to vector<16x32xf32>
    %26 = vector.shape_cast %25 : vector<16x32xf32> to vector<2x8x32xf32>
    %27 = vector.shape_cast %22 : vector<2x8x32xf32> to vector<2x8x1x32xf32>
    %28 = vector.shape_cast %24 : vector<2x8x32xf32> to vector<2x1x8x32xf32>
    %29 = vector.broadcast %27 : vector<2x8x1x32xf32> to vector<2x8x8x32xf32>
    %30 = vector.broadcast %28 : vector<2x1x8x32xf32> to vector<2x8x8x32xf32>
    %31 = arith.mulf %29, %30 : vector<2x8x8x32xf32>
    %32 = vector.shape_cast %31 : vector<2x8x8x32xf32> to vector<128x32xf32>
    %33 = arith.truncf %32 : vector<128x32xf32> to vector<128x32xbf16>
    %cst_17 = arith.constant dense<0.000000e+00> : vector<128x4xf32>
    %34 = tpu.matmul %33, %0, %cst_17 {dimension_numbers = #tpu.dot_dimension_numbers<[1], [0], [0], [1], [0, 0, 1, 1], [], []>} : vector<128x32xbf16>, vector<32x4xbf16>, vector<128x4xf32> -> vector<128x4xf32>
    %35 = vector.shape_cast %34 : vector<128x4xf32> to vector<2x8x8x4xf32>
    %cst_18 = arith.constant dense<0xFF800000> : vector<2x8x4xf32>
    %36 = vector.multi_reduction <maximumf>, %35, %cst_18 [2] : vector<2x8x8x4xf32> to vector<2x8x4xf32>
    %37 = vector.shape_cast %36 : vector<2x8x4xf32> to vector<2x8x1x4xf32>
    %38 = vector.broadcast %37 : vector<2x8x1x4xf32> to vector<2x8x8x4xf32>
    %39 = arith.subf %35, %38 : vector<2x8x8x4xf32>
    %40 = math.exp %39 : vector<2x8x8x4xf32>
    %cst_19 = arith.constant dense<0.000000e+00> : vector<2x8x4xf32>
    %41 = vector.multi_reduction <add>, %40, %cst_19 [2] : vector<2x8x8x4xf32> to vector<2x8x4xf32>
    %42 = vector.shape_cast %41 : vector<2x8x4xf32> to vector<2x8x1x4xf32>
    %43 = tpu.reciprocal %42 {approx = true} : vector<2x8x1x4xf32> -> vector<2x8x1x4xf32>
    %44 = vector.broadcast %43 : vector<2x8x1x4xf32> to vector<2x8x8x4xf32>
    %45 = arith.mulf %40, %44 : vector<2x8x8x4xf32>
    %46 = vector.shape_cast %45 : vector<2x8x8x4xf32> to vector<128x4xf32>
    %47 = arith.truncf %46 : vector<128x4xf32> to vector<128x4xbf16>
    %cst_20 = arith.constant dense<0.000000e+00> : vector<128x32xf32>
    %48 = tpu.matmul %47, %1, %cst_20 {dimension_numbers = #tpu.dot_dimension_numbers<[1], [0], [0], [1], [0, 0, 1, 1], [], []>} : vector<128x4xbf16>, vector<4x32xbf16>, vector<128x32xf32> -> vector<128x32xf32>
    %49 = vector.shape_cast %48 : vector<128x32xf32> to vector<2x8x8x32xf32>
    %50 = vector.shape_cast %26 : vector<2x8x32xf32> to vector<2x1x8x32xf32>
    %51 = vector.broadcast %50 : vector<2x1x8x32xf32> to vector<2x8x8x32xf32>
    %52 = arith.mulf %49, %51 : vector<2x8x8x32xf32>
    %cst_21 = arith.constant dense<0.000000e+00> : vector<2x8x32xf32>
    %53 = vector.multi_reduction <add>, %52, %cst_21 [2] : vector<2x8x8x32xf32> to vector<2x8x32xf32>
    %54 = vector.shape_cast %53 : vector<2x8x32xf32> to vector<16x32xf32>
    %c0_22 = arith.constant 0 : index
    %c0_23 = arith.constant 0 : index
    %c0_24 = arith.constant 0 : index
    %55 = vector.load %arg6[%c0_22, %c0_23, %c0_24] : memref<2x32x32xbf16, #tpu.memory_space<vmem>>, vector<1x32x32xbf16>
    %56 = vector.shape_cast %55 : vector<1x32x32xbf16> to vector<32x32xbf16>
    %57 = arith.truncf %54 : vector<16x32xf32> to vector<16x32xbf16>
    %cst_25 = arith.constant dense<0.000000e+00> : vector<16x32xf32>
    %58 = tpu.matmul %57, %56, %cst_25 {dimension_numbers = #tpu.dot_dimension_numbers<[1], [0], [0], [1], [0, 0, 1, 1], [], []>} : vector<16x32xbf16>, vector<32x32xbf16>, vector<16x32xf32> -> vector<16x32xf32>
    %c0_26 = arith.constant 0 : index
    %c0_27 = arith.constant 0 : index
    %c0_28 = arith.constant 0 : index
    %59 = vector.load %arg7[%c0_26, %c0_27, %c0_28] : memref<2x1x32xf32, #tpu.memory_space<vmem>>, vector<1x1x32xf32>
    %60 = vector.shape_cast %59 : vector<1x1x32xf32> to vector<1x32xf32>
    %61 = vector.broadcast %60 : vector<1x32xf32> to vector<16x32xf32>
    %62 = arith.addf %58, %61 : vector<16x32xf32>
    %63 = arith.addf %12, %62 : vector<16x32xf32>
    %c0_29 = arith.constant 0 : index
    %c0_30 = arith.constant 0 : index
    %c0_31 = arith.constant 0 : index
    %64 = vector.load %arg8[%c0_29, %c0_30, %c0_31] : memref<2x1x32xf32, #tpu.memory_space<vmem>>, vector<1x1x32xf32>
    %65 = vector.shape_cast %64 : vector<1x1x32xf32> to vector<1x32xf32>
    %c0_32 = arith.constant 0 : index
    %c0_33 = arith.constant 0 : index
    %c0_34 = arith.constant 0 : index
    %66 = vector.load %arg9[%c0_32, %c0_33, %c0_34] : memref<2x1x32xf32, #tpu.memory_space<vmem>>, vector<1x1x32xf32>
    %67 = vector.shape_cast %66 : vector<1x1x32xf32> to vector<1x32xf32>
    %cst_35 = arith.constant dense<0.000000e+00> : vector<16xf32>
    %68 = vector.multi_reduction <add>, %63, %cst_35 [1] : vector<16x32xf32> to vector<16xf32>
    %69 = vector.shape_cast %68 : vector<16xf32> to vector<16x1xf32>
    %cst_36 = arith.constant 3.200000e+01 : f32
    %70 = vector.broadcast %cst_36 : f32 to vector<16x1xf32>
    %71 = arith.divf %69, %70 : vector<16x1xf32>
    %72 = vector.broadcast %71 : vector<16x1xf32> to vector<16x32xf32>
    %73 = arith.subf %63, %72 : vector<16x32xf32>
    %74 = arith.mulf %73, %73 : vector<16x32xf32>
    %cst_37 = arith.constant dense<0.000000e+00> : vector<16xf32>
    %75 = vector.multi_reduction <add>, %74, %cst_37 [1] : vector<16x32xf32> to vector<16xf32>
    %76 = vector.shape_cast %75 : vector<16xf32> to vector<16x1xf32>
    %cst_38 = arith.constant 3.200000e+01 : f32
    %77 = vector.broadcast %cst_38 : f32 to vector<16x1xf32>
    %78 = arith.divf %76, %77 : vector<16x1xf32>
    %79 = vector.broadcast %71 : vector<16x1xf32> to vector<16x32xf32>
    %80 = arith.subf %63, %79 : vector<16x32xf32>
    %cst_39 = arith.constant 9.99999974E-6 : f32
    %81 = vector.broadcast %cst_39 : f32 to vector<16x1xf32>
    %82 = arith.addf %78, %81 : vector<16x1xf32>
    %83 = math.rsqrt %82 : vector<16x1xf32>
    %84 = vector.broadcast %83 : vector<16x1xf32> to vector<16x32xf32>
    %85 = arith.mulf %80, %84 : vector<16x32xf32>
    %86 = vector.broadcast %65 : vector<1x32xf32> to vector<16x32xf32>
    %87 = arith.mulf %85, %86 : vector<16x32xf32>
    %88 = vector.broadcast %67 : vector<1x32xf32> to vector<16x32xf32>
    %89 = arith.addf %87, %88 : vector<16x32xf32>
    %c0_40 = arith.constant 0 : index
    %c0_41 = arith.constant 0 : index
    %c0_42 = arith.constant 0 : index
    %90 = vector.load %arg10[%c0_40, %c0_41, %c0_42] : memref<2x32x2048xbf16, #tpu.memory_space<vmem>>, vector<1x32x2048xbf16>
    %91 = vector.shape_cast %90 : vector<1x32x2048xbf16> to vector<32x2048xbf16>
    %92 = arith.truncf %89 : vector<16x32xf32> to vector<16x32xbf16>
    %cst_43 = arith.constant dense<0.000000e+00> : vector<16x2048xf32>
    %93 = tpu.matmul %92, %91, %cst_43 {dimension_numbers = #tpu.dot_dimension_numbers<[1], [0], [0], [1], [0, 0, 1, 1], [], []>} : vector<16x32xbf16>, vector<32x2048xbf16>, vector<16x2048xf32> -> vector<16x2048xf32>
    %c0_44 = arith.constant 0 : index
    %c0_45 = arith.constant 0 : index
    %c0_46 = arith.constant 0 : index
    %94 = vector.load %arg11[%c0_44, %c0_45, %c0_46] : memref<2x1x2048xf32, #tpu.memory_space<vmem>>, vector<1x1x2048xf32>
    %95 = vector.shape_cast %94 : vector<1x1x2048xf32> to vector<1x2048xf32>
    %96 = vector.broadcast %95 : vector<1x2048xf32> to vector<16x2048xf32>
    %97 = arith.addf %93, %96 : vector<16x2048xf32>
    %cst_47 = arith.constant 0.000000e+00 : f32
    %98 = vector.broadcast %cst_47 : f32 to vector<16x2048xf32>
    %99 = arith.maximumf %97, %98 : vector<16x2048xf32>
    %c0_48 = arith.constant 0 : index
    %c0_49 = arith.constant 0 : index
    %c0_50 = arith.constant 0 : index
    %100 = vector.load %arg12[%c0_48, %c0_49, %c0_50] : memref<2x2048x32xbf16, #tpu.memory_space<vmem>>, vector<1x2048x32xbf16>
    %101 = vector.shape_cast %100 : vector<1x2048x32xbf16> to vector<2048x32xbf16>
    %102 = arith.truncf %99 : vector<16x2048xf32> to vector<16x2048xbf16>
    %cst_51 = arith.constant dense<0.000000e+00> : vector<16x32xf32>
    %103 = tpu.matmul %102, %101, %cst_51 {dimension_numbers = #tpu.dot_dimension_numbers<[1], [0], [0], [1], [0, 0, 1, 1], [], []>} : vector<16x2048xbf16>, vector<2048x32xbf16>, vector<16x32xf32> -> vector<16x32xf32>
    %c0_52 = arith.constant 0 : index
    %c0_53 = arith.constant 0 : index
    %c0_54 = arith.constant 0 : index
    %104 = vector.load %arg13[%c0_52, %c0_53, %c0_54] : memref<2x1x32xf32, #tpu.memory_space<vmem>>, vector<1x1x32xf32>
    %105 = vector.shape_cast %104 : vector<1x1x32xf32> to vector<1x32xf32>
    %106 = vector.broadcast %105 : vector<1x32xf32> to vector<16x32xf32>
    %107 = arith.addf %103, %106 : vector<16x32xf32>
    %108 = arith.addf %89, %107 : vector<16x32xf32>
    %c0_55 = arith.constant 0 : index
    %c0_56 = arith.constant 0 : index
    %c0_57 = arith.constant 0 : index
    %109 = vector.load %arg14[%c0_55, %c0_56, %c0_57] : memref<2x1x32xf32, #tpu.memory_space<vmem>>, vector<1x1x32xf32>
    %110 = vector.shape_cast %109 : vector<1x1x32xf32> to vector<1x32xf32>
    %c0_58 = arith.constant 0 : index
    %c0_59 = arith.constant 0 : index
    %c0_60 = arith.constant 0 : index
    %111 = vector.load %arg15[%c0_58, %c0_59, %c0_60] : memref<2x1x32xf32, #tpu.memory_space<vmem>>, vector<1x1x32xf32>
    %112 = vector.shape_cast %111 : vector<1x1x32xf32> to vector<1x32xf32>
    %cst_61 = arith.constant dense<0.000000e+00> : vector<16xf32>
    %113 = vector.multi_reduction <add>, %108, %cst_61 [1] : vector<16x32xf32> to vector<16xf32>
    %114 = vector.shape_cast %113 : vector<16xf32> to vector<16x1xf32>
    %cst_62 = arith.constant 3.200000e+01 : f32
    %115 = vector.broadcast %cst_62 : f32 to vector<16x1xf32>
    %116 = arith.divf %114, %115 : vector<16x1xf32>
    %117 = vector.broadcast %116 : vector<16x1xf32> to vector<16x32xf32>
    %118 = arith.subf %108, %117 : vector<16x32xf32>
    %119 = arith.mulf %118, %118 : vector<16x32xf32>
    %cst_63 = arith.constant dense<0.000000e+00> : vector<16xf32>
    %120 = vector.multi_reduction <add>, %119, %cst_63 [1] : vector<16x32xf32> to vector<16xf32>
    %121 = vector.shape_cast %120 : vector<16xf32> to vector<16x1xf32>
    %cst_64 = arith.constant 3.200000e+01 : f32
    %122 = vector.broadcast %cst_64 : f32 to vector<16x1xf32>
    %123 = arith.divf %121, %122 : vector<16x1xf32>
    %124 = vector.broadcast %116 : vector<16x1xf32> to vector<16x32xf32>
    %125 = arith.subf %108, %124 : vector<16x32xf32>
    %cst_65 = arith.constant 9.99999974E-6 : f32
    %126 = vector.broadcast %cst_65 : f32 to vector<16x1xf32>
    %127 = arith.addf %123, %126 : vector<16x1xf32>
    %128 = math.rsqrt %127 : vector<16x1xf32>
    %129 = vector.broadcast %128 : vector<16x1xf32> to vector<16x32xf32>
    %130 = arith.mulf %125, %129 : vector<16x32xf32>
    %131 = vector.broadcast %110 : vector<1x32xf32> to vector<16x32xf32>
    %132 = arith.mulf %130, %131 : vector<16x32xf32>
    %133 = vector.broadcast %112 : vector<1x32xf32> to vector<16x32xf32>
    %134 = arith.addf %132, %133 : vector<16x32xf32>
    %c1 = arith.constant 1 : index
    %c0_66 = arith.constant 0 : index
    %c0_67 = arith.constant 0 : index
    %135 = vector.load %arg4[%c1, %c0_66, %c0_67] : memref<2x32x96xbf16, #tpu.memory_space<vmem>>, vector<1x32x96xbf16>
    %136 = vector.shape_cast %135 : vector<1x32x96xbf16> to vector<32x96xbf16>
    %137 = arith.truncf %134 : vector<16x32xf32> to vector<16x32xbf16>
    %cst_68 = arith.constant dense<0.000000e+00> : vector<16x96xf32>
    %138 = tpu.matmul %137, %136, %cst_68 {dimension_numbers = #tpu.dot_dimension_numbers<[1], [0], [0], [1], [0, 0, 1, 1], [], []>} : vector<16x32xbf16>, vector<32x96xbf16>, vector<16x96xf32> -> vector<16x96xf32>
    %c1_69 = arith.constant 1 : index
    %c0_70 = arith.constant 0 : index
    %c0_71 = arith.constant 0 : index
    %139 = vector.load %arg5[%c1_69, %c0_70, %c0_71] : memref<2x1x96xf32, #tpu.memory_space<vmem>>, vector<1x1x96xf32>
    %140 = vector.shape_cast %139 : vector<1x1x96xf32> to vector<1x96xf32>
    %141 = vector.broadcast %140 : vector<1x96xf32> to vector<16x96xf32>
    %142 = arith.addf %138, %141 : vector<16x96xf32>
    %143 = vector.extract_strided_slice %142 {offsets = [0, 0], sizes = [16, 32], strides = [1, 1]} : vector<16x96xf32> to vector<16x32xf32>
    %144 = vector.shape_cast %143 : vector<16x32xf32> to vector<2x8x32xf32>
    %145 = vector.extract_strided_slice %142 {offsets = [0, 32], sizes = [16, 32], strides = [1, 1]} : vector<16x96xf32> to vector<16x32xf32>
    %146 = vector.shape_cast %145 : vector<16x32xf32> to vector<2x8x32xf32>
    %147 = vector.extract_strided_slice %142 {offsets = [0, 64], sizes = [16, 32], strides = [1, 1]} : vector<16x96xf32> to vector<16x32xf32>
    %148 = vector.shape_cast %147 : vector<16x32xf32> to vector<2x8x32xf32>
    %149 = vector.shape_cast %144 : vector<2x8x32xf32> to vector<2x8x1x32xf32>
    %150 = vector.shape_cast %146 : vector<2x8x32xf32> to vector<2x1x8x32xf32>
    %151 = vector.broadcast %149 : vector<2x8x1x32xf32> to vector<2x8x8x32xf32>
    %152 = vector.broadcast %150 : vector<2x1x8x32xf32> to vector<2x8x8x32xf32>
    %153 = arith.mulf %151, %152 : vector<2x8x8x32xf32>
    %154 = vector.shape_cast %153 : vector<2x8x8x32xf32> to vector<128x32xf32>
    %155 = arith.truncf %154 : vector<128x32xf32> to vector<128x32xbf16>
    %cst_72 = arith.constant dense<0.000000e+00> : vector<128x4xf32>
    %156 = tpu.matmul %155, %0, %cst_72 {dimension_numbers = #tpu.dot_dimension_numbers<[1], [0], [0], [1], [0, 0, 1, 1], [], []>} : vector<128x32xbf16>, vector<32x4xbf16>, vector<128x4xf32> -> vector<128x4xf32>
    %157 = vector.shape_cast %156 : vector<128x4xf32> to vector<2x8x8x4xf32>
    %cst_73 = arith.constant dense<0xFF800000> : vector<2x8x4xf32>
    %158 = vector.multi_reduction <maximumf>, %157, %cst_73 [2] : vector<2x8x8x4xf32> to vector<2x8x4xf32>
    %159 = vector.shape_cast %158 : vector<2x8x4xf32> to vector<2x8x1x4xf32>
    %160 = vector.broadcast %159 : vector<2x8x1x4xf32> to vector<2x8x8x4xf32>
    %161 = arith.subf %157, %160 : vector<2x8x8x4xf32>
    %162 = math.exp %161 : vector<2x8x8x4xf32>
    %cst_74 = arith.constant dense<0.000000e+00> : vector<2x8x4xf32>
    %163 = vector.multi_reduction <add>, %162, %cst_74 [2] : vector<2x8x8x4xf32> to vector<2x8x4xf32>
    %164 = vector.shape_cast %163 : vector<2x8x4xf32> to vector<2x8x1x4xf32>
    %165 = tpu.reciprocal %164 {approx = true} : vector<2x8x1x4xf32> -> vector<2x8x1x4xf32>
    %166 = vector.broadcast %165 : vector<2x8x1x4xf32> to vector<2x8x8x4xf32>
    %167 = arith.mulf %162, %166 : vector<2x8x8x4xf32>
    %168 = vector.shape_cast %167 : vector<2x8x8x4xf32> to vector<128x4xf32>
    %169 = arith.truncf %168 : vector<128x4xf32> to vector<128x4xbf16>
    %cst_75 = arith.constant dense<0.000000e+00> : vector<128x32xf32>
    %170 = tpu.matmul %169, %1, %cst_75 {dimension_numbers = #tpu.dot_dimension_numbers<[1], [0], [0], [1], [0, 0, 1, 1], [], []>} : vector<128x4xbf16>, vector<4x32xbf16>, vector<128x32xf32> -> vector<128x32xf32>
    %171 = vector.shape_cast %170 : vector<128x32xf32> to vector<2x8x8x32xf32>
    %172 = vector.shape_cast %148 : vector<2x8x32xf32> to vector<2x1x8x32xf32>
    %173 = vector.broadcast %172 : vector<2x1x8x32xf32> to vector<2x8x8x32xf32>
    %174 = arith.mulf %171, %173 : vector<2x8x8x32xf32>
    %cst_76 = arith.constant dense<0.000000e+00> : vector<2x8x32xf32>
    %175 = vector.multi_reduction <add>, %174, %cst_76 [2] : vector<2x8x8x32xf32> to vector<2x8x32xf32>
    %176 = vector.shape_cast %175 : vector<2x8x32xf32> to vector<16x32xf32>
    %c1_77 = arith.constant 1 : index
    %c0_78 = arith.constant 0 : index
    %c0_79 = arith.constant 0 : index
    %177 = vector.load %arg6[%c1_77, %c0_78, %c0_79] : memref<2x32x32xbf16, #tpu.memory_space<vmem>>, vector<1x32x32xbf16>
    %178 = vector.shape_cast %177 : vector<1x32x32xbf16> to vector<32x32xbf16>
    %179 = arith.truncf %176 : vector<16x32xf32> to vector<16x32xbf16>
    %cst_80 = arith.constant dense<0.000000e+00> : vector<16x32xf32>
    %180 = tpu.matmul %179, %178, %cst_80 {dimension_numbers = #tpu.dot_dimension_numbers<[1], [0], [0], [1], [0, 0, 1, 1], [], []>} : vector<16x32xbf16>, vector<32x32xbf16>, vector<16x32xf32> -> vector<16x32xf32>
    %c1_81 = arith.constant 1 : index
    %c0_82 = arith.constant 0 : index
    %c0_83 = arith.constant 0 : index
    %181 = vector.load %arg7[%c1_81, %c0_82, %c0_83] : memref<2x1x32xf32, #tpu.memory_space<vmem>>, vector<1x1x32xf32>
    %182 = vector.shape_cast %181 : vector<1x1x32xf32> to vector<1x32xf32>
    %183 = vector.broadcast %182 : vector<1x32xf32> to vector<16x32xf32>
    %184 = arith.addf %180, %183 : vector<16x32xf32>
    %185 = arith.addf %134, %184 : vector<16x32xf32>
    %c1_84 = arith.constant 1 : index
    %c0_85 = arith.constant 0 : index
    %c0_86 = arith.constant 0 : index
    %186 = vector.load %arg8[%c1_84, %c0_85, %c0_86] : memref<2x1x32xf32, #tpu.memory_space<vmem>>, vector<1x1x32xf32>
    %187 = vector.shape_cast %186 : vector<1x1x32xf32> to vector<1x32xf32>
    %c1_87 = arith.constant 1 : index
    %c0_88 = arith.constant 0 : index
    %c0_89 = arith.constant 0 : index
    %188 = vector.load %arg9[%c1_87, %c0_88, %c0_89] : memref<2x1x32xf32, #tpu.memory_space<vmem>>, vector<1x1x32xf32>
    %189 = vector.shape_cast %188 : vector<1x1x32xf32> to vector<1x32xf32>
    %cst_90 = arith.constant dense<0.000000e+00> : vector<16xf32>
    %190 = vector.multi_reduction <add>, %185, %cst_90 [1] : vector<16x32xf32> to vector<16xf32>
    %191 = vector.shape_cast %190 : vector<16xf32> to vector<16x1xf32>
    %cst_91 = arith.constant 3.200000e+01 : f32
    %192 = vector.broadcast %cst_91 : f32 to vector<16x1xf32>
    %193 = arith.divf %191, %192 : vector<16x1xf32>
    %194 = vector.broadcast %193 : vector<16x1xf32> to vector<16x32xf32>
    %195 = arith.subf %185, %194 : vector<16x32xf32>
    %196 = arith.mulf %195, %195 : vector<16x32xf32>
    %cst_92 = arith.constant dense<0.000000e+00> : vector<16xf32>
    %197 = vector.multi_reduction <add>, %196, %cst_92 [1] : vector<16x32xf32> to vector<16xf32>
    %198 = vector.shape_cast %197 : vector<16xf32> to vector<16x1xf32>
    %cst_93 = arith.constant 3.200000e+01 : f32
    %199 = vector.broadcast %cst_93 : f32 to vector<16x1xf32>
    %200 = arith.divf %198, %199 : vector<16x1xf32>
    %201 = vector.broadcast %193 : vector<16x1xf32> to vector<16x32xf32>
    %202 = arith.subf %185, %201 : vector<16x32xf32>
    %cst_94 = arith.constant 9.99999974E-6 : f32
    %203 = vector.broadcast %cst_94 : f32 to vector<16x1xf32>
    %204 = arith.addf %200, %203 : vector<16x1xf32>
    %205 = math.rsqrt %204 : vector<16x1xf32>
    %206 = vector.broadcast %205 : vector<16x1xf32> to vector<16x32xf32>
    %207 = arith.mulf %202, %206 : vector<16x32xf32>
    %208 = vector.broadcast %187 : vector<1x32xf32> to vector<16x32xf32>
    %209 = arith.mulf %207, %208 : vector<16x32xf32>
    %210 = vector.broadcast %189 : vector<1x32xf32> to vector<16x32xf32>
    %211 = arith.addf %209, %210 : vector<16x32xf32>
    %c1_95 = arith.constant 1 : index
    %c0_96 = arith.constant 0 : index
    %c0_97 = arith.constant 0 : index
    %212 = vector.load %arg10[%c1_95, %c0_96, %c0_97] : memref<2x32x2048xbf16, #tpu.memory_space<vmem>>, vector<1x32x2048xbf16>
    %213 = vector.shape_cast %212 : vector<1x32x2048xbf16> to vector<32x2048xbf16>
    %214 = arith.truncf %211 : vector<16x32xf32> to vector<16x32xbf16>
    %cst_98 = arith.constant dense<0.000000e+00> : vector<16x2048xf32>
    %215 = tpu.matmul %214, %213, %cst_98 {dimension_numbers = #tpu.dot_dimension_numbers<[1], [0], [0], [1], [0, 0, 1, 1], [], []>} : vector<16x32xbf16>, vector<32x2048xbf16>, vector<16x2048xf32> -> vector<16x2048xf32>
    %c1_99 = arith.constant 1 : index
    %c0_100 = arith.constant 0 : index
    %c0_101 = arith.constant 0 : index
    %216 = vector.load %arg11[%c1_99, %c0_100, %c0_101] : memref<2x1x2048xf32, #tpu.memory_space<vmem>>, vector<1x1x2048xf32>
    %217 = vector.shape_cast %216 : vector<1x1x2048xf32> to vector<1x2048xf32>
    %218 = vector.broadcast %217 : vector<1x2048xf32> to vector<16x2048xf32>
    %219 = arith.addf %215, %218 : vector<16x2048xf32>
    %cst_102 = arith.constant 0.000000e+00 : f32
    %220 = vector.broadcast %cst_102 : f32 to vector<16x2048xf32>
    %221 = arith.maximumf %219, %220 : vector<16x2048xf32>
    %c1_103 = arith.constant 1 : index
    %c0_104 = arith.constant 0 : index
    %c0_105 = arith.constant 0 : index
    %222 = vector.load %arg12[%c1_103, %c0_104, %c0_105] : memref<2x2048x32xbf16, #tpu.memory_space<vmem>>, vector<1x2048x32xbf16>
    %223 = vector.shape_cast %222 : vector<1x2048x32xbf16> to vector<2048x32xbf16>
    %224 = arith.truncf %221 : vector<16x2048xf32> to vector<16x2048xbf16>
    %cst_106 = arith.constant dense<0.000000e+00> : vector<16x32xf32>
    %225 = tpu.matmul %224, %223, %cst_106 {dimension_numbers = #tpu.dot_dimension_numbers<[1], [0], [0], [1], [0, 0, 1, 1], [], []>} : vector<16x2048xbf16>, vector<2048x32xbf16>, vector<16x32xf32> -> vector<16x32xf32>
    %c1_107 = arith.constant 1 : index
    %c0_108 = arith.constant 0 : index
    %c0_109 = arith.constant 0 : index
    %226 = vector.load %arg13[%c1_107, %c0_108, %c0_109] : memref<2x1x32xf32, #tpu.memory_space<vmem>>, vector<1x1x32xf32>
    %227 = vector.shape_cast %226 : vector<1x1x32xf32> to vector<1x32xf32>
    %228 = vector.broadcast %227 : vector<1x32xf32> to vector<16x32xf32>
    %229 = arith.addf %225, %228 : vector<16x32xf32>
    %230 = arith.addf %211, %229 : vector<16x32xf32>
    %c1_110 = arith.constant 1 : index
    %c0_111 = arith.constant 0 : index
    %c0_112 = arith.constant 0 : index
    %231 = vector.load %arg14[%c1_110, %c0_111, %c0_112] : memref<2x1x32xf32, #tpu.memory_space<vmem>>, vector<1x1x32xf32>
    %232 = vector.shape_cast %231 : vector<1x1x32xf32> to vector<1x32xf32>
    %c1_113 = arith.constant 1 : index
    %c0_114 = arith.constant 0 : index
    %c0_115 = arith.constant 0 : index
    %233 = vector.load %arg15[%c1_113, %c0_114, %c0_115] : memref<2x1x32xf32, #tpu.memory_space<vmem>>, vector<1x1x32xf32>
    %234 = vector.shape_cast %233 : vector<1x1x32xf32> to vector<1x32xf32>
    %cst_116 = arith.constant dense<0.000000e+00> : vector<16xf32>
    %235 = vector.multi_reduction <add>, %230, %cst_116 [1] : vector<16x32xf32> to vector<16xf32>
    %236 = vector.shape_cast %235 : vector<16xf32> to vector<16x1xf32>
    %cst_117 = arith.constant 3.200000e+01 : f32
    %237 = vector.broadcast %cst_117 : f32 to vector<16x1xf32>
    %238 = arith.divf %236, %237 : vector<16x1xf32>
    %239 = vector.broadcast %238 : vector<16x1xf32> to vector<16x32xf32>
    %240 = arith.subf %230, %239 : vector<16x32xf32>
    %241 = arith.mulf %240, %240 : vector<16x32xf32>
    %cst_118 = arith.constant dense<0.000000e+00> : vector<16xf32>
    %242 = vector.multi_reduction <add>, %241, %cst_118 [1] : vector<16x32xf32> to vector<16xf32>
    %243 = vector.shape_cast %242 : vector<16xf32> to vector<16x1xf32>
    %cst_119 = arith.constant 3.200000e+01 : f32
    %244 = vector.broadcast %cst_119 : f32 to vector<16x1xf32>
    %245 = arith.divf %243, %244 : vector<16x1xf32>
    %246 = vector.broadcast %238 : vector<16x1xf32> to vector<16x32xf32>
    %247 = arith.subf %230, %246 : vector<16x32xf32>
    %cst_120 = arith.constant 9.99999974E-6 : f32
    %248 = vector.broadcast %cst_120 : f32 to vector<16x1xf32>
    %249 = arith.addf %245, %248 : vector<16x1xf32>
    %250 = math.rsqrt %249 : vector<16x1xf32>
    %251 = vector.broadcast %250 : vector<16x1xf32> to vector<16x32xf32>
    %252 = arith.mulf %247, %251 : vector<16x32xf32>
    %253 = vector.broadcast %232 : vector<1x32xf32> to vector<16x32xf32>
    %254 = arith.mulf %252, %253 : vector<16x32xf32>
    %255 = vector.broadcast %234 : vector<1x32xf32> to vector<16x32xf32>
    %256 = arith.addf %254, %255 : vector<16x32xf32>
    %257 = vector.shape_cast %256 : vector<16x32xf32> to vector<2x8x32xf32>
    %cst_121 = arith.constant dense<0.000000e+00> : vector<2x32xf32>
    %258 = vector.multi_reduction <add>, %257, %cst_121 [1] : vector<2x8x32xf32> to vector<2x32xf32>
    %cst_122 = arith.constant 8.000000e+00 : f32
    %259 = vector.broadcast %cst_122 : f32 to vector<2x32xf32>
    %260 = arith.divf %258, %259 : vector<2x32xf32>
    %c0_123 = arith.constant 0 : index
    %c0_124 = arith.constant 0 : index
    %261 = vector.load %arg16[%c0_123, %c0_124] : memref<32x256xbf16, #tpu.memory_space<vmem>>, vector<32x256xbf16>
    %262 = arith.truncf %260 : vector<2x32xf32> to vector<2x32xbf16>
    %cst_125 = arith.constant dense<0.000000e+00> : vector<2x256xf32>
    %263 = tpu.matmul %262, %261, %cst_125 {dimension_numbers = #tpu.dot_dimension_numbers<[1], [0], [0], [1], [0, 0, 1, 1], [], []>} : vector<2x32xbf16>, vector<32x256xbf16>, vector<2x256xf32> -> vector<2x256xf32>
    %c0_126 = arith.constant 0 : index
    %c0_127 = arith.constant 0 : index
    %264 = vector.load %arg17[%c0_126, %c0_127] : memref<1x256xf32, #tpu.memory_space<vmem>>, vector<1x256xf32>
    %265 = vector.broadcast %264 : vector<1x256xf32> to vector<2x256xf32>
    %266 = arith.addf %263, %265 : vector<2x256xf32>
    %cst_128 = arith.constant 0.000000e+00 : f32
    %267 = vector.broadcast %cst_128 : f32 to vector<2x256xf32>
    %268 = arith.maximumf %266, %267 : vector<2x256xf32>
    %c0_129 = arith.constant 0 : index
    %c0_130 = arith.constant 0 : index
    %269 = vector.load %arg18[%c0_129, %c0_130] : memref<256x5xbf16, #tpu.memory_space<vmem>>, vector<256x5xbf16>
    %270 = arith.truncf %268 : vector<2x256xf32> to vector<2x256xbf16>
    %cst_131 = arith.constant dense<0.000000e+00> : vector<2x5xf32>
    %271 = tpu.matmul %270, %269, %cst_131 {dimension_numbers = #tpu.dot_dimension_numbers<[1], [0], [0], [1], [0, 0, 1, 1], [], []>} : vector<2x256xbf16>, vector<256x5xbf16>, vector<2x5xf32> -> vector<2x5xf32>
    %c0_132 = arith.constant 0 : index
    %c0_133 = arith.constant 0 : index
    %272 = vector.load %arg19[%c0_132, %c0_133] : memref<1x5xf32, #tpu.memory_space<vmem>>, vector<1x5xf32>
    %273 = vector.broadcast %272 : vector<1x5xf32> to vector<2x5xf32>
    %274 = arith.addf %271, %273 : vector<2x5xf32>
    %c0_134 = arith.constant 0 : index
    %c0_135 = arith.constant 0 : index
    %c0_136 = arith.constant 0 : index
    %275 = vector.load %arg22[%c0_134, %c0_135, %c0_136] : memref<1x2x5xf32, #tpu.memory_space<vmem>>, vector<1x2x5xf32>
    %276 = vector.shape_cast %275 : vector<1x2x5xf32> to vector<2x5xf32>
    %277 = vector.shape_cast %274 : vector<2x5xf32> to vector<1x2x5xf32>
    tpu.vector_store %arg22[%c0_134, %c0_135, %c0_136], %277 {strides = array<i32>} : memref<1x2x5xf32, #tpu.memory_space<vmem>>, vector<1x2x5xf32>,
    return
  }
  func.func @transform_0(%arg0: i32) -> (i32, i32, i32) {
    %c0_i32 = arith.constant 0 : i32
    %c0_i32_0 = arith.constant 0 : i32
    %c0_i32_1 = arith.constant 0 : i32
    return %arg0, %c0_i32, %c0_i32_0 : i32, i32, i32
  }
  func.func @transform_1(%arg0: i32) -> (i32, i32) {
    %c0_i32 = arith.constant 0 : i32
    %c0_i32_0 = arith.constant 0 : i32
    %c0_i32_1 = arith.constant 0 : i32
    return %c0_i32, %c0_i32_0 : i32, i32
  }
  func.func @transform_2(%arg0: i32) -> (i32, i32) {
    %c0_i32 = arith.constant 0 : i32
    %c0_i32_0 = arith.constant 0 : i32
    %c0_i32_1 = arith.constant 0 : i32
    return %c0_i32, %c0_i32_0 : i32, i32
  }
  func.func @transform_3(%arg0: i32) -> (i32, i32, i32) {
    %c0_i32 = arith.constant 0 : i32
    %c0_i32_0 = arith.constant 0 : i32
    %c0_i32_1 = arith.constant 0 : i32
    %c0_i32_2 = arith.constant 0 : i32
    return %c0_i32, %c0_i32_0, %c0_i32_1 : i32, i32, i32
  }
  func.func @transform_4(%arg0: i32) -> (i32, i32, i32) {
    %c0_i32 = arith.constant 0 : i32
    %c0_i32_0 = arith.constant 0 : i32
    %c0_i32_1 = arith.constant 0 : i32
    %c0_i32_2 = arith.constant 0 : i32
    return %c0_i32, %c0_i32_0, %c0_i32_1 : i32, i32, i32
  }
  func.func @transform_5(%arg0: i32) -> (i32, i32, i32) {
    %c0_i32 = arith.constant 0 : i32
    %c0_i32_0 = arith.constant 0 : i32
    %c0_i32_1 = arith.constant 0 : i32
    %c0_i32_2 = arith.constant 0 : i32
    return %c0_i32, %c0_i32_0, %c0_i32_1 : i32, i32, i32
  }
  func.func @transform_6(%arg0: i32) -> (i32, i32, i32) {
    %c0_i32 = arith.constant 0 : i32
    %c0_i32_0 = arith.constant 0 : i32
    %c0_i32_1 = arith.constant 0 : i32
    %c0_i32_2 = arith.constant 0 : i32
    return %c0_i32, %c0_i32_0, %c0_i32_1 : i32, i32, i32
  }
  func.func @transform_7(%arg0: i32) -> (i32, i32, i32) {
    %c0_i32 = arith.constant 0 : i32
    %c0_i32_0 = arith.constant 0 : i32
    %c0_i32_1 = arith.constant 0 : i32
    %c0_i32_2 = arith.constant 0 : i32
    return %c0_i32, %c0_i32_0, %c0_i32_1 : i32, i32, i32
  }
  func.func @transform_8(%arg0: i32) -> (i32, i32, i32) {
    %c0_i32 = arith.constant 0 : i32
    %c0_i32_0 = arith.constant 0 : i32
    %c0_i32_1 = arith.constant 0 : i32
    %c0_i32_2 = arith.constant 0 : i32
    return %c0_i32, %c0_i32_0, %c0_i32_1 : i32, i32, i32
  }
  func.func @transform_9(%arg0: i32) -> (i32, i32, i32) {
    %c0_i32 = arith.constant 0 : i32
    %c0_i32_0 = arith.constant 0 : i32
    %c0_i32_1 = arith.constant 0 : i32
    %c0_i32_2 = arith.constant 0 : i32
    return %c0_i32, %c0_i32_0, %c0_i32_1 : i32, i32, i32
  }
  func.func @transform_10(%arg0: i32) -> (i32, i32, i32) {
    %c0_i32 = arith.constant 0 : i32
    %c0_i32_0 = arith.constant 0 : i32
    %c0_i32_1 = arith.constant 0 : i32
    %c0_i32_2 = arith.constant 0 : i32
    return %c0_i32, %c0_i32_0, %c0_i32_1 : i32, i32, i32
  }
  func.func @transform_11(%arg0: i32) -> (i32, i32, i32) {
    %c0_i32 = arith.constant 0 : i32
    %c0_i32_0 = arith.constant 0 : i32
    %c0_i32_1 = arith.constant 0 : i32
    %c0_i32_2 = arith.constant 0 : i32
    return %c0_i32, %c0_i32_0, %c0_i32_1 : i32, i32, i32
  }
  func.func @transform_12(%arg0: i32) -> (i32, i32, i32) {
    %c0_i32 = arith.constant 0 : i32
    %c0_i32_0 = arith.constant 0 : i32
    %c0_i32_1 = arith.constant 0 : i32
    %c0_i32_2 = arith.constant 0 : i32
    return %c0_i32, %c0_i32_0, %c0_i32_1 : i32, i32, i32
  }
  func.func @transform_13(%arg0: i32) -> (i32, i32, i32) {
    %c0_i32 = arith.constant 0 : i32
    %c0_i32_0 = arith.constant 0 : i32
    %c0_i32_1 = arith.constant 0 : i32
    %c0_i32_2 = arith.constant 0 : i32
    return %c0_i32, %c0_i32_0, %c0_i32_1 : i32, i32, i32
  }
  func.func @transform_14(%arg0: i32) -> (i32, i32, i32) {
    %c0_i32 = arith.constant 0 : i32
    %c0_i32_0 = arith.constant 0 : i32
    %c0_i32_1 = arith.constant 0 : i32
    %c0_i32_2 = arith.constant 0 : i32
    return %c0_i32, %c0_i32_0, %c0_i32_1 : i32, i32, i32
  }
  func.func @transform_15(%arg0: i32) -> (i32, i32) {
    %c0_i32 = arith.constant 0 : i32
    %c0_i32_0 = arith.constant 0 : i32
    %c0_i32_1 = arith.constant 0 : i32
    return %c0_i32, %c0_i32_0 : i32, i32
  }
  func.func @transform_16(%arg0: i32) -> (i32, i32) {
    %c0_i32 = arith.constant 0 : i32
    %c0_i32_0 = arith.constant 0 : i32
    %c0_i32_1 = arith.constant 0 : i32
    return %c0_i32, %c0_i32_0 : i32, i32
  }
  func.func @transform_17(%arg0: i32) -> (i32, i32) {
    %c0_i32 = arith.constant 0 : i32
    %c0_i32_0 = arith.constant 0 : i32
    %c0_i32_1 = arith.constant 0 : i32
    return %c0_i32, %c0_i32_0 : i32, i32
  }
  func.func @transform_18(%arg0: i32) -> (i32, i32) {
    %c0_i32 = arith.constant 0 : i32
    %c0_i32_0 = arith.constant 0 : i32
    %c0_i32_1 = arith.constant 0 : i32
    return %c0_i32, %c0_i32_0 : i32, i32
  }
  func.func @transform_19(%arg0: i32) -> (i32, i32) {
    %c0_i32 = arith.constant 0 : i32
    %c0_i32_0 = arith.constant 0 : i32
    %c0_i32_1 = arith.constant 0 : i32
    return %c0_i32, %c0_i32_0 : i32, i32
  }
  func.func @transform_20(%arg0: i32) -> (i32, i32) {
    %c0_i32 = arith.constant 0 : i32
    %c0_i32_0 = arith.constant 0 : i32
    %c0_i32_1 = arith.constant 0 : i32
    return %c0_i32, %c0_i32_0 : i32, i32
  }
  func.func @transform_21(%arg0: i32) -> (i32, i32, i32) {
    %c0_i32 = arith.constant 0 : i32
    %c0_i32_0 = arith.constant 0 : i32
    %c0_i32_1 = arith.constant 0 : i32
    return %arg0, %c0_i32, %c0_i32_0 : i32, i32, i32
  }
}

</mosaic_0001>

<bundles_post_ra>
// kernel: tpu_custom_call.1
= control target key start
LH: loop header
LB: loop body
LE: loop exit
PB: predicated region body
PF: predicated region fallthrough
CT: control target
= control target key end

     0   :  { %s10685_s0 = inlined_call_operand.vmem [shape: f32[1,16,16], index: 0, kind: input, shape index: {}]   ;;  %s10686_s1 = inlined_call_operand.vmem [shape: f32[8,32], index: 1, kind: input, shape index: {}]   ;;  %s10687_s2 = inlined_call_operand.vmem [shape: bf16[16,32], index: 2, kind: input, shape index: {}]   ;;  %s10688_s3 = inlined_call_operand.vmem [shape: bf16[2,32,96], index: 3, kind: input, shape index: {}]   ;;  %s10689_s4 = inlined_call_operand.vmem [shape: f32[2,1,96], index: 4, kind: input, shape index: {}]   ;;  %s10690_s5 = inlined_call_operand.vmem [shape: bf16[2,32,32], index: 5, kind: input, shape index: {}]   ;;  %s10691_s6 = inlined_call_operand.vmem [shape: f32[2,1,32], index: 6, kind: input, shape index: {}]   ;;  %s10692_s7 = inlined_call_operand.vmem [shape: f32[2,1,32], index: 7, kind: input, shape index: {}]   ;;  %s10693_s8 = inlined_call_operand.vmem [shape: f32[2,1,32], index: 8, kind: input, shape index: {}]   ;;  %s10694_s9 = inlined_call_operand.vmem [shape: bf16[2,32,2048], index: 9, kind: input, shape index: {}]   ;;  %s10695_s10 = inlined_call_operand.vmem [shape: f32[2,1,2048], index: 10, kind: input, shape index: {}]   ;;  %s10696_s11 = inlined_call_operand.vmem [shape: bf16[2,2048,32], index: 11, kind: input, shape index: {}]   ;;  %s10697_s12 = inlined_call_operand.vmem [shape: f32[2,1,32], index: 12, kind: input, shape index: {}]   ;;  %s10698_s13 = inlined_call_operand.vmem [shape: f32[2,1,32], index: 13, kind: input, shape index: {}]   ;;  %s10699_s14 = inlined_call_operand.vmem [shape: f32[2,1,32], index: 14, kind: input, shape index: {}]   ;;  %s10700_s15 = inlined_call_operand.vmem [shape: bf16[32,256], index: 15, kind: input, shape index: {}]   ;;  %s10701_s16 = inlined_call_operand.vmem [shape: f32[1,256], index: 16, kind: input, shape index: {}]   ;;  %s10702_s17 = inlined_call_operand.vmem [shape: bf16[256,5], index: 17, kind: input, shape index: {}]   ;;  %s10703_s18 = inlined_call_operand.vmem [shape: f32[1,5], index: 18, kind: input, shape index: {}]   ;;  %s10704_s19 = inlined_call_operand.vmem [shape: bf16[32,4], index: 19, kind: input, shape index: {}]   ;;  %s10705_s20 = inlined_call_operand.vmem [shape: bf16[4,32], index: 20, kind: input, shape index: {}]   ;;  %s10706_s21 = inlined_call_operand.hbm [shape: f32[1,2,5], index: 21, kind: output, shape index: {}]  }
   0x1   :  { %10711 = sst [smem:[#allocation5_spill]] %s10685_s0 }
   0x2   :  { %10712 = sst [smem:[#allocation6_spill]] %s10686_s1 }
   0x3   :  { %10713 = sst [smem:[#allocation7_spill]] %s10687_s2 }
   0x4   :  { %10714 = sst [smem:[#allocation8_spill]] %s10688_s3 }
   0x5   :  { %10715 = sst [smem:[#allocation9_spill]] %s10689_s4 }
   0x6   :  { %10716 = sst [smem:[#allocation10_spill]] %s10690_s5 }
   0x7   :  { %s10717_s26 = sld [smem:[#allocation7_spill]]  ;;  %v8648_v1 = vmov 0.0   ;;  %s10718_s28 = sld [smem:[#allocation5_spill]]  ;;  %vm8649_vm0 = vmmov 0   ;;  %vm86_vm1 = vcmask 130048  }
   0x8   :  { %8061 = vmatprep.subr.bf16.mxu1 %v8648_v1  ;;  %8063 = vmatprep.mubr.msk.bf16.mxu1 %vm8649_vm0, %v8648_v1  ;;  %s10719_s5 = sld [smem:[#allocation8_spill]] }
   0xd   :  { %v8188_v0 = vld [vmem:[%s10717_s26] sm:$0xff]   ;;  %v76_v3 = vld [vmem:[%s10718_s28 + $0x8] sm:$0xff] }
   0xe   :  { %v75_v2 = vld [vmem:[%s10718_s28] sm:$0xff]  ;;  %8062 = vmatpush3.bf16.msra.mxu1 %v8188_v0  ;;  %v8190_v6 = vld [vmem:[%s10719_s5 + $0x8] sm:$0xff]  }
   0xf   :  { %v79_v4 = vpack.c.bf16 %v76_v3, %v75_v2  ;;  %v8189_v5 = vld [vmem:[%s10719_s5] sm:$0xff]   ;;  %8067 = vmatprep.subr.bf16.mxu1 %v8648_v1 }
  0x11   :  { %8064 = vmatmul.mubr.msk.bf16.vlgmr.msra.gmra.mrb[0].mxu1 %vm86_vm1, %v79_v4 }
  0x12   :  { %8068 = vmatpush3.bf16.msra.mxu1 %v8189_v5  ;;  %8071 = vmatprep.mubr.msk.bf16.mxu1 %vm8649_vm0, %v8648_v1 }
  0x13   :  { %8069 = vmatprep.subr.bf16.mxu1 %v8648_v1 }
  0x16   :  { %8070 = vmatpush3.bf16.msra.mxu1 %v8190_v6 }
  0x17   :  { %26 = vsyncpa [#allocation3], 0  ;;  %s10720_s2 = sld [smem:[#allocation6_spill]]  ;;  %vm158_vm2 = vcmask 261120   ;;  %v8191_v15 = vld [vmem:[%s10704_s19] sm:$0xff]   ;;  %v8192_v16 = vld [vmem:[%s10704_s19 + $0x8] sm:$0xff]   ;;  %v209_v26 = vlaneseq }
  0x18   :  { %8075 = vmatprep.subr.bf16.mxu0 %v8191_v15  ;;  %8175 = vmatprep.subr.bf16.mxu1 %v8191_v15  ;;  %s10721_s0 = sld [smem:[#allocation9_spill]]  ;;  %s8650_s4 = smov 64   ;;  %v8652_v24 = vmov 1966171168   ;;  %vm883_vm3 = vcmask 1041408   ;;  %vm546_vm4 = vcmask 31744  }
  0x19   :  { %8076 = vmatpush3.bf16.msra.mxu0 %v8191_v15  ;;  %s8651_s30 = smov 96   ;;  %v207_v25 = vunpack.c.l.s4 %v8652_v24  ;;  %v8811_v28 = vshrl.u32 %v209_v26, 7  ;;  %vm1177_vm5 = vcmask 1041409   ;;  %vm1179_vm6 = vcmask 1042434  }
  0x1a   :  { %8077 = vmatprep.subr.bf16.mxu0 %v8192_v16  ;;  %vm1181_vm7 = vcmask 1043459   ;;  %vm1183_vm8 = vcmask 1044484   ;;  %vm1185_vm9 = vcmask 1045509   ;;  %vm1187_vm10 = vcmask 1046534  }
  0x1b   :  { %v208_v27 = vunpack.c.0.s8 %v207_v25  ;;  %v8822_v40 = vsub.s32 0, %v8811_v28  ;;  %vm1189_vm11 = vcmask 1047559   ;;  %vm6894_vm12 = vcmask 33792  }
  0x1d   :  { %v131_v8 = vld [vmem:[%s10720_s2] sm:$0xff]  ;;  %8078 = vmatpush3.bf16.msra.mxu0 %v8192_v16  ;;  %v8814_v29 = vsub.s32 %v208_v27, %v8811_v28  ;;  %s10722_s2 = sld [smem:[#allocation10_spill]] }
  0x1e   :  { %8113 = vmatprep.subr.bf16.mxu0 %v8648_v1  ;;  %v6912_v17 = vld [vmem:[%s10721_s0] ss:$0 sm:$0xff] }
  0xe4   :  { %v124_v7 = vpop.f32.mrb[0].mxu1 }
  0xe5   :  { %v8065_v9 = vpop.f32.mrb[1].mxu1  ;;  %v8790_v11 = vadd.f32 %v131_v8, %v124_v7 }
  0xe6   :  { %v127_v10 = vpop.f32.mrb[2].mxu1 }
  0xe7   :  { %v8792_v12 = vadd.f32 %v131_v8, %v127_v10  ;;  %v8066_v13 = vpop.f32.mrb[3].mxu1 }
  0xe9   :  { %v138_v14 = vpack.c.bf16 %v8792_v12, %v8790_v11 }
  0xeb   :  { %8072 = vmatmul.mubr.msk.bf16.vlgmr.msra.gmra.mrb[4].mxu1 %vm158_vm2, %v138_v14 }
  0xec   :  { %8177 = vmatpush3.bf16.msra.mxu1 %v8191_v15 }
  0xed   :  { %8176 = vmatprep.subr.bf16.mxu1 %v8192_v16 }
  0xf0   :  { %8178 = vmatpush3.bf16.msra.mxu1 %v8192_v16 }
 0x1be   :  { %v196_v18 = vpop.f32.mrb[4].mxu1 }
 0x1bf   :  { %v197_v19 = vadd.f32 %v6912_v17, %v196_v18  ;;  %v8073_v20 = vpop.f32.mrb[5].mxu1 }
 0x1c0   :  { %v199_v21 = vpop.f32.mrb[6].mxu1 }
 0x1c1   :  { %984 = vrot.lane.b32.xlu1 %v197_v19, %s8650_s4  ;;  %383 = vrot.lane.b32.xlu0 %v197_v19, %s8651_s30  ;;  %v8074_v22 = vpop.f32.mrb[7].mxu1  ;;  %v200_v23 = vadd.f32 %v6912_v17, %v199_v21  ;;  %v212_v30 = vrot.slane %v197_v19, %v8814_v29  ;;  %v205_v31 = vcombine.high %v197_v19, %v197_v19 }
 0x1c3   :  { %v254_v32 = vcombine.high %v200_v23, %v200_v23  ;;  %v220_v33 = vcombine.high %v212_v30, %v212_v30  ;;  %v219_v34 = vrot.slane %v205_v31, %v8814_v29  ;;  %v228_v36 = vrot.slane %v212_v30, %v8814_v29 }
 0x1c4   :  { %v261_v41 = vrot.slane %v200_v23, %v8814_v29 }
 0x1c5   :  { %986 = vrot.lane.b32.xlu1 %v200_v23, %s8650_s4  ;;  %385 = vrot.lane.b32.xlu0 %v200_v23, %s8651_s30  ;;  %v268_v35 = vrot.slane %v254_v32, %v8814_v29  ;;  %v242_v37 = vrot.slane %v220_v33, %v8814_v29  ;;  %v221_v38 = vcombine.high %v219_v34, %v219_v34 }
 0x1c6   :  { %v235_v42 = vrot.slane %v219_v34, %v8814_v29  ;;  %v250_v44 = vcombine.high %v228_v36, %v228_v36  ;;  %v269_v48 = vcombine.high %v261_v41, %v261_v41  ;;  %v306_v49 = vrot.slane %v228_v36, %v8822_v40 }
 0x1c7   :  { %v270_v39 = vcombine.high %v268_v35, %v268_v35  ;;  %v284_v43 = vrot.slane %v268_v35, %v8814_v29  ;;  %v252_v45 = vcombine.high %v242_v37, %v242_v37  ;;  %v249_v46 = vrot.slane %v221_v38, %v8814_v29 }
 0x1c8   :  { %v310_v50 = vrot.slane %v242_v37, %v8822_v40  ;;  %v314_v52 = vrot.slane %v250_v44, %v8822_v40  ;;  %v322_v54 = vrot.slane %v235_v42, %v8822_v40  ;;  %v251_v58 = vcombine.high %v235_v42, %v235_v42 }
 0x1c9   :  { %v298_v47 = vrot.slane %v270_v39, %v8814_v29  ;;  %v300_v51 = vcombine.high %v284_v43, %v284_v43  ;;  %v318_v53 = vrot.slane %v252_v45, %v8822_v40  ;;  %v326_v56 = vrot.slane %v249_v46, %v8822_v40 }
 0x1ca   :  { %v253_v59 = vcombine.high %v249_v46, %v249_v46  ;;  %v277_v3 = vrot.slane %v261_v41, %v8814_v29  ;;  %v291_v4 = vrot.slane %v269_v48, %v8814_v29  ;;  %v354_v7 = vrot.slane %v284_v43, %v8822_v40  ;;  %v74_v41 = vld [vmem:[%s10705_s20] sm:$0x3] }
 0x1cb   :  { %v302_v57 = vcombine.high %v298_v47, %v298_v47  ;;  %v358_v8 = vrot.slane %v298_v47, %v8822_v40  ;;  %v362_v9 = vrot.slane %v300_v51, %v8822_v40  ;;  %v330_v15 = vrot.slane %v251_v58, %v8822_v40  ;;  %8179 = vmatprep.subr.msk.bf16.mxu1 %vm883_vm3, %v74_v41 }
 0x1cc   :  { %v334_v16 = vrot.slane %v253_v59, %v8822_v40  ;;  %v338_v21 = vrot.slane %v277_v3, %v8822_v40  ;;  %v342_v22 = vrot.slane %v291_v4, %v8822_v40  ;;  %v299_v31 = vcombine.high %v277_v3, %v277_v3 }
 0x1cd   :  { %v366_v10 = vrot.slane %v302_v57, %v8822_v40  ;;  %v301_v32 = vcombine.high %v291_v4, %v291_v4  ;;  %v8862_v42 = vsel %vm883_vm3, %v74_v41, 0 }
 0x1ce   :  { %v346_v35 = vrot.slane %v299_v31, %v8822_v40 }
 0x1cf   :  { %v350_v36 = vrot.slane %v301_v32, %v8822_v40 }
 0x233   :  { %v384_v55 = vpop.permute.xlu0 %383 }
 0x234   :  { %v389_v60 = vmul.f32 %v384_v55, %v306_v49  ;;  %v390_v61 = vmul.f32 %v384_v55, %v310_v50  ;;  %v391_v62 = vmul.f32 %v384_v55, %v314_v52  ;;  %v392_v63 = vmul.f32 %v384_v55, %v318_v53 }
 0x235   :  { %v393_v0 = vmul.f32 %v384_v55, %v322_v54  ;;  %v394_v2 = vmul.f32 %v384_v55, %v326_v56  ;;  %v395_v25 = vmul.f32 %v384_v55, %v330_v15  ;;  %v396_v26 = vmul.f32 %v384_v55, %v334_v16 }
 0x236   :  { %v405_v5 = vpack.c.bf16 %v390_v61, %v389_v60  ;;  %v406_v6 = vpack.c.bf16 %v392_v63, %v391_v62 }
 0x237   :  { %v386_v13 = vpop.permute.xlu0 %385  ;;  %v407_v14 = vpack.c.bf16 %v394_v2, %v393_v0  ;;  %v408_v33 = vpack.c.bf16 %v396_v26, %v395_v25 }
 0x238   :  { %8079 = vmatprep.mubr.msk.bf16.mxu0 %vm158_vm2, %v405_v5  ;;  %v401_v17 = vmul.f32 %v386_v13, %v354_v7  ;;  %v402_v18 = vmul.f32 %v386_v13, %v358_v8  ;;  %v403_v19 = vmul.f32 %v386_v13, %v362_v9  ;;  %v404_v20 = vmul.f32 %v386_v13, %v366_v10 }
 0x239   :  { %8080 = vmatmul.mubr.msk.bf16.vlgmr.msra.gmra.mrb[0].mxu0 %vm158_vm2, %v406_v6  ;;  %v397_v27 = vmul.f32 %v386_v13, %v338_v21  ;;  %v398_v30 = vmul.f32 %v386_v13, %v342_v22  ;;  %v399_v37 = vmul.f32 %v386_v13, %v346_v35  ;;  %v400_v38 = vmul.f32 %v386_v13, %v350_v36 }
 0x23a   :  { %8083 = vmatprep.mubr.msk.bf16.mxu0 %vm158_vm2, %v407_v14  ;;  %v411_v23 = vpack.c.bf16 %v402_v18, %v401_v17  ;;  %v412_v24 = vpack.c.bf16 %v404_v20, %v403_v19 }
 0x23b   :  { %v409_v34 = vpack.c.bf16 %v398_v30, %v397_v27  ;;  %v410_v39 = vpack.c.bf16 %v400_v38, %v399_v37 }
 0x23c   :  { %8091 = vmatprep.mubr.msk.bf16.mxu1 %vm158_vm2, %v411_v23 }
 0x23d   :  { %8092 = vmatmul.mubr.msk.bf16.vlgmr.msra.gmra.mrb[8].mxu1 %vm158_vm2, %v412_v24 }
 0x23e   :  { %8096 = vmatpush3.bf16.msra.mxu1 %v8862_v42 }
 0x241   :  { %8084 = vmatmul.mubr.msk.bf16.gmra.mrb[4].mxu0 %vm158_vm2, %v408_v33 }
 0x242   :  { %8087 = vmatprep.mubr.msk.bf16.mxu0 %vm158_vm2, %v409_v34 }
 0x249   :  { %8088 = vmatmul.mubr.msk.bf16.gmra.mrb[8].mxu0 %vm158_vm2, %v410_v39 }
 0x24a   :  { %8117 = vmatprep.mubr.msk.bf16.mxu0 %vm8649_vm0, %v8648_v1 }
 0x30c   :  { %v8081_v43 = vpop.f32.mrb[0].mxu0 }
 0x30d   :  { %v561_v44 = vsel %vm546_vm4, %v8081_v43, -inf  ;;  %v8866_v45 = vpop.f32.mrb[1].mxu0 }
 0x30e   :  { %v562_v46 = vrot.slane %v561_v44, 4  ;;  %v547_v47 = vsel %vm546_vm4, %v8866_v45, -inf  ;;  %v8870_v48 = vpop.f32.mrb[2].mxu0 }
 0x30f   :  { %v548_v49 = vrot.slane %v547_v47, 4  ;;  %v568_v50 = vsel %vm546_vm4, %v8870_v48, -inf  ;;  %v8874_v51 = vpop.f32.mrb[3].mxu0 }
 0x310   :  { %v563_v52 = vmax.f32 %v561_v44, %v562_v46  ;;  %v569_v53 = vrot.slane %v568_v50, 4  ;;  %v554_v54 = vsel %vm546_vm4, %v8874_v51, -inf  ;;  %v8878_v57 = vpop.f32.mrb[8].mxu1 }
 0x311   :  { %v549_v55 = vmax.f32 %v547_v47, %v548_v49  ;;  %v555_v56 = vrot.slane %v554_v54, 4  ;;  %v645_v60 = vsel %vm546_vm4, %v8878_v57, -inf  ;;  %v8882_v61 = vpop.f32.mrb[9].mxu1 }
 0x312   :  { %v564_v58 = vrot.slane %v563_v52, 2  ;;  %v570_v59 = vmax.f32 %v568_v50, %v569_v53  ;;  %v646_v0 = vrot.slane %v645_v60, 4  ;;  %v631_v2 = vsel %vm546_vm4, %v8882_v61, -inf  ;;  %v8886_v3 = vpop.f32.mrb[10].mxu1 }
 0x313   :  { %v550_v62 = vrot.slane %v549_v55, 2  ;;  %v556_v63 = vmax.f32 %v554_v54, %v555_v56  ;;  %v632_v6 = vrot.slane %v631_v2, 4  ;;  %v652_v7 = vsel %vm546_vm4, %v8886_v3, -inf  ;;  %v8890_v8 = vpop.f32.mrb[11].mxu1 }
 0x314   :  { %v565_v4 = vmax.f32 %v563_v52, %v564_v58  ;;  %v571_v5 = vrot.slane %v570_v59, 2  ;;  %v8892_v9 = vpop.f32.mrb[4].mxu0  ;;  %v647_v14 = vmax.f32 %v645_v60, %v646_v0  ;;  %v653_v15 = vrot.slane %v652_v7, 4 }
 0x315   :  { %v551_v10 = vmax.f32 %v549_v55, %v550_v62  ;;  %v557_v13 = vrot.slane %v556_v63, 2  ;;  %v8894_v16 = vpop.f32.mrb[5].mxu0  ;;  %v633_v19 = vmax.f32 %v631_v2, %v632_v6  ;;  %v638_v20 = vsel %vm546_vm4, %v8890_v8, -inf }
 0x316   :  { %v566_v17 = vrot.slane %v565_v4, 1  ;;  %v572_v18 = vmax.f32 %v570_v59, %v571_v5  ;;  %v8898_v21 = vpop.f32.mrb[6].mxu0  ;;  %v648_v24 = vrot.slane %v647_v14, 2  ;;  %v654_v25 = vmax.f32 %v652_v7, %v653_v15 }
 0x317   :  { %v552_v22 = vrot.slane %v551_v10, 1  ;;  %v558_v23 = vmax.f32 %v556_v63, %v557_v13  ;;  %v8900_v26 = vpop.f32.mrb[7].mxu0  ;;  %v634_v31 = vrot.slane %v633_v19, 2  ;;  %v639_v32 = vrot.slane %v638_v20, 4 }
 0x318   :  { %v567_v27 = vmax.f32 %v565_v4, %v566_v17  ;;  %v573_v30 = vrot.slane %v572_v18, 1  ;;  %v649_v35 = vmax.f32 %v647_v14, %v648_v24  ;;  %v655_v36 = vrot.slane %v654_v25, 2 }
 0x319   :  { %v553_v33 = vmax.f32 %v551_v10, %v552_v22  ;;  %v559_v34 = vrot.slane %v558_v23, 1  ;;  %v635_v39 = vmax.f32 %v633_v19, %v634_v31  ;;  %v640_v41 = vmax.f32 %v638_v20, %v639_v32 }
 0x31a   :  { %v661_v37 = vsub.f32 %v8081_v43, %v567_v27  ;;  %v574_v38 = vmax.f32 %v572_v18, %v573_v30  ;;  %v650_v47 = vrot.slane %v649_v35, 1  ;;  %v656_v49 = vmax.f32 %v654_v25, %v655_v36 }
 0x31b   :  { %v659_v44 = vsub.f32 %v8866_v45, %v553_v33  ;;  %v560_v46 = vmax.f32 %v558_v23, %v559_v34  ;;  %v636_v53 = vrot.slane %v635_v39, 1  ;;  %v641_v54 = vrot.slane %v640_v41, 2 }
 0x31c   :  { %v679_v50 = vmul.f32 1.442695, %v661_v37  ;;  %v662_v52 = vsub.f32 %v8870_v48, %v574_v38  ;;  %v8904_v55 = vpop.f32.mrb[8].mxu0  ;;  %v651_v59 = vmax.f32 %v649_v35, %v650_v47  ;;  %v657_v43 = vrot.slane %v656_v49, 1 }
 0x31d   :  { %v675_v56 = vmul.f32 1.442695, %v659_v44  ;;  %v660_v58 = vsub.f32 %v8874_v51, %v560_v46  ;;  %v8907_v60 = vpop.f32.mrb[9].mxu0  ;;  %v637_v45 = vmax.f32 %v635_v39, %v636_v53  ;;  %v642_v63 = vmax.f32 %v640_v41, %v641_v54 }
 0x31e   :  { %8477 = vpow2.f32 %v679_v50  ;;  %v681_v62 = vmul.f32 1.442695, %v662_v52  ;;  %v8909_v0 = vpop.f32.mrb[10].mxu0  ;;  %v673_v48 = vsub.f32 %v8878_v57, %v651_v59  ;;  %v658_v4 = vmax.f32 %v656_v49, %v657_v43 }
 0x31f   :  { %8479 = vpow2.f32 %v675_v56  ;;  %v677_v2 = vmul.f32 1.442695, %v660_v58  ;;  %v8912_v5 = vpop.f32.mrb[11].mxu0  ;;  %v671_v51 = vsub.f32 %v8882_v61, %v637_v45  ;;  %v643_v6 = vrot.slane %v642_v63, 1 }
 0x320   :  { %8481 = vpow2.f32 %v681_v62  ;;  %v589_v7 = vsel %vm546_vm4, %v8892_v9, -inf  ;;  %v703_v10 = vmul.f32 1.442695, %v673_v48  ;;  %v674_v13 = vsub.f32 %v8886_v3, %v658_v4 }
 0x321   :  { %8483 = vpow2.f32 %v677_v2  ;;  %v590_v14 = vrot.slane %v589_v7, 4  ;;  %v699_v15 = vmul.f32 1.442695, %v671_v51  ;;  %v644_v17 = vmax.f32 %v642_v63, %v643_v6 }
 0x322   :  { %v575_v57 = vsel %vm546_vm4, %v8894_v16, -inf  ;;  %v596_v18 = vsel %vm546_vm4, %v8898_v21, -inf  ;;  %8485 = vpow2.f32 %v703_v10  ;;  %v705_v19 = vmul.f32 1.442695, %v674_v13 }
 0x323   :  { %v591_v61 = vmax.f32 %v589_v7, %v590_v14  ;;  %v576_v20 = vrot.slane %v575_v57, 4  ;;  %8487 = vpow2.f32 %v699_v15  ;;  %v672_v22 = vsub.f32 %v8890_v8, %v644_v17 }
 0x324   :  { %v597_v23 = vrot.slane %v596_v18, 4  ;;  %v582_v3 = vsel %vm546_vm4, %v8900_v26, -inf  ;;  %8489 = vpow2.f32 %v705_v19  ;;  %v617_v32 = vsel %vm546_vm4, %v8904_v55, -inf }
 0x325   :  { %v592_v24 = vrot.slane %v591_v61, 2  ;;  %v577_v25 = vmax.f32 %v575_v57, %v576_v20  ;;  %v583_v27 = vrot.slane %v582_v3, 4  ;;  %v701_v30 = vmul.f32 1.442695, %v672_v22 }
 0x326   :  { %v598_v31 = vmax.f32 %v596_v18, %v597_v23  ;;  %v8929_v33 = vsel %vm546_vm4, %v8907_v60, -inf  ;;  %v618_v36 = vrot.slane %v617_v32, 4  ;;  %v8938_v41 = vsel %vm546_vm4, %v8909_v0, -inf }
 0x327   :  { %v593_v34 = vmax.f32 %v591_v61, %v592_v24  ;;  %v578_v35 = vrot.slane %v577_v25, 2  ;;  %v8931_v8 = vmax.f32 %v582_v3, %v583_v27  ;;  %8491 = vpow2.f32 %v701_v30 }
 0x328   :  { %v8933_v37 = vpop.eup %8477  ;;  %v599_v38 = vrot.slane %v598_v31, 2  ;;  %v604_v39 = vrot.slane %v8929_v33, 4  ;;  %v8949_v58 = vmax.f32 %v617_v32, %v618_v36 }
 0x329   :  { %v8940_v44 = vpop.eup %8479  ;;  %v721_v46 = vsel %vm546_vm4, %v8933_v37, 0.0  ;;  %v594_v47 = vrot.slane %v593_v34, 1  ;;  %v579_v49 = vmax.f32 %v577_v25, %v578_v35  ;;  %v585_v50 = vrot.slane %v8931_v8, 2 }
 0x32a   :  { %v8945_v52 = vpop.eup %8481  ;;  %v722_v53 = vrot.slane %v721_v46, 4  ;;  %v707_v54 = vsel %vm546_vm4, %v8940_v44, 0.0  ;;  %v600_v56 = vmax.f32 %v598_v31, %v599_v38 }
 0x32b   :  { %v8951_v59 = vpop.eup %8483  ;;  %v708_v43 = vrot.slane %v707_v54, 4  ;;  %v728_v62 = vsel %vm546_vm4, %v8945_v52, 0.0  ;;  %v595_v45 = vmax.f32 %v593_v34, %v594_v47  ;;  %v580_v63 = vrot.slane %v579_v49, 1 }
 0x32c   :  { %v723_v2 = vadd.f32 %v722_v53, %v721_v46  ;;  %v729_v48 = vrot.slane %v728_v62, 4  ;;  %v714_v4 = vsel %vm546_vm4, %v8951_v59, 0.0  ;;  %v601_v51 = vrot.slane %v600_v56, 1  ;;  %v8957_v6 = vpop.eup %8485 }
 0x32d   :  { %v709_v7 = vadd.f32 %v708_v43, %v707_v54  ;;  %v715_v10 = vrot.slane %v714_v4, 4  ;;  %v665_v13 = vsub.f32 %v8892_v9, %v595_v45  ;;  %v581_v14 = vmax.f32 %v579_v49, %v580_v63  ;;  %v8960_v15 = vpop.eup %8487 }
 0x32e   :  { %v724_v17 = vrot.slane %v723_v2, 2  ;;  %v730_v57 = vadd.f32 %v729_v48, %v728_v62  ;;  %v805_v18 = vsel %vm546_vm4, %v8957_v6, 0.0  ;;  %v602_v19 = vmax.f32 %v600_v56, %v601_v51  ;;  %v8964_v61 = vpop.eup %8489 }
 0x32f   :  { %v710_v20 = vrot.slane %v709_v7, 2  ;;  %v716_v22 = vadd.f32 %v715_v10, %v714_v4  ;;  %v806_v23 = vrot.slane %v805_v18, 4  ;;  %v791_v3 = vsel %vm546_vm4, %v8960_v15, 0.0 }
 0x330   :  { %v725_v24 = vadd.f32 %v724_v17, %v723_v2  ;;  %v731_v25 = vrot.slane %v730_v57, 2  ;;  %v792_v9 = vrot.slane %v791_v3, 4  ;;  %v812_v27 = vsel %vm546_vm4, %v8964_v61, 0.0 }
 0x331   :  { %v711_v30 = vadd.f32 %v710_v20, %v709_v7  ;;  %v717_v31 = vrot.slane %v716_v22, 2  ;;  %v807_v32 = vadd.f32 %v806_v23, %v805_v18  ;;  %v813_v34 = vrot.slane %v812_v27, 4  ;;  %v8970_v35 = vpop.eup %8491 }
 0x332   :  { %v726_v36 = vrot.slane %v725_v24, 1  ;;  %v732_v38 = vadd.f32 %v731_v25, %v730_v57  ;;  %v793_v46 = vadd.f32 %v792_v9, %v791_v3  ;;  %v687_v47 = vmul.f32 1.442695, %v665_v13 }
 0x333   :  { %v712_v49 = vrot.slane %v711_v30, 1  ;;  %v718_v53 = vadd.f32 %v717_v31, %v716_v22  ;;  %v808_v54 = vrot.slane %v807_v32, 2  ;;  %v814_v56 = vadd.f32 %v813_v34, %v812_v27 }
 0x334   :  { %v727_v43 = vadd.f32 %v726_v36, %v725_v24  ;;  %v733_v62 = vrot.slane %v732_v38, 1  ;;  %v794_v45 = vrot.slane %v793_v46, 2  ;;  %v798_v63 = vsel %vm546_vm4, %v8970_v35, 0.0 }
 0x335   :  { %v713_v2 = vadd.f32 %v712_v49, %v711_v30  ;;  %v719_v48 = vrot.slane %v718_v53, 1  ;;  %v809_v4 = vadd.f32 %v808_v54, %v807_v32  ;;  %v815_v51 = vrot.slane %v814_v56, 2 }
 0x336   :  { %8493 = vrcp.f32 %v727_v43  ;;  %v734_v7 = vadd.f32 %v733_v62, %v732_v38  ;;  %v795_v10 = vadd.f32 %v794_v45, %v793_v46  ;;  %v799_v17 = vrot.slane %v798_v63, 4 }
 0x337   :  { %8495 = vrcp.f32 %v713_v2  ;;  %v720_v13 = vadd.f32 %v719_v48, %v718_v53  ;;  %v810_v57 = vrot.slane %v809_v4, 1  ;;  %v816_v18 = vadd.f32 %v815_v51, %v814_v56 }
 0x338   :  { %8497 = vrcp.f32 %v734_v7  ;;  %v796_v20 = vrot.slane %v795_v10, 1  ;;  %v800_v22 = vadd.f32 %v799_v17, %v798_v63  ;;  %v663_v23 = vsub.f32 %v8894_v16, %v581_v14 }
 0x339   :  { %8499 = vrcp.f32 %v720_v13  ;;  %v811_v3 = vadd.f32 %v810_v57, %v809_v4  ;;  %v817_v24 = vrot.slane %v816_v18, 1  ;;  %v666_v25 = vsub.f32 %v8898_v21, %v602_v19 }
 0x33a   :  { %v797_v9 = vadd.f32 %v796_v20, %v795_v10  ;;  %v801_v27 = vrot.slane %v800_v22, 2  ;;  %8501 = vpow2.f32 %v687_v47  ;;  %v683_v30 = vmul.f32 1.442695, %v663_v23 }
 0x33b   :  { %8503 = vrcp.f32 %v811_v3  ;;  %v818_v31 = vadd.f32 %v817_v24, %v816_v18  ;;  %v689_v32 = vmul.f32 1.442695, %v666_v25  ;;  %v586_v34 = vmax.f32 %v8931_v8, %v585_v50 }
 0x33c   :  { %8505 = vrcp.f32 %v797_v9  ;;  %v802_v36 = vadd.f32 %v801_v27, %v800_v22  ;;  %v620_v16 = vrot.slane %v8949_v58, 2  ;;  %v605_v14 = vmax.f32 %v8929_v33, %v604_v39 }
 0x33d   :  { %8507 = vrcp.f32 %v818_v31  ;;  %v587_v21 = vrot.slane %v586_v34, 1  ;;  %v625_v19 = vrot.slane %v8938_v41, 4  ;;  %v610_v38 = vsel %vm546_vm4, %v8912_v5, -inf }
 0x33e   :  { %v803_v46 = vrot.slane %v802_v36, 1  ;;  %8509 = vpow2.f32 %v683_v30  ;;  %v621_v47 = vmax.f32 %v8949_v58, %v620_v16  ;;  %v606_v8 = vrot.slane %v605_v14, 2 }
 0x33f   :  { %8511 = vpow2.f32 %v689_v32  ;;  %v588_v50 = vmax.f32 %v586_v34, %v587_v21  ;;  %v626_v49 = vmax.f32 %v8938_v41, %v625_v19  ;;  %v611_v53 = vrot.slane %v610_v38, 4 }
 0x340   :  { %v8494_v54 = vpop.eup %8493  ;;  %v804_v56 = vadd.f32 %v803_v46, %v802_v36  ;;  %v622_v33 = vrot.slane %v621_v47, 1  ;;  %v607_v39 = vmax.f32 %v605_v14, %v606_v8 }
 0x341   :  { %v8496_v43 = vpop.eup %8495  ;;  %v664_v62 = vsub.f32 %v8900_v26, %v588_v50  ;;  %v627_v45 = vrot.slane %v626_v49, 2  ;;  %v612_v63 = vmax.f32 %v610_v38, %v611_v53  ;;  %v837_v48 = vmul.f32 %v8494_v54, %v8933_v37 }
 0x342   :  { %v8498_v2 = vpop.eup %8497  ;;  %8513 = vrcp.f32 %v804_v56  ;;  %v623_v58 = vmax.f32 %v621_v47, %v622_v33  ;;  %v608_v4 = vrot.slane %v607_v39, 1  ;;  %v835_v26 = vmul.f32 %v8496_v43, %v8940_v44 }
 0x343   :  { %v8500_v51 = vpop.eup %8499  ;;  %v838_v7 = vmul.f32 %v8498_v2, %v8945_v52  ;;  %v685_v41 = vmul.f32 1.442695, %v664_v62  ;;  %v628_v10 = vmax.f32 %v626_v49, %v627_v45  ;;  %v613_v17 = vrot.slane %v612_v63, 2 }
 0x344   :  { %v8991_v13 = vpop.eup %8501  ;;  %v669_v57 = vsub.f32 %v8904_v55, %v623_v58  ;;  %v609_v18 = vmax.f32 %v607_v39, %v608_v4  ;;  %v836_v20 = vmul.f32 %v8500_v51, %v8951_v59 }
 0x345   :  { %v8504_v22 = vpop.eup %8503  ;;  %v749_v37 = vsel %vm546_vm4, %v8991_v13, 0.0  ;;  %8515 = vpow2.f32 %v685_v41  ;;  %v629_v23 = vrot.slane %v628_v10, 1  ;;  %v614_v3 = vmax.f32 %v612_v63, %v613_v17 }
 0x346   :  { %v8506_v52 = vpop.eup %8505  ;;  %v750_v24 = vrot.slane %v749_v37, 4  ;;  %v695_v25 = vmul.f32 1.442695, %v669_v57  ;;  %v667_v9 = vsub.f32 %v8907_v60, %v609_v18  ;;  %v851_v27 = vpack.c.bf16 %v836_v20, %v835_v26 }
 0x347   :  { %v8508_v30 = vpop.eup %8507  ;;  %v630_v55 = vmax.f32 %v628_v10, %v629_v23  ;;  %v615_v31 = vrot.slane %v614_v3, 1  ;;  %v852_v32 = vpack.c.bf16 %v838_v7, %v837_v48  ;;  %v9003_v36 = vmul.f32 %v8504_v22, %v8957_v6 }
 0x348   :  { %v8999_v44 = vpop.eup %8509  ;;  %v751_v59 = vadd.f32 %v750_v24, %v749_v37  ;;  %8517 = vpow2.f32 %v695_v25  ;;  %v691_v34 = vmul.f32 1.442695, %v667_v9  ;;  %8097 = vmatprep.mubr.msk.bf16.mxu1 %vm546_vm4, %v851_v27  ;;  %v9012_v19 = vmul.f32 %v8508_v30, %v8964_v61 }
 0x349   :  { %v9005_v16 = vpop.eup %8511  ;;  %v735_v60 = vsel %vm546_vm4, %v8999_v44, 0.0  ;;  %v670_v14 = vsub.f32 %v8909_v0, %v630_v55  ;;  %v616_v21 = vmax.f32 %v614_v3, %v615_v31  ;;  %8098 = vmatmul.mubr.msk.bf16.vlgmr.msra.gmra.mrb[12].mxu1 %vm546_vm4, %v852_v32  ;;  %v9020_v56 = vmul.f32 %v8506_v52, %v8960_v15 }
 0x34a   :  { %v752_v38 = vrot.slane %v751_v59, 2  ;;  %v736_v46 = vrot.slane %v735_v60, 4  ;;  %v756_v47 = vsel %vm546_vm4, %v9005_v16, 0.0  ;;  %8519 = vpow2.f32 %v691_v34 }
 0x34b   :  { %v757_v6 = vrot.slane %v756_v47, 4  ;;  %v697_v8 = vmul.f32 1.442695, %v670_v14  ;;  %v668_v50 = vsub.f32 %v8912_v5, %v616_v21  ;;  %v858_v49 = vpack.c.bf16 %v9012_v19, %v9003_v36 }
 0x34c   :  { %v8514_v0 = vpop.eup %8513  ;;  %v753_v53 = vadd.f32 %v752_v38, %v751_v59  ;;  %v737_v54 = vadd.f32 %v736_v46, %v735_v60 }
 0x34d   :  { %v758_v61 = vadd.f32 %v757_v6, %v756_v47  ;;  %8521 = vpow2.f32 %v697_v8  ;;  %v693_v33 = vmul.f32 1.442695, %v668_v50  ;;  %v9023_v39 = vmul.f32 %v8514_v0, %v8970_v35 }
 0x34e   :  { %v754_v43 = vrot.slane %v753_v53, 1  ;;  %v738_v62 = vrot.slane %v737_v54, 2 }
 0x34f   :  { %v9025_v45 = vpop.eup %8515  ;;  %v759_v5 = vrot.slane %v758_v61, 2  ;;  %8523 = vpow2.f32 %v693_v33  ;;  %v857_v63 = vpack.c.bf16 %v9023_v39, %v9020_v56  ;;  %v985_v56 = vpop.permute.xlu1 %984 }
 0x350   :  { %v739_v2 = vadd.f32 %v738_v62, %v737_v54  ;;  %v742_v15 = vsel %vm546_vm4, %v9025_v45, 0.0  ;;  %v755_v48 = vadd.f32 %v754_v43, %v753_v53 }
 0x351   :  { %v760_v58 = vadd.f32 %v759_v5, %v758_v61  ;;  %v743_v4 = vrot.slane %v742_v15, 4 }
 0x352   :  { %v9031_v51 = vpop.eup %8517  ;;  %v740_v35 = vrot.slane %v739_v2, 1  ;;  %8525 = vrcp.f32 %v755_v48 }
 0x353   :  { %v761_v7 = vrot.slane %v760_v58, 1  ;;  %v744_v41 = vadd.f32 %v743_v4, %v742_v15  ;;  %v777_v10 = vsel %vm546_vm4, %v9031_v51, 0.0 }
 0x354   :  { %v8520_v17 = vpop.eup %8519  ;;  %v778_v57 = vrot.slane %v777_v10, 4  ;;  %v741_v3 = vadd.f32 %v740_v35, %v739_v2 }
 0x355   :  { %v762_v18 = vadd.f32 %v761_v7, %v760_v58  ;;  %v745_v26 = vrot.slane %v744_v41, 2  ;;  %v763_v20 = vsel %vm546_vm4, %v8520_v17, 0.0 }
 0x356   :  { %v779_v22 = vadd.f32 %v778_v57, %v777_v10  ;;  %v764_v37 = vrot.slane %v763_v20, 4 }
 0x357   :  { %v8522_v23 = vpop.eup %8521  ;;  %8527 = vrcp.f32 %v762_v18  ;;  %v746_v52 = vadd.f32 %v745_v26, %v744_v41 }
 0x358   :  { %v780_v24 = vrot.slane %v779_v22, 2  ;;  %v765_v25 = vadd.f32 %v764_v37, %v763_v20  ;;  %v784_v9 = vsel %vm546_vm4, %v8522_v23, 0.0  ;;  %8529 = vrcp.f32 %v741_v3 }
 0x359   :  { %v8524_v27 = vpop.eup %8523  ;;  %v747_v30 = vrot.slane %v746_v52, 1  ;;  %v785_v55 = vrot.slane %v784_v9, 4 }
 0x35a   :  { %v781_v31 = vadd.f32 %v780_v24, %v779_v22  ;;  %v766_v32 = vrot.slane %v765_v25, 2  ;;  %v770_v59 = vsel %vm546_vm4, %v8524_v27, 0.0 }
 0x35b   :  { %v748_v34 = vadd.f32 %v747_v30, %v746_v52  ;;  %v786_v60 = vadd.f32 %v785_v55, %v784_v9  ;;  %v771_v14 = vrot.slane %v770_v59, 4 }
 0x35c   :  { %v782_v21 = vrot.slane %v781_v31, 1  ;;  %v767_v38 = vadd.f32 %v766_v32, %v765_v25  ;;  %v8526_v8 = vpop.eup %8525 }
 0x35d   :  { %8531 = vrcp.f32 %v748_v34  ;;  %v787_v46 = vrot.slane %v786_v60, 2  ;;  %v772_v47 = vadd.f32 %v771_v14, %v770_v59  ;;  %v841_v62 = vmul.f32 %v8526_v8, %v8991_v13 }
 0x35e   :  { %v768_v6 = vrot.slane %v767_v38, 1  ;;  %v783_v50 = vadd.f32 %v782_v21, %v781_v31 }
 0x35f   :  { %v788_v0 = vadd.f32 %v787_v46, %v786_v60  ;;  %v773_v53 = vrot.slane %v772_v47, 2 }
 0x360   :  { %v769_v54 = vadd.f32 %v768_v6, %v767_v38  ;;  %8533 = vrcp.f32 %v783_v50 }
 0x361   :  { %v8528_v61 = vpop.eup %8527  ;;  %v789_v33 = vrot.slane %v788_v0, 1  ;;  %v774_v43 = vadd.f32 %v773_v53, %v772_v47 }
 0x362   :  { %v842_v5 = vmul.f32 %v8528_v61, %v9005_v16  ;;  %8535 = vrcp.f32 %v769_v54  ;;  %v8530_v58 = vpop.eup %8529 }
 0x363   :  { %v790_v2 = vadd.f32 %v789_v33, %v788_v0  ;;  %v775_v15 = vrot.slane %v774_v43, 1  ;;  %v839_v7 = vmul.f32 %v8530_v58, %v8999_v44  ;;  %v8193_v44 = vld [vmem:[%s10722_s2] sm:$0xff]  }
 0x364   :  { %v854_v48 = vpack.c.bf16 %v842_v5, %v841_v62  ;;  %8114 = vmatpush3.bf16.msra.mxu0 %v8193_v44 }
 0x365   :  { %8537 = vrcp.f32 %v790_v2  ;;  %v776_v4 = vadd.f32 %v775_v15, %v774_v43  ;;  %8115 = vmatprep.subr.bf16.mxu0 %v8648_v1 }
 0x367   :  { %v8532_v35 = vpop.eup %8531  ;;  %8539 = vrcp.f32 %v776_v4 }
 0x368   :  { %v840_v41 = vmul.f32 %v8532_v35, %v9025_v45  ;;  %v8194_v45 = vld [vmem:[%s10722_s2 + $0x8] sm:$0xff]  }
 0x369   :  { %8116 = vmatpush3.bf16.msra.mxu0 %v8194_v45 }
 0x36a   :  { %v853_v10 = vpack.c.bf16 %v840_v41, %v839_v7  ;;  %v8534_v13 = vpop.eup %8533 }
 0x36b   :  { %v845_v18 = vmul.f32 %v8534_v13, %v9031_v51 }
 0x36c   :  { %8101 = vmatprep.mubr.msk.bf16.mxu1 %vm546_vm4, %v853_v10  ;;  %v8536_v16 = vpop.eup %8535 }
 0x36d   :  { %8102 = vmatmul.mubr.msk.bf16.gmra.mrb[16].mxu1 %vm546_vm4, %v854_v48  ;;  %v843_v22 = vmul.f32 %v8536_v16, %v8520_v17 }
 0x36f   :  { %v8538_v57 = vpop.eup %8537 }
 0x370   :  { %v846_v26 = vmul.f32 %v8538_v57, %v8522_v23 }
 0x371   :  { %v8540_v20 = vpop.eup %8539 }
 0x372   :  { %v844_v37 = vmul.f32 %v8540_v20, %v8524_v27  ;;  %v856_v3 = vpack.c.bf16 %v846_v26, %v845_v18 }
 0x374   :  { %v855_v52 = vpack.c.bf16 %v844_v37, %v843_v22 }
 0x376   :  { %8105 = vmatprep.mubr.msk.bf16.mxu1 %vm546_vm4, %v855_v52 }
 0x377   :  { %8106 = vmatmul.mubr.msk.bf16.gmra.mrb[20].mxu1 %vm546_vm4, %v856_v3 }
 0x378   :  { %8109 = vmatprep.mubr.msk.bf16.mxu1 %vm546_vm4, %v857_v63 }
 0x37f   :  { %8110 = vmatmul.mubr.msk.bf16.gmra.mrb[24].mxu1 %vm546_vm4, %v858_v49 }
 0x41c   :  { %v8099_v39 = vpop.f32.mrb[12].mxu1 }
 0x41d   :  { %v992_v63 = vmul.f32 %v8099_v39, %v985_v56  ;;  %v921_v51 = vpop.f32.mrb[13].mxu1 }
 0x41e   :  { %v990_v17 = vmul.f32 %v985_v56, %v921_v51  ;;  %v8100_v36 = vpop.f32.mrb[14].mxu1 }
 0x41f   :  { %v1020_v19 = vsel %vm158_vm2, %v992_v63, 0.0  ;;  %v993_v49 = vmul.f32 %v8100_v36, %v985_v56  ;;  %v924_v23 = vpop.f32.mrb[15].mxu1 }
 0x420   :  { %v1021_v24 = vrot.slane %v1020_v19, 4  ;;  %v1006_v25 = vsel %vm158_vm2, %v990_v17, 0.0  ;;  %v991_v9 = vmul.f32 %v985_v56, %v924_v23 }
 0x421   :  { %v1007_v27 = vrot.slane %v1006_v25, 4  ;;  %v1027_v30 = vsel %vm158_vm2, %v993_v49, 0.0 }
 0x422   :  { %v1022_v55 = vadd.f32 %v1021_v24, %v1020_v19  ;;  %v1028_v31 = vrot.slane %v1027_v30, 4  ;;  %v1013_v32 = vsel %vm158_vm2, %v991_v9, 0.0 }
 0x423   :  { %v1008_v59 = vadd.f32 %v1007_v27, %v1006_v25  ;;  %v1014_v34 = vrot.slane %v1013_v32, 4 }
 0x424   :  { %v1023_v60 = vrot.slane %v1022_v55, 2  ;;  %v1029_v14 = vadd.f32 %v1028_v31, %v1027_v30 }
 0x425   :  { %v1009_v21 = vrot.slane %v1008_v59, 2  ;;  %v1015_v38 = vadd.f32 %v1014_v34, %v1013_v32 }
 0x426   :  { %v1024_v46 = vadd.f32 %v1023_v60, %v1022_v55  ;;  %v1030_v47 = vrot.slane %v1029_v14, 2  ;;  %v9075_v55 = vpop.permute.xlu1 %986 }
 0x427   :  { %v1010_v6 = vadd.f32 %v1009_v21, %v1008_v59  ;;  %v1016_v8 = vrot.slane %v1015_v38, 2 }
 0x428   :  { %v1025_v50 = vrot.slane %v1024_v46, 1  ;;  %v1031_v0 = vadd.f32 %v1030_v47, %v1029_v14 }
 0x429   :  { %v1011_v53 = vrot.slane %v1010_v6, 1  ;;  %v1017_v54 = vadd.f32 %v1016_v8, %v1015_v38 }
 0x42a   :  { %v1026_v61 = vadd.f32 %v1025_v50, %v1024_v46  ;;  %v1032_v33 = vrot.slane %v1031_v0, 1 }
 0x42b   :  { %v1012_v43 = vadd.f32 %v1011_v53, %v1010_v6  ;;  %v1018_v62 = vrot.slane %v1017_v54, 1 }
 0x42c   :  { %v1033_v5 = vadd.f32 %v1032_v33, %v1031_v0  ;;  %v1124_v48 = vpack.c.bf16 %v1026_v61, %v1026_v61 }
 0x42d   :  { %v1122_v2 = vpack.c.bf16 %v1012_v43, %v1012_v43  ;;  %v1019_v15 = vadd.f32 %v1018_v62, %v1017_v54 }
 0x42e   :  { %v1125_v58 = vpack.c.bf16 %v1033_v5, %v1033_v5  ;;  %v1163_v41 = vunpack.c.l.b16 %v1124_v48 }
 0x42f   :  { %v1123_v4 = vpack.c.bf16 %v1019_v15, %v1019_v15  ;;  %v1161_v35 = vunpack.c.l.b16 %v1122_v2 }
 0x430   :  { %v1164_v10 = vunpack.c.l.b16 %v1125_v58 }
 0x431   :  { %v1162_v7 = vunpack.c.l.b16 %v1123_v4 }
 0x433   :  { %v1178_v13 = vsel %vm1177_vm5, %v1162_v7, %v1161_v35 }
 0x434   :  { %v1180_v16 = vsel %vm1179_vm6, %v1163_v41, %v1178_v13 }
 0x435   :  { %v9069_v57 = vsel %vm1181_vm7, %v1164_v10, %v1180_v16 }
 0x440   :  { %v8103_v18 = vpop.f32.mrb[16].mxu1 }
 0x441   :  { %v996_v26 = vmul.f32 %v8103_v18, %v985_v56  ;;  %v937_v20 = vpop.f32.mrb[17].mxu1 }
 0x442   :  { %v994_v22 = vmul.f32 %v985_v56, %v937_v20  ;;  %v8104_v37 = vpop.f32.mrb[18].mxu1 }
 0x443   :  { %v1048_v3 = vsel %vm158_vm2, %v996_v26, 0.0  ;;  %v997_v52 = vmul.f32 %v8104_v37, %v985_v56  ;;  %v940_v44 = vpop.f32.mrb[19].mxu1 }
 0x444   :  { %v1049_v45 = vrot.slane %v1048_v3, 4  ;;  %v1034_v39 = vsel %vm158_vm2, %v994_v22, 0.0  ;;  %v995_v63 = vmul.f32 %v985_v56, %v940_v44 }
 0x445   :  { %v1035_v51 = vrot.slane %v1034_v39, 4  ;;  %v1055_v17 = vsel %vm158_vm2, %v997_v52, 0.0 }
 0x446   :  { %v1050_v36 = vadd.f32 %v1049_v45, %v1048_v3  ;;  %v1056_v19 = vrot.slane %v1055_v17, 4  ;;  %v1041_v49 = vsel %vm158_vm2, %v995_v63, 0.0 }
 0x447   :  { %v1036_v23 = vadd.f32 %v1035_v51, %v1034_v39  ;;  %v1042_v24 = vrot.slane %v1041_v49, 4 }
 0x448   :  { %v1051_v25 = vrot.slane %v1050_v36, 2  ;;  %v1057_v9 = vadd.f32 %v1056_v19, %v1055_v17 }
 0x449   :  { %v1037_v27 = vrot.slane %v1036_v23, 2  ;;  %v1043_v30 = vadd.f32 %v1042_v24, %v1041_v49 }
 0x44a   :  { %v1052_v31 = vadd.f32 %v1051_v25, %v1050_v36  ;;  %v1058_v32 = vrot.slane %v1057_v9, 2  ;;  %v8107_v59 = vpop.f32.mrb[20].mxu1 }
 0x44b   :  { %v1038_v34 = vadd.f32 %v1037_v27, %v1036_v23  ;;  %v1044_v56 = vrot.slane %v1043_v30, 2  ;;  %v1000_v60 = vmul.f32 %v8107_v59, %v9075_v55  ;;  %v953_v14 = vpop.f32.mrb[21].mxu1 }
 0x44c   :  { %v1053_v21 = vrot.slane %v1052_v31, 1  ;;  %v1059_v38 = vadd.f32 %v1058_v32, %v1057_v9  ;;  %v998_v46 = vmul.f32 %v9075_v55, %v953_v14  ;;  %v8108_v47 = vpop.f32.mrb[22].mxu1 }
 0x44d   :  { %v1039_v6 = vrot.slane %v1038_v34, 1  ;;  %v1045_v8 = vadd.f32 %v1044_v56, %v1043_v30  ;;  %v1076_v50 = vsel %vm158_vm2, %v1000_v60, 0.0  ;;  %v1001_v0 = vmul.f32 %v8108_v47, %v9075_v55  ;;  %v956_v53 = vpop.f32.mrb[23].mxu1 }
 0x44e   :  { %v1054_v54 = vadd.f32 %v1053_v21, %v1052_v31  ;;  %v1060_v61 = vrot.slane %v1059_v38, 1  ;;  %v1077_v33 = vrot.slane %v1076_v50, 4  ;;  %v1062_v43 = vsel %vm158_vm2, %v998_v46, 0.0 }
 0x44f   :  { %v1040_v62 = vadd.f32 %v1039_v6, %v1038_v34  ;;  %v1046_v5 = vrot.slane %v1045_v8, 1  ;;  %v1063_v2 = vrot.slane %v1062_v43, 4  ;;  %v1083_v15 = vsel %vm158_vm2, %v1001_v0, 0.0 }
 0x450   :  { %v1128_v48 = vpack.c.bf16 %v1054_v54, %v1054_v54  ;;  %v1061_v58 = vadd.f32 %v1060_v61, %v1059_v38  ;;  %v1078_v4 = vadd.f32 %v1077_v33, %v1076_v50  ;;  %v1084_v35 = vrot.slane %v1083_v15, 4 }
 0x451   :  { %v1126_v7 = vpack.c.bf16 %v1040_v62, %v1040_v62  ;;  %v1047_v41 = vadd.f32 %v1046_v5, %v1045_v8  ;;  %v1064_v10 = vadd.f32 %v1063_v2, %v1062_v43  ;;  %v999_v13 = vmul.f32 %v9075_v55, %v956_v53 }
 0x452   :  { %v1167_v16 = vunpack.c.l.b16 %v1128_v48  ;;  %v1129_v18 = vpack.c.bf16 %v1061_v58, %v1061_v58  ;;  %v1079_v26 = vrot.slane %v1078_v4, 2  ;;  %v1085_v20 = vadd.f32 %v1084_v35, %v1083_v15  ;;  %v8111_v22 = vpop.f32.mrb[24].mxu1 }
 0x453   :  { %v1165_v37 = vunpack.c.l.b16 %v1126_v7  ;;  %v1127_v3 = vpack.c.bf16 %v1047_v41, %v1047_v41  ;;  %v1065_v52 = vrot.slane %v1064_v10, 2  ;;  %v1069_v44 = vsel %vm158_vm2, %v999_v13, 0.0  ;;  %v969_v45 = vpop.f32.mrb[25].mxu1 }
 0x454   :  { %v1168_v39 = vunpack.c.l.b16 %v1129_v18  ;;  %v1080_v63 = vadd.f32 %v1079_v26, %v1078_v4  ;;  %v1086_v51 = vrot.slane %v1085_v20, 2  ;;  %v1070_v17 = vrot.slane %v1069_v44, 4  ;;  %v8112_v36 = vpop.f32.mrb[26].mxu1 }
 0x455   :  { %v1184_v19 = vsel %vm1183_vm8, %v1165_v37, %v9069_v57  ;;  %v1166_v49 = vunpack.c.l.b16 %v1127_v3  ;;  %v1066_v23 = vadd.f32 %v1065_v52, %v1064_v10  ;;  %v1004_v24 = vmul.f32 %v8111_v22, %v9075_v55  ;;  %v972_v25 = vpop.f32.mrb[27].mxu1 }
 0x456   :  { %v1081_v9 = vrot.slane %v1080_v63, 1  ;;  %v1087_v27 = vadd.f32 %v1086_v51, %v1085_v20  ;;  %v1071_v30 = vadd.f32 %v1070_v17, %v1069_v44  ;;  %v1002_v31 = vmul.f32 %v9075_v55, %v969_v45 }
 0x457   :  { %v1186_v32 = vsel %vm1185_vm9, %v1166_v49, %v1184_v19  ;;  %v1067_v59 = vrot.slane %v1066_v23, 1  ;;  %v1104_v34 = vsel %vm158_vm2, %v1004_v24, 0.0  ;;  %v1005_v56 = vmul.f32 %v8112_v36, %v9075_v55 }
 0x458   :  { %v1188_v60 = vsel %vm1187_vm10, %v1167_v16, %v1186_v32  ;;  %v1088_v57 = vrot.slane %v1087_v27, 1  ;;  %v1072_v14 = vrot.slane %v1071_v30, 2  ;;  %v1105_v38 = vrot.slane %v1104_v34, 4 }
 0x459   :  { %v1190_v21 = vsel %vm1189_vm11, %v1168_v39, %v1188_v60  ;;  %v1090_v46 = vsel %vm158_vm2, %v1002_v31, 0.0  ;;  %v1068_v47 = vadd.f32 %v1067_v59, %v1066_v23  ;;  %v1082_v50 = vadd.f32 %v1081_v9, %v1080_v63 }
 0x45a   :  { %v1073_v6 = vadd.f32 %v1072_v14, %v1071_v30  ;;  %v1091_v8 = vrot.slane %v1090_v46, 4  ;;  %v1106_v0 = vadd.f32 %v1105_v38, %v1104_v34  ;;  %v1111_v53 = vsel %vm158_vm2, %v1005_v56, 0.0 }
 0x45b   :  { %v1003_v54 = vmul.f32 %v9075_v55, %v972_v25  ;;  %v1089_v61 = vadd.f32 %v1088_v57, %v1087_v27  ;;  %v1112_v5 = vrot.slane %v1111_v53, 4  ;;  %v1130_v15 = vpack.c.bf16 %v1068_v47, %v1068_v47  ;;  %v6934_v47 = vld [vmem:[%s10691_s6] ss:$0 sm:$0xff] }
 0x45c   :  { %v1074_v33 = vrot.slane %v1073_v6, 1  ;;  %v1092_v43 = vadd.f32 %v1091_v8, %v1090_v46  ;;  %v1107_v62 = vrot.slane %v1106_v0, 2  ;;  %v1132_v35 = vpack.c.bf16 %v1082_v50, %v1082_v50 }
 0x45d   :  { %v1097_v2 = vsel %vm158_vm2, %v1003_v54, 0.0  ;;  %v1113_v41 = vadd.f32 %v1112_v5, %v1111_v53  ;;  %v1133_v10 = vpack.c.bf16 %v1089_v61, %v1089_v61  ;;  %v1169_v20 = vunpack.c.l.b16 %v1130_v15  ;;  %v1310_v5 = vld [vmem:[%s10694_s9 + $0x40] sm:$0xff] }
 0x45e   :  { %v1075_v48 = vadd.f32 %v1074_v33, %v1073_v6  ;;  %v1093_v58 = vrot.slane %v1092_v43, 2  ;;  %v1098_v4 = vrot.slane %v1097_v2, 4  ;;  %v1108_v7 = vadd.f32 %v1107_v62, %v1106_v0  ;;  %v1302_v62 = vld [vmem:[%s10694_s9] sm:$0xff] }
 0x45f   :  { %v1114_v55 = vrot.slane %v1113_v41, 2  ;;  %v1171_v52 = vunpack.c.l.b16 %v1132_v35  ;;  %v1172_v45 = vunpack.c.l.b16 %v1133_v10  ;;  %v6941_v15 = vcombine.high %v1302_v62, %v1310_v5 }
 0x460   :  { %v1131_v13 = vpack.c.bf16 %v1075_v48, %v1075_v48  ;;  %v1094_v16 = vadd.f32 %v1093_v58, %v1092_v43  ;;  %v1099_v18 = vadd.f32 %v1098_v4, %v1097_v2  ;;  %v1109_v26 = vrot.slane %v1108_v7, 1 }
 0x461   :  { %v1115_v44 = vadd.f32 %v1114_v55, %v1113_v41  ;;  %v6940_v2 = vcombine.low %v1302_v62, %v1310_v5  ;;  %1582 = vmatprep.subr.bf16.mxu1 %v6941_v15  ;;  %v1314_v62 = vld [vmem:[%s10694_s9 + $0x60] sm:$0xff]  ;;  %v1307_v5 = vld [vmem:[%s10694_s9 + $0x28] sm:$0xff] }
 0x462   :  { %v1170_v22 = vunpack.c.l.b16 %v1131_v13  ;;  %v1095_v37 = vrot.slane %v1094_v16, 1  ;;  %v1100_v3 = vrot.slane %v1099_v18, 2  ;;  %v1110_v36 = vadd.f32 %v1109_v26, %v1108_v7 }
 0x463   :  { %v1116_v19 = vrot.slane %v1115_v44, 1  ;;  %1583 = vmatpush1.bf16.msra.mxu1 %v6940_v2  ;;  %v1315_v2 = vld [vmem:[%s10694_s9 + $0x68] sm:$0xff] }
 0x464   :  { %v1191_v39 = vsel %vm1177_vm5, %v1170_v22, %v1169_v20  ;;  %v1096_v63 = vadd.f32 %v1095_v37, %v1094_v16  ;;  %v1101_v51 = vadd.f32 %v1100_v3, %v1099_v18  ;;  %v1136_v30 = vpack.c.bf16 %v1110_v36, %v1110_v36  ;;  %v1303_v16 = vld [vmem:[%s10694_s9 + $0x8] sm:$0xff]  ;;  %v1318_v20 = vld [vmem:[%s10694_s9 + $0x80] sm:$0xff] }
 0x465   :  { %v1192_v17 = vsel %vm1179_vm6, %v1171_v52, %v1191_v39  ;;  %v1117_v25 = vadd.f32 %v1116_v19, %v1115_v44  ;;  %v1311_v18 = vld [vmem:[%s10694_s9 + $0x48] sm:$0xff]  ;;  %v1326_v22 = vld [vmem:[%s10694_s9 + $0xc0] sm:$0xff]  ;;  %v1313_v19 = vld [vmem:[%s10694_s9 + $0x58] sm:$0xff] }
 0x466   :  { %v1134_v49 = vpack.c.bf16 %v1096_v63, %v1096_v63  ;;  %v1193_v23 = vsel %vm1181_vm7, %v1172_v45, %v1192_v17  ;;  %v1102_v24 = vrot.slane %v1101_v51, 1  ;;  %v1175_v56 = vunpack.c.l.b16 %v1136_v30  ;;  %v1319_v37 = vld [vmem:[%s10694_s9 + $0x88] sm:$0xff]  ;;  %v1304_v63 = vld [vmem:[%s10694_s9 + $0x10] sm:$0xff]  ;;  %v1305_v17 = vld [vmem:[%s10694_s9 + $0x18] sm:$0xff] }
 0x467   :  { %v1137_v32 = vpack.c.bf16 %v1117_v25, %v1117_v25  ;;  %v6943_v26 = vcombine.high %v1303_v16, %v1311_v18  ;;  %v6942_v55 = vcombine.low %v1303_v16, %v1311_v18  ;;  %v6957_v3 = vcombine.high %v1318_v20, %v1326_v22  ;;  %v1327_v52 = vld [vmem:[%s10694_s9 + $0xc8] sm:$0xff]  ;;  %v1308_v18 = vld [vmem:[%s10694_s9 + $0x30] sm:$0xff] }
 0x468   :  { %v1173_v9 = vunpack.c.l.b16 %v1134_v49  ;;  %v1103_v27 = vadd.f32 %v1102_v24, %v1101_v51  ;;  %v6956_v44 = vcombine.low %v1318_v20, %v1326_v22  ;;  %v6958_v45 = vcombine.low %v1319_v37, %v1327_v52  ;;  %v1312_v51 = vld [vmem:[%s10694_s9 + $0x50] sm:$0xff]  ;;  %v1317_v20 = vld [vmem:[%s10694_s9 + $0x78] sm:$0xff] }
 0x469   :  { %v1176_v60 = vunpack.c.l.b16 %v1137_v32  ;;  %1625 = vmatprep.subr.bf16.mxu0 %v6943_v26  ;;  %v6959_v39 = vcombine.high %v1319_v37, %v1327_v52  ;;  %1584 = vmatprep.subr.bf16.mxu1 %v6957_v3  ;;  %v6945_v36 = vcombine.high %v1304_v63, %v1312_v51  ;;  %v8653_v49 = vmov 0   ;;  %v1316_v26 = vld [vmem:[%s10694_s9 + $0x70] sm:$0xff] }
 0x46a   :  { %v1194_v31 = vsel %vm1183_vm8, %v1173_v9, %v1193_v23  ;;  %v1135_v59 = vpack.c.bf16 %v1103_v27, %v1103_v27  ;;  %1585 = vmatpush1.bf16.msra.mxu1 %v6956_v44  ;;  %1614 = vmatprep.mubr.bf16.mxu1 %v8653_v49  ;;  %v6944_v23 = vcombine.low %v1304_v63, %v1312_v51  ;;  %v1324_v44 = vld [vmem:[%s10694_s9 + $0xb0] sm:$0xff]  ;;  %v1333_v63 = vld [vmem:[%s10694_s9 + $0xf8] sm:$0xff] }
 0x46b   :  { %v6946_v24 = vcombine.low %v1305_v17, %v1313_v19  ;;  %v6947_v25 = vcombine.high %v1305_v17, %v1313_v19  ;;  %1668 = vmatprep.subr.bf16.mxu1 %v6945_v36  ;;  %v6953_v3 = vcombine.high %v1308_v18, %v1316_v26  ;;  %v6952_v51 = vcombine.low %v1308_v18, %v1316_v26 }
 0x46c   :  { %v1174_v34 = vunpack.c.l.b16 %v1135_v59 }
 0x46e   :  { %v1195_v57 = vsel %vm1185_vm9, %v1174_v34, %v1194_v31 }
 0x46f   :  { %v1196_v14 = vsel %vm1187_vm10, %v1175_v56, %v1195_v57 }
 0x470   :  { %v1197_v38 = vsel %vm1189_vm11, %v1176_v60, %v1196_v14  ;;  %v6938_v60 = vld [vmem:[%s10692_s7] ss:$0 sm:$0xff] }
 0x471   :  { %v1198_v46 = vpack.c.b16 %v1197_v38, %v1190_v21 }
 0x473   :  { %8118 = vmatmul.mubr.msk.bf16.vlgmr.msra.gmra.mrb[12].mxu0 %vm158_vm2, %v1198_v46  ;;  %v6939_v46 = vld [vmem:[%s10693_s8] ss:$0 sm:$0xff] }
 0x474   :  { %1626 = vmatpush1.bf16.msra.mxu0 %v6942_v55  ;;  %1657 = vmatprep.mubr.bf16.mxu0 %v8653_v49  ;;  %v1309_v55 = vld [vmem:[%s10694_s9 + $0x38] sm:$0xff] }
 0x475   :  { %1627 = vmatprep.subr.bf16.mxu0 %v6959_v39  ;;  %v6955_v52 = vcombine.high %v1309_v55, %v1317_v20  ;;  %v1325_v39 = vld [vmem:[%s10694_s9 + $0xb8] sm:$0xff]  ;;  %v6954_v17 = vcombine.low %v1309_v55, %v1317_v20 }
 0x476   :  { %v6971_v19 = vcombine.high %v1325_v39, %v1333_v63 }
 0x478   :  { %1628 = vmatpush1.bf16.msra.mxu0 %v6958_v45  ;;  %v1332_v45 = vld [vmem:[%s10694_s9 + $0xf0] sm:$0xff] }
 0x479   :  { %1711 = vmatprep.subr.bf16.mxu0 %v6947_v25  ;;  %v6969_v36 = vcombine.high %v1324_v44, %v1332_v45  ;;  %v8195_v25 = vld [vmem:[%s10696_s11 + $0x40] sm:$0xff]  }
 0x546   :  { %v1248_v6 = vpop.f32.mrb[12].mxu0 }
 0x547   :  { %v1249_v8 = vadd.f32 %v6934_v47, %v1248_v6  ;;  %v8119_v50 = vpop.f32.mrb[13].mxu0  ;;  %v1320_v6 = vld [vmem:[%s10694_s9 + $0x90] sm:$0xff] }
 0x548   :  { %v1251_v0 = vpop.f32.mrb[14].mxu0  ;;  %v1321_v50 = vld [vmem:[%s10694_s9 + $0x98] sm:$0xff] }
 0x549   :  { %v1252_v53 = vadd.f32 %v6934_v47, %v1251_v0  ;;  %v8120_v54 = vpop.f32.mrb[15].mxu0  ;;  %v1255_v61 = vadd.f32 %v1249_v8, %v8790_v11  ;;  %v1328_v8 = vld [vmem:[%s10694_s9 + $0xd0] sm:$0xff]  ;;  %v1329_v0 = vld [vmem:[%s10694_s9 + $0xd8] sm:$0xff] }
 0x54a   :  { %v6960_v15 = vcombine.low %v1320_v6, %v1328_v8 }
 0x54b   :  { %v1259_v33 = vsel %vm158_vm2, %v1255_v61, 0.0  ;;  %v1256_v43 = vadd.f32 %v1252_v53, %v8792_v12 }
 0x54c   :  { %1260 = vadd.xlane.f32.xlu0 %v1259_v33  ;;  %v6961_v33 = vcombine.high %v1320_v6, %v1328_v8  ;;  %v8210_v6 = vld [vmem:[%s10696_s11 + $0x98] sm:$0xff]   ;;  %v8211_v8 = vld [vmem:[%s10696_s11 + $0x60] sm:$0xff]  }
 0x54d   :  { %v1262_v21 = vsel %vm158_vm2, %v1256_v43, 0.0 }
 0x54e   :  { %1263 = vadd.xlane.f32.xlu1 %v1262_v21  ;;  %v1306_v21 = vld [vmem:[%s10694_s9 + $0x20] sm:$0xff] }
 0x5d9   :  { %v1261_v11 = vpop.xlane.xlu0 %1260 }
 0x5da   :  { %v1266_v48 = vmul.f32 0.03125, %v1261_v11  ;;  %v6962_v11 = vcombine.low %v1321_v50, %v1329_v0 }
 0x5db   :  { %v1264_v58 = vpop.xlane.xlu1 %1263 }
 0x5dc   :  { %v1268_v12 = vsub.f32 %v1255_v61, %v1266_v48  ;;  %v1267_v4 = vmul.f32 0.03125, %v1264_v58  ;;  %v6949_v48 = vcombine.high %v1306_v21, %v1314_v62  ;;  %v6951_v58 = vcombine.high %v1307_v5, %v1315_v2 }
 0x5de   :  { %v1269_v35 = vsub.f32 %v1256_v43, %v1267_v4  ;;  %v1270_v7 = vmul.f32 %v1268_v12, %v1268_v12  ;;  %v6963_v43 = vcombine.high %v1321_v50, %v1329_v0  ;;  %v1330_v4 = vld [vmem:[%s10694_s9 + $0xe0] sm:$0xff] }
 0x5df   :  { %v8212_v50 = vld [vmem:[%s10696_s11 + $0xe0] sm:$0xff]  }
 0x5e0   :  { %v1272_v41 = vsel %vm158_vm2, %v1270_v7, 0.0  ;;  %v1271_v10 = vmul.f32 %v1269_v35, %v1269_v35  ;;  %v1331_v7 = vld [vmem:[%s10694_s9 + $0xe8] sm:$0xff]  ;;  %v8213_v0 = vld [vmem:[%s10696_s11 + $0x20] sm:$0xff]  }
 0x5e1   :  { %1273 = vadd.xlane.f32.xlu0 %v1272_v41  ;;  %v6948_v41 = vcombine.low %v1306_v21, %v1314_v62  ;;  %v8217_v21 = vld [vmem:[%s10696_s11 + $0x28] sm:$0xff]  }
 0x5e2   :  { %v1275_v13 = vsel %vm158_vm2, %v1271_v10, 0.0  ;;  %v6950_v10 = vcombine.low %v1307_v5, %v1315_v2  ;;  %v8218_v62 = vld [vmem:[%s10696_s11 + $0xa8] sm:$0xff]   ;;  %v8219_v5 = vld [vmem:[%s10696_s11 + $0x70] sm:$0xff]  }
 0x5e3   :  { %v8220_v2 = vld [vmem:[%s10696_s11 + $0xf0] sm:$0xff]  }
 0x5e5   :  { %1276 = vadd.xlane.f32.xlu0 %v1275_v13 }
 0x66e   :  { %v1274_v9 = vpop.xlane.xlu0 %1273 }
 0x66f   :  { %v1278_v27 = vmul.f32 0.03125, %v1274_v9  ;;  %v8196_v9 = vld [vmem:[%s10696_s11 + $0xc0] sm:$0xff]  }
 0x671   :  { %v1280_v30 = vadd.f32 1e-05, %v1278_v27  ;;  %v8197_v27 = vld [vmem:[%s10696_s11] sm:$0xff]  }
 0x672   :  { %v1277_v31 = vpop.xlane.xlu0 %1276 }
 0x673   :  { %8541 = vrsqrt.f32 %v1280_v30  ;;  %v1279_v32 = vmul.f32 0.03125, %v1277_v31  ;;  %v8198_v30 = vld [vmem:[%s10696_s11 + $0x80] sm:$0xff]   ;;  %v8199_v31 = vld [vmem:[%s10696_s11 + $0x48] sm:$0xff]  }
 0x675   :  { %v1281_v59 = vadd.f32 1e-05, %v1279_v32  ;;  %v8200_v32 = vld [vmem:[%s10696_s11 + $0xc8] sm:$0xff]  }
 0x677   :  { %8543 = vrsqrt.f32 %v1281_v59  ;;  %v8201_v59 = vld [vmem:[%s10696_s11 + $0x8] sm:$0xff]  }
 0x67d   :  { %v8542_v34 = vpop.eup %8541 }
 0x67e   :  { %v1284_v56 = vmul.f32 %v8542_v34, %v1268_v12  ;;  %v1322_v12 = vld [vmem:[%s10694_s9 + $0xa0] sm:$0xff]  ;;  %v8202_v34 = vld [vmem:[%s10696_s11 + $0x88] sm:$0xff]  }
 0x67f   :  { %v6965_v13 = vcombine.high %v1322_v12, %v1330_v4  ;;  %v6964_v22 = vcombine.low %v1322_v12, %v1330_v4  ;;  %v8225_v12 = vld [vmem:[%s10696_s11 + $0x38] sm:$0xff]  }
 0x680   :  { %v1292_v14 = vmul.f32 %v6938_v60, %v1284_v56  ;;  %v8203_v56 = vld [vmem:[%s10696_s11 + $0x50] sm:$0xff]   ;;  %v8226_v4 = vld [vmem:[%s10696_s11 + $0xb8] sm:$0xff]  }
 0x681   :  { %v8544_v57 = vpop.eup %8543 }
 0x682   :  { %v1285_v38 = vmul.f32 %v8544_v57, %v1269_v35  ;;  %v9171_v53 = vadd.f32 %v6939_v46, %v1292_v14  ;;  %v1323_v35 = vld [vmem:[%s10694_s9 + $0xa8] sm:$0xff]  ;;  %v8205_v57 = vld [vmem:[%s10696_s11 + $0x10] sm:$0xff]  }
 0x683   :  { %v6967_v16 = vcombine.high %v1323_v35, %v1331_v7  ;;  %v6966_v37 = vcombine.low %v1323_v35, %v1331_v7  ;;  %v8206_v14 = vld [vmem:[%s10696_s11 + $0x90] sm:$0xff]   ;;  %v8227_v35 = vld [vmem:[%s10696_s11 + $0x140] sm:$0xff]  }
 0x684   :  { %v1293_v47 = vmul.f32 %v6938_v60, %v1285_v38  ;;  %v8204_v60 = vld [vmem:[%s10696_s11 + $0xd0] sm:$0xff]   ;;  %v8207_v38 = vld [vmem:[%s10696_s11 + $0x58] sm:$0xff]   ;;  %v8228_v7 = vld [vmem:[%s10696_s11 + $0x1c0] sm:$0xff]  }
 0x686   :  { %v9173_v54 = vadd.f32 %v6939_v46, %v1293_v47  ;;  %v8208_v46 = vld [vmem:[%s10696_s11 + $0xd8] sm:$0xff]  }
 0x687   :  { %v8209_v47 = vld [vmem:[%s10696_s11 + $0x18] sm:$0xff]  }
 0x688   :  { %v9177_v61 = vpack.c.bf16 %v9173_v54, %v9171_v53 }
 0x68a   :  { %6972 = vmatmul.mubr.msk.bf16.vlgmr.msra.gmra.mrb[28].mxu1 %vm158_vm2, %v9177_v61  ;;  %6973 = vmatmul.mubr.msk.bf16.vlgmr.msra.gmra.mrb[16].mxu0 %vm158_vm2, %v9177_v61 }
 0x68b   :  { %1669 = vmatpush1.bf16.msra.mxu1 %v6944_v23  ;;  %1712 = vmatpush1.bf16.msra.mxu0 %v6946_v24  ;;  %v6968_v23 = vcombine.low %v1324_v44, %v1332_v45  ;;  %v6970_v24 = vcombine.low %v1325_v39, %v1333_v63  ;;  %v9374_v44 = vsub.s32 5, %v8811_v28  ;;  %v9377_v45 = vsub.s32 7, %v8811_v28 }
 0x68c   :  { %1670 = vmatprep.subr.bf16.mxu1 %v6961_v33  ;;  %1713 = vmatprep.subr.bf16.mxu0 %v6963_v43  ;;  %v8215_v33 = vld [vmem:[%s10696_s11 + $0x68] sm:$0xff]  }
 0x68d   :  { %1700 = vmatprep.mubr.bf16.mxu1 %v8653_v49  ;;  %1743 = vmatprep.mubr.bf16.mxu0 %v8653_v49  ;;  %v8216_v43 = vld [vmem:[%s10696_s11 + $0xe8] sm:$0xff]  }
 0x68f   :  { %1671 = vmatpush1.bf16.msra.mxu1 %v6960_v15  ;;  %1714 = vmatpush1.bf16.msra.mxu0 %v6962_v11  ;;  %v8221_v15 = vld [vmem:[%s10696_s11 + $0x30] sm:$0xff]  }
 0x690   :  { %1754 = vmatprep.subr.bf16.mxu1 %v6949_v48  ;;  %1797 = vmatprep.subr.bf16.mxu0 %v6951_v58  ;;  %v8222_v11 = vld [vmem:[%s10696_s11 + $0xb0] sm:$0xff]   ;;  %v8223_v48 = vld [vmem:[%s10696_s11 + $0x78] sm:$0xff]  }
 0x691   :  { %v8224_v58 = vld [vmem:[%s10696_s11 + $0xf8] sm:$0xff]  }
 0x692   :  { %6974 = vmatmul.mubr.msk.bf16.vlgmr.msra.gmra.mrb[32].mxu1 %vm158_vm2, %v9177_v61  ;;  %6975 = vmatmul.mubr.msk.bf16.vlgmr.msra.gmra.mrb[20].mxu0 %vm158_vm2, %v9177_v61 }
 0x693   :  { %1755 = vmatpush1.bf16.msra.mxu1 %v6948_v41  ;;  %1798 = vmatpush1.bf16.msra.mxu0 %v6950_v10  ;;  %v9352_v41 = vsub.s32 2, %v8811_v28  ;;  %v1335_v10 = vld [vmem:[%s10695_s10] sm:$0xff] }
 0x694   :  { %1756 = vmatprep.subr.bf16.mxu1 %v6965_v13  ;;  %1799 = vmatprep.subr.bf16.mxu0 %v6967_v16  ;;  %v9358_v13 = vsub.s32 1, %v8811_v28  ;;  %v9361_v16 = vsub.s32 3, %v8811_v28  ;;  %v1342_v18 = vrot.slane %v1335_v10, %v8822_v40 }
 0x695   :  { %1786 = vmatprep.mubr.bf16.mxu1 %v8653_v49  ;;  %1829 = vmatprep.mubr.bf16.mxu0 %v8653_v49  ;;  %v1350_v26 = vrot.slane %v1335_v10, %v9352_v41 }
 0x696   :  { %v1346_v55 = vrot.slane %v1335_v10, %v9358_v13  ;;  %v1354_v20 = vrot.slane %v1335_v10, %v9361_v16 }
 0x697   :  { %1757 = vmatpush1.bf16.msra.mxu1 %v6964_v22  ;;  %1800 = vmatpush1.bf16.msra.mxu0 %v6966_v37  ;;  %v9368_v22 = vsub.s32 4, %v8811_v28  ;;  %v9371_v37 = vsub.s32 6, %v8811_v28  ;;  %v1362_v28 = vrot.slane %v1335_v10, %v9374_v44 }
 0x698   :  { %1840 = vmatprep.subr.bf16.mxu1 %v6953_v3  ;;  %1883 = vmatprep.subr.bf16.mxu0 %v6955_v52 }
 0x69a   :  { %6976 = vmatmul.mubr.msk.bf16.vlgmr.msra.gmra.mrb[36].mxu1 %vm158_vm2, %v9177_v61  ;;  %6977 = vmatmul.mubr.msk.bf16.vlgmr.msra.gmra.mrb[24].mxu0 %vm158_vm2, %v9177_v61 }
 0x69b   :  { %1841 = vmatpush1.bf16.msra.mxu1 %v6952_v51  ;;  %1884 = vmatpush1.bf16.msra.mxu0 %v6954_v17 }
 0x69c   :  { %1842 = vmatprep.subr.bf16.mxu1 %v6969_v36  ;;  %1885 = vmatprep.subr.bf16.mxu0 %v6971_v19 }
 0x69d   :  { %1872 = vmatprep.mubr.bf16.mxu1 %v8653_v49  ;;  %1915 = vmatprep.mubr.bf16.mxu0 %v8653_v49 }
 0x69f   :  { %1843 = vmatpush1.bf16.msra.mxu1 %v6968_v23  ;;  %1886 = vmatpush1.bf16.msra.mxu0 %v6970_v24 }
 0x6a0   :  { %7662 = vmatprep.subr.bf16.mxu1 %v8195_v25  ;;  %7684 = vmatprep.subr.bf16.mxu0 %v8196_v9 }
 0x6a2   :  { %6978 = vmatmul.mubr.msk.bf16.vlgmr.msra.gmra.mrb[40].mxu1 %vm158_vm2, %v9177_v61  ;;  %6979 = vmatmul.mubr.msk.bf16.vlgmr.msra.gmra.mrb[28].mxu0 %vm158_vm2, %v9177_v61  ;;  %v8214_v61 = vld [vmem:[%s10696_s11 + $0xa0] sm:$0xff]  }
 0x6a3   :  { %7663 = vmatpush3.bf16.msra.mxu1 %v8197_v27  ;;  %7685 = vmatpush3.bf16.msra.mxu0 %v8198_v30 }
 0x6a4   :  { %7664 = vmatprep.subr.bf16.mxu1 %v8199_v31  ;;  %7686 = vmatprep.subr.bf16.mxu0 %v8200_v32  ;;  %v1358_v31 = vrot.slane %v1335_v10, %v9368_v22  ;;  %v1366_v32 = vrot.slane %v1335_v10, %v9371_v37 }
 0x6a7   :  { %7665 = vmatpush3.bf16.msra.mxu1 %v8201_v59  ;;  %7687 = vmatpush3.bf16.msra.mxu0 %v8202_v34 }
 0x6a8   :  { %7666 = vmatprep.subr.bf16.mxu1 %v8203_v56  ;;  %7688 = vmatprep.subr.bf16.mxu0 %v8204_v60  ;;  %v1370_v56 = vrot.slane %v1335_v10, %v9377_v45 }
 0x6ab   :  { %7667 = vmatpush3.bf16.msra.mxu1 %v8205_v57  ;;  %7689 = vmatpush3.bf16.msra.mxu0 %v8206_v14 }
 0x6ac   :  { %7668 = vmatprep.subr.bf16.mxu1 %v8207_v38  ;;  %7690 = vmatprep.subr.bf16.mxu0 %v8208_v46 }
 0x6af   :  { %7669 = vmatpush3.bf16.msra.mxu1 %v8209_v47  ;;  %7691 = vmatpush3.bf16.msra.mxu0 %v8210_v6 }
 0x6b0   :  { %7670 = vmatprep.subr.bf16.mxu1 %v8211_v8  ;;  %7692 = vmatprep.subr.bf16.mxu0 %v8212_v50  ;;  %v9386_v50 = vld [vmem:[%s10695_s10 + $0x8] sm:$0xff] }
 0x6b3   :  { %7671 = vmatpush3.bf16.msra.mxu1 %v8213_v0  ;;  %7693 = vmatpush3.bf16.msra.mxu0 %v8214_v61 }
 0x6b4   :  { %7672 = vmatprep.subr.bf16.mxu1 %v8215_v33  ;;  %7694 = vmatprep.subr.bf16.mxu0 %v8216_v43 }
 0x6b7   :  { %7673 = vmatpush3.bf16.msra.mxu1 %v8217_v21  ;;  %7695 = vmatpush3.bf16.msra.mxu0 %v8218_v62 }
 0x6b8   :  { %7674 = vmatprep.subr.bf16.mxu1 %v8219_v5  ;;  %7696 = vmatprep.subr.bf16.mxu0 %v8220_v2  ;;  %v8229_v5 = vld [vmem:[%s10696_s11 + $0x100] sm:$0xff]  }
 0x6b9   :  { %v8230_v2 = vld [vmem:[%s10696_s11 + $0x180] sm:$0xff]  }
 0x6bb   :  { %7675 = vmatpush3.bf16.msra.mxu1 %v8221_v15  ;;  %7697 = vmatpush3.bf16.msra.mxu0 %v8222_v11 }
 0x6bc   :  { %7676 = vmatprep.subr.bf16.mxu1 %v8223_v48  ;;  %7698 = vmatprep.subr.bf16.mxu0 %v8224_v58 }
 0x6bf   :  { %7677 = vmatpush3.bf16.msra.mxu1 %v8225_v12  ;;  %7699 = vmatpush3.bf16.msra.mxu0 %v8226_v4  ;;  %v8231_v12 = vld [vmem:[%s10696_s11 + $0x148] sm:$0xff]  }
 0x6c0   :  { %7706 = vmatprep.subr.bf16.mxu1 %v8227_v35  ;;  %7728 = vmatprep.subr.bf16.mxu0 %v8228_v7  ;;  %v8232_v4 = vld [vmem:[%s10696_s11 + $0x1c8] sm:$0xff]   ;;  %v1374_v35 = vrot.slane %v9386_v50, %v8822_v40 }
 0x75d   :  { %v1616_v3 = vpop.f32.mrb[28].mxu1  ;;  %v1659_v52 = vpop.f32.mrb[16].mxu0 }
 0x75e   :  { %v1617_v39 = vadd.f32 %v1616_v3, %v1342_v18  ;;  %v1660_v63 = vadd.f32 %v1659_v52, %v1350_v26  ;;  %v1618_v51 = vpop.f32.mrb[29].mxu1  ;;  %v1661_v17 = vpop.f32.mrb[17].mxu0 }
 0x75f   :  { %v1619_v36 = vadd.f32 %v1618_v51, %v1346_v55  ;;  %v1662_v19 = vadd.f32 %v1661_v17, %v1354_v20  ;;  %v1620_v23 = vpop.f32.mrb[30].mxu1  ;;  %v1663_v24 = vpop.f32.mrb[18].mxu0 }
 0x760   :  { %v1621_v25 = vadd.f32 %v1620_v23, %v1342_v18  ;;  %v1664_v9 = vadd.f32 %v1663_v24, %v1350_v26  ;;  %v1622_v27 = vpop.f32.mrb[31].mxu1  ;;  %v1665_v30 = vpop.f32.mrb[19].mxu0  ;;  %v1926_v60 = vmax.f32 %v1617_v39, 0.0  ;;  %v1928_v57 = vmax.f32 %v1660_v63, 0.0 }
 0x761   :  { %v1623_v59 = vadd.f32 %v1622_v27, %v1346_v55  ;;  %v1666_v34 = vadd.f32 %v1665_v30, %v1354_v20  ;;  %v1927_v46 = vmax.f32 %v1619_v36, 0.0  ;;  %v1929_v47 = vmax.f32 %v1662_v19, 0.0  ;;  %v8233_v36 = vld [vmem:[%s10696_s11 + $0x108] sm:$0xff]   ;;  %v8235_v30 = vld [vmem:[%s10696_s11 + $0x150] sm:$0xff]  }
 0x762   :  { %v1942_v14 = vmax.f32 %v1621_v25, 0.0  ;;  %v1944_v38 = vmax.f32 %v1664_v9, 0.0  ;;  %v1382_v55 = vrot.slane %v9386_v50, %v9352_v41  ;;  %v1378_v63 = vrot.slane %v9386_v50, %v9358_v13  ;;  %v8234_v19 = vld [vmem:[%s10696_s11 + $0x188] sm:$0xff]  }
 0x763   :  { %v1943_v6 = vmax.f32 %v1623_v59, 0.0  ;;  %v1945_v8 = vmax.f32 %v1666_v34, 0.0  ;;  %v1386_v23 = vrot.slane %v9386_v50, %v9361_v16 }
 0x764   :  { %v2214_v0 = vpack.c.bf16 %v1942_v14, %v1926_v60  ;;  %v2216_v61 = vpack.c.bf16 %v1944_v38, %v1928_v57 }
 0x765   :  { %v2215_v33 = vpack.c.bf16 %v1943_v6, %v1927_v46  ;;  %v2217_v43 = vpack.c.bf16 %v1945_v8, %v1929_v47  ;;  %v1702_v21 = vpop.f32.mrb[32].mxu1  ;;  %v1745_v62 = vpop.f32.mrb[20].mxu0  ;;  %v8237_v47 = vld [vmem:[%s10696_s11 + $0x110] sm:$0xff]  }
 0x766   :  { %v1703_v15 = vadd.f32 %v1702_v21, %v1358_v31  ;;  %v1746_v11 = vadd.f32 %v1745_v62, %v1366_v32  ;;  %v1704_v48 = vpop.f32.mrb[33].mxu1  ;;  %v1747_v58 = vpop.f32.mrb[21].mxu0  ;;  %v8238_v6 = vld [vmem:[%s10696_s11 + $0x190] sm:$0xff]   ;;  %v8240_v21 = vld [vmem:[%s10696_s11 + $0x1d8] sm:$0xff]  }
 0x767   :  { %v1705_v7 = vadd.f32 %v1704_v48, %v1362_v28  ;;  %v1748_v10 = vadd.f32 %v1747_v58, %v1370_v56  ;;  %v1706_v18 = vpop.f32.mrb[34].mxu1  ;;  %v1749_v26 = vpop.f32.mrb[22].mxu0  ;;  %3037 = vmatprep.mubr.bf16.mxu1 %v2215_v33  ;;  %3078 = vmatprep.mubr.bf16.mxu0 %v2217_v43  ;;  %v8239_v43 = vld [vmem:[%s10696_s11 + $0x158] sm:$0xff]  }
 0x768   :  { %v1707_v20 = vadd.f32 %v1706_v18, %v1358_v31  ;;  %v1750_v3 = vadd.f32 %v1749_v26, %v1366_v32  ;;  %v1708_v52 = vpop.f32.mrb[35].mxu1  ;;  %v1751_v39 = vpop.f32.mrb[23].mxu0  ;;  %3038 = vmatmul.mubr.bf16.vlgmr.msra.gmra.mrb[44].mxu1 %v2214_v0  ;;  %3079 = vmatmul.mubr.bf16.vlgmr.msra.gmra.mrb[32].mxu0 %v2216_v61  ;;  %v1930_v24 = vmax.f32 %v1703_v15, 0.0  ;;  %v1932_v25 = vmax.f32 %v1746_v11, 0.0  ;;  %v8236_v31 = vld [vmem:[%s10696_s11 + $0x1d0] sm:$0xff]  }
 0x769   :  { %v1709_v51 = vadd.f32 %v1708_v52, %v1362_v28  ;;  %v1752_v17 = vadd.f32 %v1751_v39, %v1370_v56  ;;  %7707 = vmatpush3.bf16.msra.mxu1 %v8229_v5  ;;  %7729 = vmatpush3.bf16.msra.mxu0 %v8230_v2  ;;  %v1931_v32 = vmax.f32 %v1705_v7, 0.0  ;;  %v1933_v59 = vmax.f32 %v1748_v10, 0.0 }
 0x76a   :  { %v1946_v9 = vmax.f32 %v1707_v20, 0.0  ;;  %v1948_v27 = vmax.f32 %v1750_v3, 0.0  ;;  %7708 = vmatprep.subr.bf16.mxu1 %v8231_v12  ;;  %7730 = vmatprep.subr.bf16.mxu0 %v8232_v4  ;;  %v1390_v11 = vrot.slane %v9386_v50, %v9368_v22  ;;  %v1398_v7 = vrot.slane %v9386_v50, %v9371_v37  ;;  %v8241_v20 = vld [vmem:[%s10696_s11 + $0x118] sm:$0xff]  }
 0x76b   :  { %v1947_v34 = vmax.f32 %v1709_v51, 0.0  ;;  %v1949_v28 = vmax.f32 %v1752_v17, 0.0  ;;  %v1394_v10 = vrot.slane %v9386_v50, %v9374_v44  ;;  %v8244_v17 = vld [vmem:[%s10696_s11 + $0x1e0] sm:$0xff]  }
 0x76c   :  { %v9420_v56 = vpack.c.bf16 %v1946_v9, %v1930_v24  ;;  %v9422_v60 = vpack.c.bf16 %v1948_v27, %v1932_v25 }
 0x76d   :  { %v2219_v57 = vpack.c.bf16 %v1947_v34, %v1931_v32  ;;  %v2221_v14 = vpack.c.bf16 %v1949_v28, %v1933_v59  ;;  %7709 = vmatpush3.bf16.msra.mxu1 %v8233_v36  ;;  %7731 = vmatpush3.bf16.msra.mxu0 %v8234_v19  ;;  %v1788_v38 = vpop.f32.mrb[36].mxu1  ;;  %v1831_v46 = vpop.f32.mrb[24].mxu0  ;;  %v8245_v32 = vld [vmem:[%s10696_s11 + $0x120] sm:$0xff]  }
 0x76e   :  { %v1789_v8 = vadd.f32 %v1788_v38, %v1374_v35  ;;  %v1832_v0 = vadd.f32 %v1831_v46, %v1382_v55  ;;  %v1790_v61 = vpop.f32.mrb[37].mxu1  ;;  %v1833_v33 = vpop.f32.mrb[25].mxu0  ;;  %7710 = vmatprep.subr.bf16.mxu1 %v8235_v30  ;;  %7732 = vmatprep.subr.bf16.mxu0 %v8236_v31  ;;  %v8246_v59 = vld [vmem:[%s10696_s11 + $0x1a0] sm:$0xff]   ;;  %v8247_v38 = vld [vmem:[%s10696_s11 + $0x168] sm:$0xff]  }
 0x76f   :  { %v1791_v62 = vadd.f32 %v1790_v61, %v1378_v63  ;;  %v1834_v5 = vadd.f32 %v1833_v33, %v1386_v23  ;;  %v1792_v2 = vpop.f32.mrb[38].mxu1  ;;  %v1835_v15 = vpop.f32.mrb[26].mxu0  ;;  %3119 = vmatprep.mubr.bf16.mxu1 %v2219_v57  ;;  %3160 = vmatprep.mubr.bf16.mxu0 %v2221_v14  ;;  %v8248_v46 = vld [vmem:[%s10696_s11 + $0x1e8] sm:$0xff]  }
 0x770   :  { %v1793_v48 = vadd.f32 %v1792_v2, %v1374_v35  ;;  %v1836_v58 = vadd.f32 %v1835_v15, %v1382_v55  ;;  %v1794_v12 = vpop.f32.mrb[39].mxu1  ;;  %v1837_v4 = vpop.f32.mrb[27].mxu0  ;;  %v8242_v35 = vld [vmem:[%s10696_s11 + $0x198] sm:$0xff]   ;;  %v1402_v55 = vrot.slane %v9386_v50, %v9377_v45  ;;  %v1934_v3 = vmax.f32 %v1789_v8, 0.0  ;;  %v8249_v2 = vld [vmem:[%s10696_s11 + $0x128] sm:$0xff]  }
 0x771   :  { %v1795_v18 = vadd.f32 %v1794_v12, %v1378_v63  ;;  %v1838_v26 = vadd.f32 %v1837_v4, %v1386_v23  ;;  %7711 = vmatpush3.bf16.msra.mxu1 %v8237_v47  ;;  %7733 = vmatpush3.bf16.msra.mxu0 %v8238_v6  ;;  %v1936_v52 = vmax.f32 %v1832_v0, 0.0  ;;  %v8243_v63 = vld [vmem:[%s10696_s11 + $0x160] sm:$0xff]   ;;  %v1935_v36 = vmax.f32 %v1791_v62, 0.0  ;;  %v8250_v15 = vld [vmem:[%s10696_s11 + $0x1a8] sm:$0xff]  }
 0x772   :  { %v1950_v39 = vmax.f32 %v1793_v48, 0.0  ;;  %v1952_v51 = vmax.f32 %v1836_v58, 0.0  ;;  %7712 = vmatprep.subr.bf16.mxu1 %v8239_v43  ;;  %7734 = vmatprep.subr.bf16.mxu0 %v8240_v21  ;;  %v1937_v19 = vmax.f32 %v1834_v5, 0.0 }
 0x773   :  { %v1951_v23 = vmax.f32 %v1795_v18, 0.0  ;;  %v1953_v24 = vmax.f32 %v1838_v26, 0.0 }
 0x774   :  { %v9456_v25 = vpack.c.bf16 %v1950_v39, %v1934_v3  ;;  %v9458_v50 = vpack.c.bf16 %v1952_v51, %v1936_v52  ;;  %v8253_v39 = vld [vmem:[%s10696_s11 + $0x130] sm:$0xff]  }
 0x775   :  { %v9460_v9 = vpack.c.bf16 %v1951_v23, %v1935_v36  ;;  %v9462_v27 = vpack.c.bf16 %v1953_v24, %v1937_v19  ;;  %7713 = vmatpush3.bf16.msra.mxu1 %v8241_v20  ;;  %7735 = vmatpush3.bf16.msra.mxu0 %v8242_v35  ;;  %v1874_v30 = vpop.f32.mrb[40].mxu1  ;;  %v1917_v31 = vpop.f32.mrb[28].mxu0  ;;  %v8254_v51 = vld [vmem:[%s10696_s11 + $0x1b0] sm:$0xff]   ;;  %v8257_v36 = vld [vmem:[%s10696_s11 + $0x138] sm:$0xff]   ;;  %v8259_v23 = vld [vmem:[%s10696_s11 + $0x240] sm:$0xff]  }
 0x776   :  { %v1875_v34 = vadd.f32 %v1874_v30, %v1390_v11  ;;  %v1918_v28 = vadd.f32 %v1917_v31, %v1398_v7  ;;  %v1876_v57 = vpop.f32.mrb[41].mxu1  ;;  %v1919_v14 = vpop.f32.mrb[29].mxu0  ;;  %7714 = vmatprep.subr.bf16.mxu1 %v8243_v63  ;;  %7736 = vmatprep.subr.bf16.mxu0 %v8244_v17  ;;  %v8255_v63 = vld [vmem:[%s10696_s11 + $0x178] sm:$0xff]   ;;  %v8260_v24 = vld [vmem:[%s10696_s11 + $0x2c0] sm:$0xff]  }
 0x777   :  { %v1877_v47 = vadd.f32 %v1876_v57, %v1394_v10  ;;  %v1920_v6 = vadd.f32 %v1919_v14, %v1402_v55  ;;  %v1878_v8 = vpop.f32.mrb[42].mxu1  ;;  %v1921_v0 = vpop.f32.mrb[30].mxu0  ;;  %v8256_v17 = vld [vmem:[%s10696_s11 + $0x1f8] sm:$0xff]   ;;  %v8261_v30 = vld [vmem:[%s10696_s11 + $0x200] sm:$0xff]  }
 0x778   :  { %v1879_v61 = vadd.f32 %v1878_v8, %v1390_v11  ;;  %v1922_v33 = vadd.f32 %v1921_v0, %v1398_v7  ;;  %v1880_v43 = vpop.f32.mrb[43].mxu1  ;;  %v1923_v21 = vpop.f32.mrb[31].mxu0  ;;  %v1938_v48 = vmax.f32 %v1875_v34, 0.0  ;;  %v1940_v58 = vmax.f32 %v1918_v28, 0.0  ;;  %v8251_v11 = vld [vmem:[%s10696_s11 + $0x170] sm:$0xff]   ;;  %v8258_v19 = vld [vmem:[%s10696_s11 + $0x1b8] sm:$0xff]  }
 0x779   :  { %v1881_v62 = vadd.f32 %v1880_v43, %v1394_v10  ;;  %v1924_v5 = vadd.f32 %v1923_v21, %v1402_v55  ;;  %7715 = vmatpush3.bf16.msra.mxu1 %v8245_v32  ;;  %7737 = vmatpush3.bf16.msra.mxu0 %v8246_v59  ;;  %v8252_v7 = vld [vmem:[%s10696_s11 + $0x1f0] sm:$0xff]   ;;  %v1939_v10 = vmax.f32 %v1877_v47, 0.0  ;;  %v1941_v18 = vmax.f32 %v1920_v6, 0.0  ;;  %v8262_v31 = vld [vmem:[%s10696_s11 + $0x280] sm:$0xff]   ;;  %v8263_v32 = vld [vmem:[%s10696_s11 + $0x248] sm:$0xff]  }
 0x77a   :  { %v1954_v12 = vmax.f32 %v1879_v61, 0.0  ;;  %v1956_v4 = vmax.f32 %v1922_v33, 0.0  ;;  %7716 = vmatprep.subr.bf16.mxu1 %v8247_v38  ;;  %7738 = vmatprep.subr.bf16.mxu0 %v8248_v46  ;;  %v8264_v59 = vld [vmem:[%s10696_s11 + $0x2c8] sm:$0xff]   ;;  %v8271_v57 = vld [vmem:[%s10696_s11 + $0x258] sm:$0xff]   ;;  %v8275_v47 = vld [vmem:[%s10696_s11 + $0x260] sm:$0xff]  }
 0x77b   :  { %v1955_v26 = vmax.f32 %v1881_v62, 0.0  ;;  %v1957_v20 = vmax.f32 %v1924_v5, 0.0  ;;  %v8265_v34 = vld [vmem:[%s10696_s11 + $0x208] sm:$0xff]   ;;  %v8272_v14 = vld [vmem:[%s10696_s11 + $0x2d8] sm:$0xff]   ;;  %v8276_v6 = vld [vmem:[%s10696_s11 + $0x2e0] sm:$0xff]  }
 0x77c   :  { %v9488_v35 = vpack.c.bf16 %v1954_v12, %v1938_v48  ;;  %v9490_v55 = vpack.c.bf16 %v1956_v4, %v1940_v58  ;;  %v8266_v28 = vld [vmem:[%s10696_s11 + $0x288] sm:$0xff]   ;;  %v8273_v38 = vld [vmem:[%s10696_s11 + $0x218] sm:$0xff]   ;;  %v8277_v8 = vld [vmem:[%s10696_s11 + $0x220] sm:$0xff]  }
 0x77d   :  { %v9492_v3 = vpack.c.bf16 %v1955_v26, %v1939_v10  ;;  %v9494_v52 = vpack.c.bf16 %v1957_v20, %v1941_v18  ;;  %7717 = vmatpush3.bf16.msra.mxu1 %v8249_v2  ;;  %7739 = vmatpush3.bf16.msra.mxu0 %v8250_v15  ;;  %v8274_v46 = vld [vmem:[%s10696_s11 + $0x298] sm:$0xff]   ;;  %v8278_v0 = vld [vmem:[%s10696_s11 + $0x2a0] sm:$0xff]   ;;  %v8279_v61 = vld [vmem:[%s10696_s11 + $0x268] sm:$0xff]  }
 0x77e   :  { %7718 = vmatprep.subr.bf16.mxu1 %v8251_v11  ;;  %7740 = vmatprep.subr.bf16.mxu0 %v8252_v7  ;;  %v8280_v33 = vld [vmem:[%s10696_s11 + $0x2e8] sm:$0xff]   ;;  %v8283_v62 = vld [vmem:[%s10696_s11 + $0x270] sm:$0xff]   ;;  %v8287_v48 = vld [vmem:[%s10696_s11 + $0x278] sm:$0xff]  }
 0x77f   :  { %v8281_v43 = vld [vmem:[%s10696_s11 + $0x228] sm:$0xff]   ;;  %v8284_v5 = vld [vmem:[%s10696_s11 + $0x2f0] sm:$0xff]   ;;  %v8288_v58 = vld [vmem:[%s10696_s11 + $0x2f8] sm:$0xff]  }
 0x780   :  { %v8282_v21 = vld [vmem:[%s10696_s11 + $0x2a8] sm:$0xff]   ;;  %v8285_v2 = vld [vmem:[%s10696_s11 + $0x230] sm:$0xff]   ;;  %v8289_v12 = vld [vmem:[%s10696_s11 + $0x238] sm:$0xff]  }
 0x781   :  { %7719 = vmatpush3.bf16.msra.mxu1 %v8253_v39  ;;  %7741 = vmatpush3.bf16.msra.mxu0 %v8254_v51  ;;  %v8286_v15 = vld [vmem:[%s10696_s11 + $0x2b0] sm:$0xff]   ;;  %v8290_v4 = vld [vmem:[%s10696_s11 + $0x2b8] sm:$0xff]   ;;  %v8291_v11 = vld [vmem:[%s10696_s11 + $0x340] sm:$0xff]  }
 0x782   :  { %7720 = vmatprep.subr.bf16.mxu1 %v8255_v63  ;;  %7742 = vmatprep.subr.bf16.mxu0 %v8256_v17  ;;  %v8292_v7 = vld [vmem:[%s10696_s11 + $0x3c0] sm:$0xff]   ;;  %v8295_v26 = vld [vmem:[%s10696_s11 + $0x348] sm:$0xff]   ;;  %v8302_v63 = vld [vmem:[%s10696_s11 + $0x390] sm:$0xff]  }
 0x783   :  { %v8293_v10 = vld [vmem:[%s10696_s11 + $0x300] sm:$0xff]   ;;  %v8296_v20 = vld [vmem:[%s10696_s11 + $0x3c8] sm:$0xff]   ;;  %v8304_v17 = vld [vmem:[%s10696_s11 + $0x3d8] sm:$0xff]  }
 0x784   :  { %v8294_v18 = vld [vmem:[%s10696_s11 + $0x380] sm:$0xff]   ;;  %v8297_v39 = vld [vmem:[%s10696_s11 + $0x308] sm:$0xff]  }
 0x785   :  { %7721 = vmatpush3.bf16.msra.mxu1 %v8257_v36  ;;  %7743 = vmatpush3.bf16.msra.mxu0 %v8258_v19  ;;  %v8298_v51 = vld [vmem:[%s10696_s11 + $0x388] sm:$0xff]   ;;  %v8305_v36 = vld [vmem:[%s10696_s11 + $0x318] sm:$0xff]  }
 0x786   :  { %7750 = vmatprep.subr.bf16.mxu1 %v8259_v23  ;;  %7772 = vmatprep.subr.bf16.mxu0 %v8260_v24  ;;  %v8306_v19 = vld [vmem:[%s10696_s11 + $0x398] sm:$0xff]   ;;  %v8307_v23 = vld [vmem:[%s10696_s11 + $0x360] sm:$0xff]  }
 0x787   :  { %v8308_v24 = vld [vmem:[%s10696_s11 + $0x3e0] sm:$0xff]  }
 0x788   :  { %3120 = vmatmul.mubr.bf16.vlgmr.msra.gmra.mrb[48].mxu1 %v9420_v56  ;;  %3161 = vmatmul.mubr.bf16.vlgmr.msra.gmra.mrb[36].mxu0 %v9422_v60  ;;  %v8267_v56 = vld [vmem:[%s10696_s11 + $0x250] sm:$0xff]  }
 0x789   :  { %7751 = vmatpush3.bf16.msra.mxu1 %v8261_v30  ;;  %3201 = vmatprep.mubr.bf16.mxu1 %v9460_v9  ;;  %v8268_v60 = vld [vmem:[%s10696_s11 + $0x2d0] sm:$0xff]   ;;  %v8309_v30 = vld [vmem:[%s10696_s11 + $0x320] sm:$0xff]  }
 0x78a   :  { %7773 = vmatpush3.bf16.msra.mxu0 %v8262_v31  ;;  %3242 = vmatprep.mubr.bf16.mxu0 %v9462_v27  ;;  %v8269_v9 = vld [vmem:[%s10696_s11 + $0x210] sm:$0xff]   ;;  %v8310_v31 = vld [vmem:[%s10696_s11 + $0x3a0] sm:$0xff]  }
 0x78b   :  { %7752 = vmatprep.subr.bf16.mxu1 %v8263_v32  ;;  %7774 = vmatprep.subr.bf16.mxu0 %v8264_v59  ;;  %v8270_v27 = vld [vmem:[%s10696_s11 + $0x290] sm:$0xff]   ;;  %v8311_v32 = vld [vmem:[%s10696_s11 + $0x368] sm:$0xff]  }
 0x78c   :  { %v8312_v59 = vld [vmem:[%s10696_s11 + $0x3e8] sm:$0xff]  }
 0x78d   :  { %7753 = vmatpush3.bf16.msra.mxu1 %v8265_v34  ;;  %v8313_v34 = vld [vmem:[%s10696_s11 + $0x328] sm:$0xff]  }
 0x78e   :  { %7775 = vmatpush3.bf16.msra.mxu0 %v8266_v28  ;;  %7754 = vmatprep.subr.bf16.mxu1 %v8267_v56  ;;  %v8314_v28 = vld [vmem:[%s10696_s11 + $0x3a8] sm:$0xff]   ;;  %v8315_v56 = vld [vmem:[%s10696_s11 + $0x370] sm:$0xff]  }
 0x78f   :  { %7776 = vmatprep.subr.bf16.mxu0 %v8268_v60  ;;  %v8316_v60 = vld [vmem:[%s10696_s11 + $0x3f0] sm:$0xff]  }
 0x791   :  { %7755 = vmatpush3.bf16.msra.mxu1 %v8269_v9  ;;  %v8317_v9 = vld [vmem:[%s10696_s11 + $0x330] sm:$0xff]  }
 0x792   :  { %7777 = vmatpush3.bf16.msra.mxu0 %v8270_v27  ;;  %7756 = vmatprep.subr.bf16.mxu1 %v8271_v57  ;;  %v8318_v27 = vld [vmem:[%s10696_s11 + $0x3b0] sm:$0xff]   ;;  %v8319_v57 = vld [vmem:[%s10696_s11 + $0x378] sm:$0xff]  }
 0x793   :  { %7778 = vmatprep.subr.bf16.mxu0 %v8272_v14  ;;  %v8320_v14 = vld [vmem:[%s10696_s11 + $0x3f8] sm:$0xff]  }
 0x795   :  { %7757 = vmatpush3.bf16.msra.mxu1 %v8273_v38  ;;  %v8321_v38 = vld [vmem:[%s10696_s11 + $0x338] sm:$0xff]  }
 0x796   :  { %7779 = vmatpush3.bf16.msra.mxu0 %v8274_v46  ;;  %7758 = vmatprep.subr.bf16.mxu1 %v8275_v47  ;;  %v8322_v46 = vld [vmem:[%s10696_s11 + $0x3b8] sm:$0xff]   ;;  %v8621_v47 = vld [vmem:[%s10704_s19] sm:$0xff]  }
 0x797   :  { %7780 = vmatprep.subr.bf16.mxu0 %v8276_v6  ;;  %v8622_v6 = vld [vmem:[%s10704_s19 + $0x8] sm:$0xff]  }
 0x799   :  { %7759 = vmatpush3.bf16.msra.mxu1 %v8277_v8 }
 0x79a   :  { %7781 = vmatpush3.bf16.msra.mxu0 %v8278_v0  ;;  %7760 = vmatprep.subr.bf16.mxu1 %v8279_v61 }
 0x79b   :  { %7782 = vmatprep.subr.bf16.mxu0 %v8280_v33 }
 0x79d   :  { %7761 = vmatpush3.bf16.msra.mxu1 %v8281_v43 }
 0x79e   :  { %7783 = vmatpush3.bf16.msra.mxu0 %v8282_v21  ;;  %7762 = vmatprep.subr.bf16.mxu1 %v8283_v62 }
 0x79f   :  { %7784 = vmatprep.subr.bf16.mxu0 %v8284_v5 }
 0x7a1   :  { %7763 = vmatpush3.bf16.msra.mxu1 %v8285_v2 }
 0x7a2   :  { %7785 = vmatpush3.bf16.msra.mxu0 %v8286_v15  ;;  %7764 = vmatprep.subr.bf16.mxu1 %v8287_v48 }
 0x7a3   :  { %7786 = vmatprep.subr.bf16.mxu0 %v8288_v58 }
 0x7a5   :  { %7765 = vmatpush3.bf16.msra.mxu1 %v8289_v12 }
 0x7a6   :  { %7787 = vmatpush3.bf16.msra.mxu0 %v8290_v4  ;;  %7794 = vmatprep.subr.bf16.mxu1 %v8291_v11 }
 0x7a7   :  { %7816 = vmatprep.subr.bf16.mxu0 %v8292_v7 }
 0x7a8   :  { %3202 = vmatmul.mubr.bf16.vlgmr.msra.gmra.mrb[52].mxu1 %v9456_v25  ;;  %v8299_v25 = vld [vmem:[%s10696_s11 + $0x350] sm:$0xff]  }
 0x7a9   :  { %3243 = vmatmul.mubr.bf16.vlgmr.msra.gmra.mrb[40].mxu0 %v9458_v50  ;;  %7795 = vmatpush3.bf16.msra.mxu1 %v8293_v10  ;;  %v8300_v50 = vld [vmem:[%s10696_s11 + $0x3d0] sm:$0xff]  }
 0x7aa   :  { %3283 = vmatprep.mubr.bf16.mxu1 %v9492_v3  ;;  %7817 = vmatpush3.bf16.msra.mxu0 %v8294_v18  ;;  %v8301_v3 = vld [vmem:[%s10696_s11 + $0x310] sm:$0xff]  }
 0x7ab   :  { %3324 = vmatprep.mubr.bf16.mxu0 %v9494_v52  ;;  %7796 = vmatprep.subr.bf16.mxu1 %v8295_v26  ;;  %v8303_v52 = vld [vmem:[%s10696_s11 + $0x358] sm:$0xff]  }
 0x7ac   :  { %7818 = vmatprep.subr.bf16.mxu0 %v8296_v20 }
 0x7ad   :  { %7797 = vmatpush3.bf16.msra.mxu1 %v8297_v39 }
 0x7ae   :  { %7819 = vmatpush3.bf16.msra.mxu0 %v8298_v51  ;;  %7798 = vmatprep.subr.bf16.mxu1 %v8299_v25 }
 0x7af   :  { %7820 = vmatprep.subr.bf16.mxu0 %v8300_v50 }
 0x7b1   :  { %7799 = vmatpush3.bf16.msra.mxu1 %v8301_v3 }
 0x7b2   :  { %7821 = vmatpush3.bf16.msra.mxu0 %v8302_v63  ;;  %7800 = vmatprep.subr.bf16.mxu1 %v8303_v52 }
 0x7b3   :  { %7822 = vmatprep.subr.bf16.mxu0 %v8304_v17 }
 0x7b5   :  { %7801 = vmatpush3.bf16.msra.mxu1 %v8305_v36 }
 0x7b6   :  { %7823 = vmatpush3.bf16.msra.mxu0 %v8306_v19  ;;  %7802 = vmatprep.subr.bf16.mxu1 %v8307_v23 }
 0x7b7   :  { %7824 = vmatprep.subr.bf16.mxu0 %v8308_v24 }
 0x7b9   :  { %7803 = vmatpush3.bf16.msra.mxu1 %v8309_v30 }
 0x7ba   :  { %7825 = vmatpush3.bf16.msra.mxu0 %v8310_v31  ;;  %7804 = vmatprep.subr.bf16.mxu1 %v8311_v32 }
 0x7bb   :  { %7826 = vmatprep.subr.bf16.mxu0 %v8312_v59 }
 0x7bd   :  { %7805 = vmatpush3.bf16.msra.mxu1 %v8313_v34 }
 0x7be   :  { %7827 = vmatpush3.bf16.msra.mxu0 %v8314_v28  ;;  %7806 = vmatprep.subr.bf16.mxu1 %v8315_v56 }
 0x7bf   :  { %7828 = vmatprep.subr.bf16.mxu0 %v8316_v60 }
 0x7c1   :  { %7807 = vmatpush3.bf16.msra.mxu1 %v8317_v9 }
 0x7c2   :  { %7829 = vmatpush3.bf16.msra.mxu0 %v8318_v27  ;;  %7808 = vmatprep.subr.bf16.mxu1 %v8319_v57 }
 0x7c3   :  { %7830 = vmatprep.subr.bf16.mxu0 %v8320_v14 }
 0x7c5   :  { %7809 = vmatpush3.bf16.msra.mxu1 %v8321_v38 }
 0x7c6   :  { %7831 = vmatpush3.bf16.msra.mxu0 %v8322_v46  ;;  %8121 = vmatprep.subr.bf16.mxu1 %v8648_v1 }
 0x7c7   :  { %8129 = vmatprep.subr.bf16.mxu0 %v8621_v47 }
 0x7c8   :  { %3284 = vmatmul.mubr.bf16.vlgmr.msra.gmra.mrb[56].mxu1 %v9488_v35  ;;  %v6980_v35 = vld [vmem:[%s10697_s12] ss:$0 sm:$0xff] }
 0x7c9   :  { %3325 = vmatmul.mubr.bf16.vlgmr.msra.gmra.mrb[44].mxu0 %v9490_v55  ;;  %8125 = vmatprep.mubr.msk.bf16.mxu1 %vm8649_vm0, %v8648_v1 }
 0x7ca   :  { %8130 = vmatpush3.bf16.msra.mxu0 %v8621_v47 }
 0x7cb   :  { %8131 = vmatprep.subr.bf16.mxu0 %v8622_v6 }
 0x7ce   :  { %8132 = vmatpush3.bf16.msra.mxu0 %v8622_v6 }
 0x7cf   :  { %8167 = vmatprep.subr.bf16.mxu0 %v8648_v1 }
 0x83b   :  { %v7678_v8 = vpop.f32.mrb[44].mxu1  ;;  %v7700_v0 = vpop.f32.mrb[32].mxu0 }
 0x83c   :  { %v7679_v61 = vpop.f32.mrb[45].mxu1  ;;  %v7701_v55 = vpop.f32.mrb[33].mxu0 }
 0x83d   :  { %v7680_v33 = vadd.f32 %v7679_v61, %v7678_v8  ;;  %v7702_v43 = vadd.f32 %v7701_v55, %v7700_v0  ;;  %v7681_v21 = vpop.f32.mrb[46].mxu1  ;;  %v7703_v62 = vpop.f32.mrb[34].mxu0 }
 0x83e   :  { %v7682_v5 = vpop.f32.mrb[47].mxu1  ;;  %v7704_v2 = vpop.f32.mrb[35].mxu0 }
 0x83f   :  { %v3040_v15 = vadd.f32 %v7680_v33, %v6980_v35  ;;  %v7683_v48 = vadd.f32 %v7682_v5, %v7681_v21  ;;  %v7705_v58 = vadd.f32 %v7704_v2, %v7703_v62 }
 0x841   :  { %v3081_v12 = vadd.f32 %v7702_v43, %v3040_v15  ;;  %v3043_v4 = vadd.f32 %v7683_v48, %v6980_v35 }
 0x843   :  { %v3084_v11 = vadd.f32 %v7705_v58, %v3043_v4 }
 0x85b   :  { %v7722_v7 = vpop.f32.mrb[48].mxu1  ;;  %v7744_v10 = vpop.f32.mrb[36].mxu0 }
 0x85c   :  { %v7723_v18 = vpop.f32.mrb[49].mxu1  ;;  %v7745_v26 = vpop.f32.mrb[37].mxu0 }
 0x85d   :  { %v7724_v20 = vadd.f32 %v7723_v18, %v7722_v7  ;;  %v7746_v39 = vadd.f32 %v7745_v26, %v7744_v10  ;;  %v7725_v51 = vpop.f32.mrb[50].mxu1  ;;  %v7747_v25 = vpop.f32.mrb[38].mxu0 }
 0x85e   :  { %v7726_v50 = vpop.f32.mrb[51].mxu1  ;;  %v7748_v3 = vpop.f32.mrb[39].mxu0 }
 0x85f   :  { %v3122_v63 = vadd.f32 %v7724_v20, %v3081_v12  ;;  %v7727_v52 = vadd.f32 %v7726_v50, %v7725_v51  ;;  %v7749_v17 = vadd.f32 %v7748_v3, %v7747_v25 }
 0x861   :  { %v3163_v36 = vadd.f32 %v7746_v39, %v3122_v63  ;;  %v3125_v19 = vadd.f32 %v7727_v52, %v3084_v11  ;;  %v8324_v52 = vld [vmem:[%s10719_s5 + $0x18] sm:$0xff]  }
 0x863   :  { %v3166_v23 = vadd.f32 %v7749_v17, %v3125_v19  ;;  %v8623_v17 = vld [vmem:[%s10705_s20] sm:$0x3] }
 0x87b   :  { %v7766_v24 = vpop.f32.mrb[52].mxu1 }
 0x87c   :  { %v7788_v30 = vpop.f32.mrb[40].mxu0  ;;  %v7767_v31 = vpop.f32.mrb[53].mxu1 }
 0x87d   :  { %v7768_v32 = vadd.f32 %v7767_v31, %v7766_v24  ;;  %v7789_v59 = vpop.f32.mrb[41].mxu0  ;;  %v7769_v34 = vpop.f32.mrb[54].mxu1 }
 0x87e   :  { %v7790_v28 = vadd.f32 %v7789_v59, %v7788_v30  ;;  %v7791_v56 = vpop.f32.mrb[42].mxu0  ;;  %v7770_v60 = vpop.f32.mrb[55].mxu1  ;;  %v7109_v59 = vld [vmem:[%s10698_s13] ss:$0 sm:$0xff] }
 0x87f   :  { %v3204_v9 = vadd.f32 %v7768_v32, %v3163_v36  ;;  %v7771_v27 = vadd.f32 %v7770_v60, %v7769_v34  ;;  %v7792_v57 = vpop.f32.mrb[43].mxu0 }
 0x880   :  { %v7793_v14 = vadd.f32 %v7792_v57, %v7791_v56 }
 0x881   :  { %v3245_v38 = vadd.f32 %v7790_v28, %v3204_v9  ;;  %v3207_v46 = vadd.f32 %v7771_v27, %v3166_v23  ;;  %v7110_v9 = vld [vmem:[%s10699_s14] ss:$0 sm:$0xff] }
 0x883   :  { %v3248_v47 = vadd.f32 %v7793_v14, %v3207_v46  ;;  %v7116_v46 = vld [vmem:[%s10721_s0 + $0x1] ss:$0 sm:$0xff] }
 0x89b   :  { %v7810_v6 = vpop.f32.mrb[56].mxu1 }
 0x89c   :  { %v7832_v8 = vpop.f32.mrb[44].mxu0  ;;  %v7811_v0 = vpop.f32.mrb[57].mxu1 }
 0x89d   :  { %v7812_v35 = vadd.f32 %v7811_v0, %v7810_v6  ;;  %v7833_v61 = vpop.f32.mrb[45].mxu0  ;;  %v7813_v55 = vpop.f32.mrb[58].mxu1 }
 0x89e   :  { %v7834_v33 = vadd.f32 %v7833_v61, %v7832_v8  ;;  %v7835_v43 = vpop.f32.mrb[46].mxu0  ;;  %v7814_v21 = vpop.f32.mrb[59].mxu1 }
 0x89f   :  { %v3286_v62 = vadd.f32 %v7812_v35, %v3245_v38  ;;  %v7815_v5 = vadd.f32 %v7814_v21, %v7813_v55  ;;  %v7836_v2 = vpop.f32.mrb[47].mxu0 }
 0x8a0   :  { %v7837_v15 = vadd.f32 %v7836_v2, %v7835_v43 }
 0x8a1   :  { %v3327_v48 = vadd.f32 %v7834_v33, %v3286_v62  ;;  %v3289_v58 = vadd.f32 %v7815_v5, %v3248_v47 }
 0x8a3   :  { %v3330_v12 = vadd.f32 %v7837_v15, %v3289_v58  ;;  %v3333_v4 = vadd.f32 %v3327_v48, %v9171_v53 }
 0x8a5   :  { %v3337_v11 = vsel %vm158_vm2, %v3333_v4, 0.0  ;;  %v3334_v7 = vadd.f32 %v3330_v12, %v9173_v54  ;;  %v8323_v54 = vld [vmem:[%s10719_s5 + $0x10] sm:$0xff]  }
 0x8a6   :  { %3338 = vadd.xlane.f32.xlu1 %v3337_v11  ;;  %8122 = vmatpush3.bf16.msra.mxu1 %v8323_v54 }
 0x8a7   :  { %v3340_v10 = vsel %vm158_vm2, %v3334_v7, 0.0  ;;  %8123 = vmatprep.subr.bf16.mxu1 %v8648_v1 }
 0x8a8   :  { %3341 = vadd.xlane.f32.xlu0 %v3340_v10 }
 0x8aa   :  { %8124 = vmatpush3.bf16.msra.mxu1 %v8324_v52 }
 0x8ab   :  { %8180 = vmatprep.subr.msk.bf16.mxu1 %vm883_vm3, %v8623_v17 }
 0x933   :  { %v3339_v18 = vpop.xlane.xlu1 %3338 }
 0x934   :  { %v3343_v26 = vmul.f32 0.03125, %v3339_v18 }
 0x935   :  { %v3342_v20 = vpop.xlane.xlu0 %3341 }
 0x936   :  { %v3345_v39 = vsub.f32 %v3333_v4, %v3343_v26  ;;  %v3344_v51 = vmul.f32 0.03125, %v3342_v20 }
 0x938   :  { %v3346_v25 = vsub.f32 %v3334_v7, %v3344_v51  ;;  %v3347_v50 = vmul.f32 %v3345_v39, %v3345_v39 }
 0x93a   :  { %v3349_v3 = vsel %vm158_vm2, %v3347_v50, 0.0  ;;  %v3348_v63 = vmul.f32 %v3346_v25, %v3346_v25 }
 0x93b   :  { %3350 = vadd.xlane.f32.xlu1 %v3349_v3 }
 0x93c   :  { %v3352_v53 = vsel %vm158_vm2, %v3348_v63, 0.0 }
 0x93d   :  { %3353 = vadd.xlane.f32.xlu0 %v3352_v53 }
 0x9c8   :  { %v3351_v36 = vpop.xlane.xlu1 %3350 }
 0x9c9   :  { %v3355_v19 = vmul.f32 0.03125, %v3351_v36 }
 0x9ca   :  { %v3354_v23 = vpop.xlane.xlu0 %3353 }
 0x9cb   :  { %v3357_v24 = vadd.f32 1e-05, %v3355_v19  ;;  %v3356_v30 = vmul.f32 0.03125, %v3354_v23 }
 0x9cd   :  { %8545 = vrsqrt.f32 %v3357_v24  ;;  %v3358_v31 = vadd.f32 1e-05, %v3356_v30 }
 0x9cf   :  { %8547 = vrsqrt.f32 %v3358_v31 }
 0x9d7   :  { %v8546_v32 = vpop.eup %8545 }
 0x9d8   :  { %v3361_v34 = vmul.f32 %v8546_v32, %v3345_v39 }
 0x9d9   :  { %v8548_v28 = vpop.eup %8547 }
 0x9da   :  { %v3369_v56 = vmul.f32 %v7109_v59, %v3361_v34  ;;  %v3362_v60 = vmul.f32 %v8548_v28, %v3346_v25 }
 0x9dc   :  { %v3370_v27 = vmul.f32 %v7109_v59, %v3362_v60  ;;  %v9752_v57 = vadd.f32 %v7110_v9, %v3369_v56 }
 0x9de   :  { %v9754_v14 = vadd.f32 %v7110_v9, %v3370_v27 }
 0x9e0   :  { %v3384_v38 = vpack.c.bf16 %v9754_v14, %v9752_v57 }
 0x9e2   :  { %8126 = vmatmul.mubr.msk.bf16.vlgmr.msra.gmra.mrb[60].mxu1 %vm158_vm2, %v3384_v38 }
 0x9e3   :  { %8150 = vmatpush3.bf16.msra.mxu1 %v8862_v42 }
 0xab5   :  { %v3442_v47 = vpop.f32.mrb[60].mxu1 }
 0xab6   :  { %v3443_v6 = vadd.f32 %v7116_v46, %v3442_v47  ;;  %v8127_v8 = vpop.f32.mrb[61].mxu1 }
 0xab7   :  { %v3445_v0 = vpop.f32.mrb[62].mxu1 }
 0xab8   :  { %v3446_v35 = vadd.f32 %v7116_v46, %v3445_v0  ;;  %3629 = vrot.lane.b32.xlu1 %v3443_v6, %s8651_s30  ;;  %v8128_v61 = vpop.f32.mrb[63].mxu1  ;;  %v3458_v42 = vrot.slane %v3443_v6, %v8814_v29  ;;  %v3451_v55 = vcombine.high %v3443_v6, %v3443_v6 }
 0xaba   :  { %3631 = vrot.lane.b32.xlu0 %v3446_v35, %s8651_s30  ;;  %v3466_v33 = vcombine.high %v3458_v42, %v3458_v42  ;;  %v3465_v43 = vrot.slane %v3451_v55, %v8814_v29  ;;  %v3474_v21 = vrot.slane %v3458_v42, %v8814_v29  ;;  %v3507_v2 = vrot.slane %v3446_v35, %v8814_v29 }
 0xabb   :  { %v3500_v12 = vcombine.high %v3446_v35, %v3446_v35 }
 0xabc   :  { %4213 = vrot.lane.b32.xlu1 %v3443_v6, %s8650_s4  ;;  %v3488_v62 = vrot.slane %v3466_v33, %v8814_v29  ;;  %v3467_v5 = vcombine.high %v3465_v43, %v3465_v43  ;;  %v3496_v15 = vcombine.high %v3474_v21, %v3474_v21  ;;  %v3481_v58 = vrot.slane %v3465_v43, %v8814_v29 }
 0xabd   :  { %v3515_v11 = vcombine.high %v3507_v2, %v3507_v2  ;;  %v3552_v10 = vrot.slane %v3474_v21, %v8822_v40  ;;  %v3514_v20 = vrot.slane %v3500_v12, %v8814_v29  ;;  %v3523_v19 = vrot.slane %v3507_v2, %v8814_v29 }
 0xabe   :  { %v3498_v48 = vcombine.high %v3488_v62, %v3488_v62  ;;  %v3495_v4 = vrot.slane %v3467_v5, %v8814_v29  ;;  %v3560_v7 = vrot.slane %v3496_v15, %v8822_v40  ;;  %v3556_v18 = vrot.slane %v3488_v62, %v8822_v40 }
 0xabf   :  { %v3568_v51 = vrot.slane %v3481_v58, %v8822_v40  ;;  %v3497_v17 = vcombine.high %v3481_v58, %v3481_v58  ;;  %v3537_v23 = vrot.slane %v3515_v11, %v8814_v29  ;;  %v3516_v28 = vcombine.high %v3514_v20, %v3514_v20 }
 0xac0   :  { %4215 = vrot.lane.b32.xlu1 %v3446_v35, %s8650_s4  ;;  %v3564_v26 = vrot.slane %v3498_v48, %v8822_v40  ;;  %v3572_v25 = vrot.slane %v3495_v4, %v8822_v40  ;;  %v3499_v36 = vcombine.high %v3495_v4, %v3495_v4  ;;  %v3584_v56 = vrot.slane %v3523_v19, %v8822_v40 }
 0xac1   :  { %v3576_v59 = vrot.slane %v3497_v17, %v8822_v40  ;;  %v3588_v60 = vrot.slane %v3537_v23, %v8822_v40  ;;  %v3545_v47 = vcombine.high %v3523_v19, %v3523_v19  ;;  %v3547_v6 = vcombine.high %v3537_v23, %v3537_v23 }
 0xac2   :  { %v3580_v34 = vrot.slane %v3499_v36, %v8822_v40  ;;  %v3530_v8 = vrot.slane %v3514_v20, %v8814_v29  ;;  %v3544_v0 = vrot.slane %v3516_v28, %v8814_v29 }
 0xac3   :  { %v3592_v42 = vrot.slane %v3545_v47, %v8822_v40  ;;  %v3596_v55 = vrot.slane %v3547_v6, %v8822_v40 }
 0xac4   :  { %v3600_v33 = vrot.slane %v3530_v8, %v8822_v40  ;;  %v3604_v43 = vrot.slane %v3544_v0, %v8822_v40  ;;  %v3546_v15 = vcombine.high %v3530_v8, %v3530_v8  ;;  %v3548_v29 = vcombine.high %v3544_v0, %v3544_v0 }
 0xac6   :  { %v3608_v12 = vrot.slane %v3546_v15, %v8822_v40  ;;  %v3612_v4 = vrot.slane %v3548_v29, %v8822_v40 }
 0xb2a   :  { %v3630_v39 = vpop.permute.xlu1 %3629 }
 0xb2b   :  { %v3635_v50 = vmul.f32 %v3630_v39, %v3552_v10  ;;  %v3636_v3 = vmul.f32 %v3630_v39, %v3556_v18  ;;  %v3637_v63 = vmul.f32 %v3630_v39, %v3560_v7  ;;  %v3638_v53 = vmul.f32 %v3630_v39, %v3564_v26 }
 0xb2c   :  { %v3639_v54 = vmul.f32 %v3630_v39, %v3568_v51  ;;  %v3640_v52 = vmul.f32 %v3630_v39, %v3572_v25  ;;  %v3632_v32 = vpop.permute.xlu0 %3631  ;;  %v3641_v9 = vmul.f32 %v3630_v39, %v3576_v59  ;;  %v3642_v27 = vmul.f32 %v3630_v39, %v3580_v34 }
 0xb2d   :  { %v3651_v24 = vpack.c.bf16 %v3636_v3, %v3635_v50  ;;  %v3652_v30 = vpack.c.bf16 %v3638_v53, %v3637_v63  ;;  %v3643_v38 = vmul.f32 %v3632_v32, %v3584_v56  ;;  %v3644_v46 = vmul.f32 %v3632_v32, %v3588_v60 }
 0xb2e   :  { %v3653_v31 = vpack.c.bf16 %v3640_v52, %v3639_v54  ;;  %v3654_v35 = vpack.c.bf16 %v3642_v27, %v3641_v9  ;;  %v3645_v21 = vmul.f32 %v3632_v32, %v3592_v42  ;;  %v3646_v62 = vmul.f32 %v3632_v32, %v3596_v55 }
 0xb2f   :  { %8133 = vmatprep.mubr.msk.bf16.mxu0 %vm158_vm2, %v3651_v24  ;;  %v3655_v61 = vpack.c.bf16 %v3644_v46, %v3643_v38  ;;  %v3647_v5 = vmul.f32 %v3632_v32, %v3600_v33  ;;  %v3648_v2 = vmul.f32 %v3632_v32, %v3604_v43  ;;  %v3649_v11 = vmul.f32 %v3632_v32, %v3608_v12 }
 0xb30   :  { %8134 = vmatmul.mubr.msk.bf16.vlgmr.msra.gmra.mrb[48].mxu0 %vm158_vm2, %v3652_v30  ;;  %v3656_v48 = vpack.c.bf16 %v3646_v62, %v3645_v21  ;;  %v3650_v7 = vmul.f32 %v3632_v32, %v3612_v4 }
 0xb31   :  { %8137 = vmatprep.mubr.msk.bf16.mxu0 %vm158_vm2, %v3653_v31  ;;  %v3657_v58 = vpack.c.bf16 %v3648_v2, %v3647_v5 }
 0xb32   :  { %v3658_v10 = vpack.c.bf16 %v3650_v7, %v3649_v11 }
 0xb38   :  { %8138 = vmatmul.mubr.msk.bf16.gmra.mrb[52].mxu0 %vm158_vm2, %v3654_v35 }
 0xb39   :  { %8141 = vmatprep.mubr.msk.bf16.mxu0 %vm158_vm2, %v3655_v61 }
 0xb40   :  { %8142 = vmatmul.mubr.msk.bf16.gmra.mrb[56].mxu0 %vm158_vm2, %v3656_v48 }
 0xb41   :  { %8145 = vmatprep.mubr.msk.bf16.mxu0 %vm158_vm2, %v3657_v58 }
 0xb48   :  { %8146 = vmatmul.mubr.msk.bf16.gmra.mrb[60].mxu0 %vm158_vm2, %v3658_v10 }
 0xb49   :  { %8171 = vmatprep.mubr.msk.bf16.mxu0 %vm8649_vm0, %v8648_v1 }
 0xc03   :  { %v8135_v18 = vpop.f32.mrb[48].mxu0 }
 0xc04   :  { %v3794_v26 = vsel %vm546_vm4, %v8135_v18, -inf  ;;  %v3717_v20 = vpop.f32.mrb[49].mxu0 }
 0xc05   :  { %v3795_v39 = vrot.slane %v3794_v26, 4  ;;  %v3780_v51 = vsel %vm546_vm4, %v3717_v20, -inf  ;;  %v8136_v25 = vpop.f32.mrb[50].mxu0 }
 0xc06   :  { %v3781_v50 = vrot.slane %v3780_v51, 4  ;;  %v3801_v3 = vsel %vm546_vm4, %v8136_v25, -inf  ;;  %v3720_v63 = vpop.f32.mrb[51].mxu0 }
 0xc07   :  { %v3796_v53 = vmax.f32 %v3794_v26, %v3795_v39  ;;  %v3802_v54 = vrot.slane %v3801_v3, 4  ;;  %v3787_v52 = vsel %vm546_vm4, %v3720_v63, -inf }
 0xc08   :  { %v3782_v17 = vmax.f32 %v3780_v51, %v3781_v50  ;;  %v3788_v36 = vrot.slane %v3787_v52, 4 }
 0xc09   :  { %v3797_v19 = vrot.slane %v3796_v53, 2  ;;  %v3803_v23 = vmax.f32 %v3801_v3, %v3802_v54 }
 0xc0a   :  { %v3783_v24 = vrot.slane %v3782_v17, 2  ;;  %v3789_v30 = vmax.f32 %v3787_v52, %v3788_v36 }
 0xc0b   :  { %v3798_v31 = vmax.f32 %v3796_v53, %v3797_v19  ;;  %v3804_v32 = vrot.slane %v3803_v23, 2  ;;  %v9809_v59 = vpop.f32.mrb[52].mxu0 }
 0xc0c   :  { %v3784_v34 = vmax.f32 %v3782_v17, %v3783_v24  ;;  %v3790_v28 = vrot.slane %v3789_v30, 2  ;;  %v3822_v56 = vsel %vm546_vm4, %v9809_v59, -inf  ;;  %v9813_v60 = vpop.f32.mrb[53].mxu0 }
 0xc0d   :  { %v3799_v9 = vrot.slane %v3798_v31, 1  ;;  %v3805_v27 = vmax.f32 %v3803_v23, %v3804_v32  ;;  %v3823_v38 = vrot.slane %v3822_v56, 4  ;;  %v3808_v46 = vsel %vm546_vm4, %v9813_v60, -inf  ;;  %v9817_v47 = vpop.f32.mrb[54].mxu0 }
 0xc0e   :  { %v3785_v6 = vrot.slane %v3784_v34, 1  ;;  %v3791_v8 = vmax.f32 %v3789_v30, %v3790_v28  ;;  %v3809_v0 = vrot.slane %v3808_v46, 4  ;;  %v3829_v35 = vsel %vm546_vm4, %v9817_v47, -inf  ;;  %v9821_v61 = vpop.f32.mrb[55].mxu0 }
 0xc0f   :  { %v3800_v42 = vmax.f32 %v3798_v31, %v3799_v9  ;;  %v3806_v55 = vrot.slane %v3805_v27, 1  ;;  %v3824_v33 = vmax.f32 %v3822_v56, %v3823_v38  ;;  %v3830_v43 = vrot.slane %v3829_v35, 4 }
 0xc10   :  { %v3786_v21 = vmax.f32 %v3784_v34, %v3785_v6  ;;  %v3792_v62 = vrot.slane %v3791_v8, 1  ;;  %v3810_v5 = vmax.f32 %v3808_v46, %v3809_v0  ;;  %v3815_v2 = vsel %vm546_vm4, %v9821_v61, -inf }
 0xc11   :  { %v3894_v15 = vsub.f32 %v8135_v18, %v3800_v42  ;;  %v3807_v29 = vmax.f32 %v3805_v27, %v3806_v55  ;;  %v3825_v48 = vrot.slane %v3824_v33, 2  ;;  %v3831_v58 = vmax.f32 %v3829_v35, %v3830_v43 }
 0xc12   :  { %v3892_v12 = vsub.f32 %v3717_v20, %v3786_v21  ;;  %v3793_v4 = vmax.f32 %v3791_v8, %v3792_v62  ;;  %v3811_v11 = vrot.slane %v3810_v5, 2  ;;  %v3816_v7 = vrot.slane %v3815_v2, 4 }
 0xc13   :  { %v3912_v10 = vmul.f32 1.442695, %v3894_v15  ;;  %v3895_v26 = vsub.f32 %v8136_v25, %v3807_v29  ;;  %v3826_v39 = vmax.f32 %v3824_v33, %v3825_v48  ;;  %v3832_v51 = vrot.slane %v3831_v58, 2  ;;  %v9825_v50 = vpop.f32.mrb[56].mxu0 }
 0xc14   :  { %v3908_v3 = vmul.f32 1.442695, %v3892_v12  ;;  %v3893_v53 = vsub.f32 %v3720_v63, %v3793_v4  ;;  %v3812_v54 = vmax.f32 %v3810_v5, %v3811_v11  ;;  %v3817_v52 = vmax.f32 %v3815_v2, %v3816_v7  ;;  %v9827_v17 = vpop.f32.mrb[57].mxu0 }
 0xc15   :  { %8549 = vpow2.f32 %v3912_v10  ;;  %v3914_v18 = vmul.f32 1.442695, %v3895_v26  ;;  %v3827_v36 = vrot.slane %v3826_v39, 1  ;;  %v3833_v19 = vmax.f32 %v3831_v58, %v3832_v51  ;;  %v9829_v20 = vpop.f32.mrb[58].mxu0 }
 0xc16   :  { %8551 = vpow2.f32 %v3908_v3  ;;  %v3910_v23 = vmul.f32 1.442695, %v3893_v53  ;;  %v3813_v24 = vrot.slane %v3812_v54, 1  ;;  %v3818_v25 = vrot.slane %v3817_v52, 2  ;;  %v9831_v30 = vpop.f32.mrb[59].mxu0 }
 0xc17   :  { %8553 = vpow2.f32 %v3914_v18  ;;  %v3828_v31 = vmax.f32 %v3826_v39, %v3827_v36  ;;  %v3834_v32 = vrot.slane %v3833_v19, 1  ;;  %v3850_v63 = vsel %vm546_vm4, %v9825_v50, -inf }
 0xc18   :  { %8555 = vpow2.f32 %v3910_v23  ;;  %v3814_v34 = vmax.f32 %v3812_v54, %v3813_v24  ;;  %v3819_v28 = vmax.f32 %v3817_v52, %v3818_v25  ;;  %v3851_v56 = vrot.slane %v3850_v63, 4 }
 0xc19   :  { %v3898_v9 = vsub.f32 %v9809_v59, %v3828_v31  ;;  %v3835_v27 = vmax.f32 %v3833_v19, %v3834_v32  ;;  %v3836_v38 = vsel %vm546_vm4, %v9827_v17, -inf  ;;  %v3857_v46 = vsel %vm546_vm4, %v9829_v20, -inf }
 0xc1a   :  { %v3896_v6 = vsub.f32 %v9813_v60, %v3814_v34  ;;  %v3820_v8 = vrot.slane %v3819_v28, 1  ;;  %v3852_v0 = vmax.f32 %v3850_v63, %v3851_v56  ;;  %v3837_v35 = vrot.slane %v3836_v38, 4 }
 0xc1b   :  { %v3920_v42 = vmul.f32 1.442695, %v3898_v9  ;;  %v3899_v55 = vsub.f32 %v9817_v47, %v3835_v27  ;;  %v3858_v33 = vrot.slane %v3857_v46, 4  ;;  %v3843_v43 = vsel %vm546_vm4, %v9831_v30, -inf  ;;  %v9844_v59 = vpop.f32.mrb[60].mxu0 }
 0xc1c   :  { %v3916_v21 = vmul.f32 1.442695, %v3896_v6  ;;  %v3821_v62 = vmax.f32 %v3819_v28, %v3820_v8  ;;  %v3853_v5 = vrot.slane %v3852_v0, 2  ;;  %v3838_v2 = vmax.f32 %v3836_v38, %v3837_v35  ;;  %v9846_v15 = vpop.f32.mrb[61].mxu0 }
 0xc1d   :  { %8557 = vpow2.f32 %v3920_v42  ;;  %v3922_v60 = vmul.f32 1.442695, %v3899_v55  ;;  %v3859_v29 = vmax.f32 %v3857_v46, %v3858_v33  ;;  %v3844_v48 = vrot.slane %v3843_v43, 4  ;;  %v9848_v58 = vpop.f32.mrb[62].mxu0 }
 0xc1e   :  { %8559 = vpow2.f32 %v3916_v21  ;;  %v3897_v47 = vsub.f32 %v9821_v61, %v3821_v62  ;;  %v3854_v12 = vmax.f32 %v3852_v0, %v3853_v5  ;;  %v3839_v4 = vrot.slane %v3838_v2, 2  ;;  %v9851_v11 = vpop.f32.mrb[63].mxu0 }
 0xc1f   :  { %v9853_v7 = vpop.eup %8549  ;;  %8561 = vpow2.f32 %v3922_v60  ;;  %v3860_v10 = vrot.slane %v3859_v29, 2  ;;  %v3845_v26 = vmax.f32 %v3843_v43, %v3844_v48  ;;  %v9857_v39 = vsel %vm546_vm4, %v9844_v59, -inf }
 0xc20   :  { %v9859_v51 = vpop.eup %8551  ;;  %v3954_v3 = vsel %vm546_vm4, %v9853_v7, 0.0  ;;  %v3918_v53 = vmul.f32 1.442695, %v3897_v47  ;;  %v3855_v61 = vrot.slane %v3854_v12, 1  ;;  %v3840_v54 = vmax.f32 %v3838_v2, %v3839_v4 }
 0xc21   :  { %v9863_v52 = vpop.eup %8553  ;;  %v3955_v18 = vrot.slane %v3954_v3, 4  ;;  %v3940_v36 = vsel %vm546_vm4, %v9859_v51, 0.0  ;;  %v3861_v19 = vmax.f32 %v3859_v29, %v3860_v10  ;;  %v3846_v23 = vrot.slane %v3845_v26, 2 }
 0xc22   :  { %v9867_v24 = vpop.eup %8555  ;;  %v3941_v25 = vrot.slane %v3940_v36, 4  ;;  %v3961_v31 = vsel %vm546_vm4, %v9863_v52, 0.0  ;;  %8563 = vpow2.f32 %v3918_v53  ;;  %v3856_v32 = vmax.f32 %v3854_v12, %v3855_v61 }
 0xc23   :  { %v3956_v63 = vadd.f32 %v3955_v18, %v3954_v3  ;;  %v3962_v34 = vrot.slane %v3961_v31, 4  ;;  %v3947_v28 = vsel %vm546_vm4, %v9867_v24, 0.0  ;;  %v3841_v56 = vrot.slane %v3840_v54, 1 }
 0xc24   :  { %v3942_v9 = vadd.f32 %v3941_v25, %v3940_v36  ;;  %v3948_v27 = vrot.slane %v3947_v28, 4  ;;  %v3902_v38 = vsub.f32 %v9825_v50, %v3856_v32  ;;  %v3862_v46 = vrot.slane %v3861_v19, 1 }
 0xc25   :  { %v3957_v6 = vrot.slane %v3956_v63, 2  ;;  %v3963_v8 = vadd.f32 %v3962_v34, %v3961_v31  ;;  %v3842_v0 = vmax.f32 %v3840_v54, %v3841_v56  ;;  %v3847_v35 = vmax.f32 %v3845_v26, %v3846_v23 }
 0xc26   :  { %v3943_v42 = vrot.slane %v3942_v9, 2  ;;  %v3949_v55 = vadd.f32 %v3948_v27, %v3947_v28  ;;  %v3928_v33 = vmul.f32 1.442695, %v3902_v38  ;;  %v3863_v43 = vmax.f32 %v3861_v19, %v3862_v46 }
 0xc27   :  { %v9874_v21 = vpop.eup %8557  ;;  %v3958_v62 = vadd.f32 %v3957_v6, %v3956_v63  ;;  %v3964_v5 = vrot.slane %v3963_v8, 2  ;;  %v3900_v2 = vsub.f32 %v9827_v17, %v3842_v0  ;;  %v3848_v60 = vrot.slane %v3847_v35, 1 }
 0xc28   :  { %v9877_v29 = vpop.eup %8559  ;;  %v3944_v48 = vadd.f32 %v3943_v42, %v3942_v9  ;;  %v3950_v50 = vrot.slane %v3949_v55, 2  ;;  %v3982_v47 = vsel %vm546_vm4, %v9874_v21, 0.0  ;;  %8565 = vpow2.f32 %v3928_v33 }
 0xc29   :  { %v9881_v12 = vpop.eup %8561  ;;  %v3959_v4 = vrot.slane %v3958_v62, 1  ;;  %v3965_v10 = vadd.f32 %v3964_v5, %v3963_v8  ;;  %v3983_v26 = vrot.slane %v3982_v47, 4  ;;  %v3968_v3 = vsel %vm546_vm4, %v9877_v29, 0.0 }
 0xc2a   :  { %v3945_v53 = vrot.slane %v3944_v48, 1  ;;  %v3951_v61 = vadd.f32 %v3950_v50, %v3949_v55  ;;  %v3969_v17 = vrot.slane %v3968_v3, 4  ;;  %v3989_v54 = vsel %vm546_vm4, %v9881_v12, 0.0 }
 0xc2b   :  { %v3960_v18 = vadd.f32 %v3959_v4, %v3958_v62  ;;  %v3966_v36 = vrot.slane %v3965_v10, 1  ;;  %v3984_v19 = vadd.f32 %v3983_v26, %v3982_v47  ;;  %v3990_v23 = vrot.slane %v3989_v54, 4 }
 0xc2c   :  { %v9887_v25 = vpop.eup %8563  ;;  %v3946_v31 = vadd.f32 %v3945_v53, %v3944_v48  ;;  %v3952_v32 = vrot.slane %v3951_v61, 1  ;;  %v3970_v63 = vadd.f32 %v3969_v17, %v3968_v3  ;;  %v3924_v34 = vmul.f32 1.442695, %v3900_v2 }
 0xc2d   :  { %8567 = vrcp.f32 %v3960_v18  ;;  %v3967_v28 = vadd.f32 %v3966_v36, %v3965_v10  ;;  %v3985_v56 = vrot.slane %v3984_v19, 2  ;;  %v3991_v9 = vadd.f32 %v3990_v23, %v3989_v54 }
 0xc2e   :  { %8569 = vrcp.f32 %v3946_v31  ;;  %v3953_v27 = vadd.f32 %v3952_v32, %v3951_v61  ;;  %v3971_v38 = vrot.slane %v3970_v63, 2  ;;  %v3975_v46 = vsel %vm546_vm4, %v9887_v25, 0.0 }
 0xc2f   :  { %8571 = vrcp.f32 %v3967_v28  ;;  %v3986_v6 = vadd.f32 %v3985_v56, %v3984_v19  ;;  %v3992_v8 = vrot.slane %v3991_v9, 2  ;;  %v3976_v0 = vrot.slane %v3975_v46, 4 }
 0xc30   :  { %8573 = vrcp.f32 %v3953_v27  ;;  %v3972_v42 = vadd.f32 %v3971_v38, %v3970_v63  ;;  %v3903_v55 = vsub.f32 %v9829_v20, %v3863_v43  ;;  %v3849_v33 = vmax.f32 %v3847_v35, %v3848_v60 }
 0xc31   :  { %v3987_v62 = vrot.slane %v3986_v6, 1  ;;  %v3993_v5 = vadd.f32 %v3992_v8, %v3991_v9  ;;  %v3977_v2 = vadd.f32 %v3976_v0, %v3975_v46  ;;  %8575 = vpow2.f32 %v3924_v34 }
 0xc32   :  { %v9892_v48 = vpop.eup %8565  ;;  %v3973_v50 = vrot.slane %v3972_v42, 1  ;;  %v3930_v47 = vmul.f32 1.442695, %v3903_v55  ;;  %v3901_v4 = vsub.f32 %v9831_v30, %v3849_v33  ;;  %v3879_v10 = vrot.slane %v9857_v39, 4 }
 0xc33   :  { %v3988_v26 = vadd.f32 %v3987_v62, %v3986_v6  ;;  %v3994_v3 = vrot.slane %v3993_v5, 1  ;;  %v3978_v53 = vrot.slane %v3977_v2, 2  ;;  %v4010_v61 = vsel %vm546_vm4, %v9892_v48, 0.0 }
 0xc34   :  { %v3974_v20 = vadd.f32 %v3973_v50, %v3972_v42  ;;  %v4011_v35 = vrot.slane %v4010_v61, 4  ;;  %8577 = vpow2.f32 %v3930_v47  ;;  %v3926_v43 = vmul.f32 1.442695, %v3901_v4 }
 0xc35   :  { %8579 = vrcp.f32 %v3988_v26  ;;  %v3995_v60 = vadd.f32 %v3994_v3, %v3993_v5  ;;  %v3979_v17 = vadd.f32 %v3978_v53, %v3977_v2  ;;  %v3880_v54 = vmax.f32 %v9857_v39, %v3879_v10 }
 0xc36   :  { %8581 = vrcp.f32 %v3974_v20  ;;  %v4012_v18 = vadd.f32 %v4011_v35, %v4010_v61  ;;  %v3864_v30 = vsel %vm546_vm4, %v9846_v15, -inf  ;;  %v3885_v36 = vsel %vm546_vm4, %v9848_v58, -inf }
 0xc37   :  { %v8568_v19 = vpop.eup %8567  ;;  %8583 = vrcp.f32 %v3995_v60  ;;  %v3980_v23 = vrot.slane %v3979_v17, 1  ;;  %v3881_v31 = vrot.slane %v3880_v54, 2  ;;  %v3865_v32 = vrot.slane %v3864_v30, 4 }
 0xc38   :  { %v8570_v63 = vpop.eup %8569  ;;  %v4013_v34 = vrot.slane %v4012_v18, 2  ;;  %8585 = vpow2.f32 %v3926_v43  ;;  %v3886_v28 = vrot.slane %v3885_v36, 4  ;;  %v3871_v38 = vsel %vm546_vm4, %v9851_v11, -inf }
 0xc39   :  { %v8572_v56 = vpop.eup %8571  ;;  %v3981_v9 = vadd.f32 %v3980_v23, %v3979_v17  ;;  %v3882_v39 = vmax.f32 %v3880_v54, %v3881_v31  ;;  %v3866_v27 = vmax.f32 %v3864_v30, %v3865_v32  ;;  %v3872_v42 = vrot.slane %v3871_v38, 4 }
 0xc3a   :  { %v8574_v46 = vpop.eup %8573  ;;  %v4071_v6 = vmul.f32 %v8572_v56, %v9863_v52  ;;  %v4014_v8 = vadd.f32 %v4013_v34, %v4012_v18  ;;  %v3887_v0 = vmax.f32 %v3885_v36, %v3886_v28  ;;  %v4070_v33 = vmul.f32 %v8568_v19, %v9853_v7 }
 0xc3b   :  { %v9906_v55 = vpop.eup %8575  ;;  %8587 = vrcp.f32 %v3981_v9  ;;  %v3883_v62 = vrot.slane %v3882_v39, 1  ;;  %v3867_v5 = vrot.slane %v3866_v27, 2  ;;  %v3873_v47 = vmax.f32 %v3871_v38, %v3872_v42 }
 0xc3c   :  { %v3996_v2 = vsel %vm546_vm4, %v9906_v55, 0.0  ;;  %v3888_v50 = vrot.slane %v3887_v0, 2  ;;  %v4068_v4 = vmul.f32 %v8570_v63, %v9859_v51  ;;  %v4069_v3 = vmul.f32 %v8574_v46, %v9867_v24 }
 0xc3d   :  { %v3997_v10 = vrot.slane %v3996_v2, 4  ;;  %v3884_v26 = vmax.f32 %v3882_v39, %v3883_v62  ;;  %v3868_v52 = vmax.f32 %v3866_v27, %v3867_v5  ;;  %v4015_v61 = vrot.slane %v4014_v8, 1 }
 0xc3e   :  { %v9913_v53 = vpop.eup %8577  ;;  %v3889_v20 = vmax.f32 %v3887_v0, %v3888_v50  ;;  %v3874_v7 = vrot.slane %v3873_v47, 2  ;;  %v4085_v35 = vpack.c.bf16 %v4071_v6, %v4070_v33  ;;  %v4084_v63 = vpack.c.bf16 %v4069_v3, %v4068_v4 }
 0xc3f   :  { %v8580_v43 = vpop.eup %8579  ;;  %v3998_v60 = vadd.f32 %v3997_v10, %v3996_v2  ;;  %v4017_v17 = vsel %vm546_vm4, %v9913_v53, 0.0  ;;  %v3906_v54 = vsub.f32 %v9844_v59, %v3884_v26  ;;  %v3869_v18 = vrot.slane %v3868_v52, 1 }
 0xc40   :  { %v8582_v51 = vpop.eup %8581  ;;  %v4018_v30 = vrot.slane %v4017_v17, 4  ;;  %v3890_v36 = vrot.slane %v3889_v20, 1  ;;  %v3875_v19 = vmax.f32 %v3873_v47, %v3874_v7  ;;  %v4016_v28 = vadd.f32 %v4015_v61, %v4014_v8  ;;  %8151 = vmatprep.mubr.msk.bf16.mxu1 %vm546_vm4, %v4084_v63 }
 0xc41   :  { %v8584_v23 = vpop.eup %8583  ;;  %v3999_v24 = vrot.slane %v3998_v60, 2  ;;  %v3936_v31 = vmul.f32 1.442695, %v3906_v54  ;;  %v3870_v32 = vmax.f32 %v3868_v52, %v3869_v18  ;;  %8152 = vmatmul.mubr.msk.bf16.vlgmr.msra.gmra.mrb[64].mxu1 %vm546_vm4, %v4085_v35  ;;  %v4074_v5 = vmul.f32 %v8580_v43, %v9874_v21 }
 0xc42   :  { %v9918_v34 = vpop.eup %8585  ;;  %v4019_v56 = vadd.f32 %v4018_v30, %v4017_v17  ;;  %v3891_v9 = vmax.f32 %v3889_v20, %v3890_v36  ;;  %v3876_v39 = vrot.slane %v3875_v19, 1  ;;  %v4075_v2 = vmul.f32 %v8584_v23, %v9881_v12 }
 0xc43   :  { %v4000_v27 = vadd.f32 %v3999_v24, %v3998_v60  ;;  %v4003_v59 = vsel %vm546_vm4, %v9918_v34, 0.0  ;;  %8589 = vpow2.f32 %v3936_v31  ;;  %v3904_v38 = vsub.f32 %v9846_v15, %v3870_v32 }
 0xc44   :  { %v4020_v46 = vrot.slane %v4019_v56, 2  ;;  %v4004_v6 = vrot.slane %v4003_v59, 4  ;;  %v3907_v0 = vsub.f32 %v9848_v58, %v3891_v9  ;;  %v3877_v42 = vmax.f32 %v3875_v19, %v3876_v39 }
 0xc45   :  { %v8588_v8 = vpop.eup %8587  ;;  %v4001_v33 = vrot.slane %v4000_v27, 1  ;;  %v3932_v62 = vmul.f32 1.442695, %v3904_v38  ;;  %v4072_v10 = vmul.f32 %v8582_v51, %v9877_v29  ;;  %v4087_v26 = vpack.c.bf16 %v4075_v2, %v4074_v5 }
 0xc46   :  { %v4021_v50 = vadd.f32 %v4020_v46, %v4019_v56  ;;  %v4005_v47 = vadd.f32 %v4004_v6, %v4003_v59  ;;  %v3938_v4 = vmul.f32 1.442695, %v3907_v0  ;;  %v3905_v15 = vsub.f32 %v9851_v11, %v3877_v42 }
 0xc47   :  { %8591 = vpow2.f32 %v3932_v62  ;;  %v4073_v58 = vmul.f32 %v8588_v8, %v9887_v25  ;;  %v4002_v21 = vadd.f32 %v4001_v33, %v4000_v27 }
 0xc48   :  { %v4022_v52 = vrot.slane %v4021_v50, 1  ;;  %v4006_v3 = vrot.slane %v4005_v47, 2  ;;  %8593 = vpow2.f32 %v3938_v4  ;;  %v3934_v61 = vmul.f32 1.442695, %v3905_v15 }
 0xc49   :  { %8595 = vrcp.f32 %v4016_v28  ;;  %v4086_v20 = vpack.c.bf16 %v4073_v58, %v4072_v10 }
 0xc4a   :  { %v4023_v7 = vadd.f32 %v4022_v52, %v4021_v50  ;;  %v4007_v12 = vadd.f32 %v4006_v3, %v4005_v47  ;;  %8597 = vpow2.f32 %v3934_v61 }
 0xc4b   :  { %8155 = vmatprep.mubr.msk.bf16.mxu1 %vm546_vm4, %v4086_v20 }
 0xc4c   :  { %8599 = vrcp.f32 %v4023_v7  ;;  %v4008_v11 = vrot.slane %v4007_v12, 1  ;;  %8156 = vmatmul.mubr.msk.bf16.gmra.mrb[68].mxu1 %vm546_vm4, %v4087_v26 }
 0xc4d   :  { %v8590_v29 = vpop.eup %8589  ;;  %8601 = vrcp.f32 %v4002_v21 }
 0xc4e   :  { %v4009_v25 = vadd.f32 %v4008_v11, %v4007_v12  ;;  %v4038_v35 = vsel %vm546_vm4, %v8590_v29, 0.0 }
 0xc4f   :  { %v4039_v43 = vrot.slane %v4038_v35, 4 }
 0xc50   :  { %8603 = vrcp.f32 %v4009_v25 }
 0xc51   :  { %v8592_v60 = vpop.eup %8591  ;;  %v4040_v17 = vadd.f32 %v4039_v43, %v4038_v35  ;;  %v8325_v35 = vld [vmem:[%s10722_s2 + $0x10] sm:$0xff]   ;;  %v4214_v43 = vpop.permute.xlu1 %4213 }
 0xc52   :  { %v8594_v54 = vpop.eup %8593  ;;  %v4024_v18 = vsel %vm546_vm4, %v8592_v60, 0.0  ;;  %8168 = vmatpush3.bf16.msra.mxu0 %v8325_v35 }
 0xc53   :  { %v8596_v51 = vpop.eup %8595  ;;  %v4041_v30 = vrot.slane %v4040_v17, 2  ;;  %v4025_v36 = vrot.slane %v4024_v18, 4  ;;  %v4045_v19 = vsel %vm546_vm4, %v8594_v54, 0.0  ;;  %8169 = vmatprep.subr.bf16.mxu0 %v8648_v1 }
 0xc54   :  { %v8598_v23 = vpop.eup %8597  ;;  %v4046_v24 = vrot.slane %v4045_v19, 4  ;;  %v4078_v59 = vmul.f32 %v8596_v51, %v9892_v48 }
 0xc55   :  { %v4042_v31 = vadd.f32 %v4041_v30, %v4040_v17  ;;  %v4026_v32 = vadd.f32 %v4025_v36, %v4024_v18  ;;  %v4031_v63 = vsel %vm546_vm4, %v8598_v23, 0.0 }
 0xc56   :  { %v8600_v28 = vpop.eup %8599  ;;  %v4047_v56 = vadd.f32 %v4046_v24, %v4045_v19  ;;  %v4032_v9 = vrot.slane %v4031_v63, 4 }
 0xc57   :  { %v4043_v39 = vrot.slane %v4042_v31, 1  ;;  %v4027_v27 = vrot.slane %v4026_v32, 2  ;;  %v4079_v38 = vmul.f32 %v8600_v28, %v9913_v53  ;;  %v8602_v46 = vpop.eup %8601 }
 0xc58   :  { %v4048_v6 = vrot.slane %v4047_v56, 2  ;;  %v4033_v0 = vadd.f32 %v4032_v9, %v4031_v63  ;;  %v4076_v47 = vmul.f32 %v8602_v46, %v9906_v55 }
 0xc59   :  { %v4028_v42 = vadd.f32 %v4027_v27, %v4026_v32  ;;  %v4089_v8 = vpack.c.bf16 %v4079_v38, %v4078_v59  ;;  %v4044_v62 = vadd.f32 %v4043_v39, %v4042_v31 }
 0xc5a   :  { %v8604_v33 = vpop.eup %8603  ;;  %v4049_v5 = vadd.f32 %v4048_v6, %v4047_v56  ;;  %v4034_v2 = vrot.slane %v4033_v0, 2 }
 0xc5b   :  { %v4029_v50 = vrot.slane %v4028_v42, 1  ;;  %v4077_v4 = vmul.f32 %v8604_v33, %v9918_v34  ;;  %8605 = vrcp.f32 %v4044_v62 }
 0xc5c   :  { %v4050_v15 = vrot.slane %v4049_v5, 1  ;;  %v4035_v10 = vadd.f32 %v4034_v2, %v4033_v0 }
 0xc5d   :  { %v4030_v58 = vadd.f32 %v4029_v50, %v4028_v42  ;;  %v4088_v48 = vpack.c.bf16 %v4077_v4, %v4076_v47 }
 0xc5e   :  { %v4051_v53 = vadd.f32 %v4050_v15, %v4049_v5  ;;  %v4036_v26 = vrot.slane %v4035_v10, 1 }
 0xc5f   :  { %8607 = vrcp.f32 %v4030_v58  ;;  %8159 = vmatprep.mubr.msk.bf16.mxu1 %vm546_vm4, %v4088_v48 }
 0xc60   :  { %8609 = vrcp.f32 %v4051_v53  ;;  %v4037_v52 = vadd.f32 %v4036_v26, %v4035_v10  ;;  %8160 = vmatmul.mubr.msk.bf16.gmra.mrb[72].mxu1 %vm546_vm4, %v4089_v8 }
 0xc62   :  { %8611 = vrcp.f32 %v4037_v52 }
 0xc65   :  { %v8606_v3 = vpop.eup %8605 }
 0xc66   :  { %v4082_v20 = vmul.f32 %v8606_v3, %v8590_v29  ;;  %v8326_v29 = vld [vmem:[%s10722_s2 + $0x18] sm:$0xff]  }
 0xc67   :  { %8170 = vmatpush3.bf16.msra.mxu0 %v8326_v29 }
 0xc69   :  { %v8608_v61 = vpop.eup %8607 }
 0xc6a   :  { %v8610_v55 = vpop.eup %8609  ;;  %v4080_v7 = vmul.f32 %v8608_v61, %v8592_v60 }
 0xc6b   :  { %v4083_v34 = vmul.f32 %v8610_v55, %v8594_v54 }
 0xc6c   :  { %v8612_v21 = vpop.eup %8611 }
 0xc6d   :  { %v4081_v12 = vmul.f32 %v8612_v21, %v8598_v23  ;;  %v4091_v11 = vpack.c.bf16 %v4083_v34, %v4082_v20 }
 0xc6f   :  { %v4090_v25 = vpack.c.bf16 %v4081_v12, %v4080_v7 }
 0xc71   :  { %8163 = vmatprep.mubr.msk.bf16.mxu1 %vm546_vm4, %v4090_v25 }
 0xc72   :  { %8164 = vmatmul.mubr.msk.bf16.gmra.mrb[76].mxu1 %vm546_vm4, %v4091_v11 }
 0xc73   :  { %4841 = vmatprep.mubr.bf16.mxu1 %v8653_v49 }
 0xd14   :  { %v8153_v60 = vpop.f32.mrb[64].mxu1 }
 0xd15   :  { %v4221_v17 = vmul.f32 %v8153_v60, %v4214_v43  ;;  %v4150_v54 = vpop.f32.mrb[65].mxu1 }
 0xd16   :  { %v4219_v18 = vmul.f32 %v4214_v43, %v4150_v54  ;;  %v8154_v51 = vpop.f32.mrb[66].mxu1 }
 0xd17   :  { %v4249_v30 = vsel %vm158_vm2, %v4221_v17, 0.0  ;;  %v4222_v36 = vmul.f32 %v8154_v51, %v4214_v43  ;;  %v4153_v19 = vpop.f32.mrb[67].mxu1 }
 0xd18   :  { %v4250_v23 = vrot.slane %v4249_v30, 4  ;;  %v4235_v24 = vsel %vm158_vm2, %v4219_v18, 0.0  ;;  %v4220_v31 = vmul.f32 %v4214_v43, %v4153_v19 }
 0xd19   :  { %v4236_v1 = vrot.slane %v4235_v24, 4  ;;  %v4256_v32 = vsel %vm158_vm2, %v4222_v36, 0.0 }
 0xd1a   :  { %v4251_v63 = vadd.f32 %v4250_v23, %v4249_v30  ;;  %v4257_v28 = vrot.slane %v4256_v32, 4  ;;  %v4242_v56 = vsel %vm158_vm2, %v4220_v31, 0.0 }
 0xd1b   :  { %v4237_v9 = vadd.f32 %v4236_v1, %v4235_v24  ;;  %v4243_v39 = vrot.slane %v4242_v56, 4 }
 0xd1c   :  { %v4252_v27 = vrot.slane %v4251_v63, 2  ;;  %v4258_v59 = vadd.f32 %v4257_v28, %v4256_v32 }
 0xd1d   :  { %v4238_v46 = vrot.slane %v4237_v9, 2  ;;  %v4244_v6 = vadd.f32 %v4243_v39, %v4242_v56 }
 0xd1e   :  { %v4253_v8 = vadd.f32 %v4252_v27, %v4251_v63  ;;  %v4259_v33 = vrot.slane %v4258_v59, 2 }
 0xd1f   :  { %v8157_v38 = vpop.f32.mrb[68].mxu1  ;;  %v4239_v2 = vadd.f32 %v4238_v46, %v4237_v9  ;;  %v4245_v50 = vrot.slane %v4244_v6, 2 }
 0xd20   :  { %v4225_v0 = vmul.f32 %v8157_v38, %v4214_v43  ;;  %v4166_v42 = vpop.f32.mrb[69].mxu1  ;;  %v4254_v10 = vrot.slane %v4253_v8, 1  ;;  %v4260_v58 = vadd.f32 %v4259_v33, %v4258_v59 }
 0xd21   :  { %v4223_v62 = vmul.f32 %v4214_v43, %v4166_v42  ;;  %v8158_v5 = vpop.f32.mrb[70].mxu1  ;;  %v4240_v26 = vrot.slane %v4239_v2, 1  ;;  %v4246_v52 = vadd.f32 %v4245_v50, %v4244_v6 }
 0xd22   :  { %v4277_v47 = vsel %vm158_vm2, %v4225_v0, 0.0  ;;  %v4226_v4 = vmul.f32 %v8158_v5, %v4214_v43  ;;  %v4169_v15 = vpop.f32.mrb[71].mxu1  ;;  %v4255_v55 = vadd.f32 %v4254_v10, %v4253_v8  ;;  %v4261_v20 = vrot.slane %v4260_v58, 1 }
 0xd23   :  { %v4278_v48 = vrot.slane %v4277_v47, 4  ;;  %v4263_v53 = vsel %vm158_vm2, %v4223_v62, 0.0  ;;  %v4241_v7 = vadd.f32 %v4240_v26, %v4239_v2  ;;  %v4247_v12 = vrot.slane %v4246_v52, 1 }
 0xd24   :  { %v4264_v3 = vrot.slane %v4263_v53, 4  ;;  %v4284_v61 = vsel %vm158_vm2, %v4226_v4, 0.0  ;;  %v4224_v25 = vmul.f32 %v4214_v43, %v4169_v15  ;;  %v4262_v35 = vadd.f32 %v4261_v20, %v4260_v58 }
 0xd25   :  { %v4279_v34 = vadd.f32 %v4278_v48, %v4277_v47  ;;  %v4285_v21 = vrot.slane %v4284_v61, 4  ;;  %v4352_v17 = vpack.c.bf16 %v4241_v7, %v4241_v7  ;;  %v4248_v54 = vadd.f32 %v4247_v12, %v4246_v52  ;;  %v9964_v47 = vpop.permute.xlu1 %4215 }
 0xd26   :  { %v4265_v11 = vadd.f32 %v4264_v3, %v4263_v53  ;;  %v4270_v51 = vsel %vm158_vm2, %v4224_v25, 0.0  ;;  %v4354_v30 = vpack.c.bf16 %v4255_v55, %v4255_v55  ;;  %v4355_v36 = vpack.c.bf16 %v4262_v35, %v4262_v35 }
 0xd27   :  { %v4280_v29 = vrot.slane %v4279_v34, 2  ;;  %v4286_v60 = vadd.f32 %v4285_v21, %v4284_v61  ;;  %v4353_v24 = vpack.c.bf16 %v4248_v54, %v4248_v54  ;;  %v4271_v1 = vrot.slane %v4270_v51, 4 }
 0xd28   :  { %v4266_v18 = vrot.slane %v4265_v11, 2  ;;  %v4392_v63 = vunpack.c.l.b16 %v4352_v17  ;;  %v4394_v9 = vunpack.c.l.b16 %v4354_v30  ;;  %v4395_v39 = vunpack.c.l.b16 %v4355_v36 }
 0xd29   :  { %v4281_v19 = vadd.f32 %v4280_v29, %v4279_v34  ;;  %v4287_v23 = vrot.slane %v4286_v60, 2  ;;  %v4393_v28 = vunpack.c.l.b16 %v4353_v24  ;;  %v4272_v43 = vadd.f32 %v4271_v1, %v4270_v51 }
 0xd2a   :  { %v4267_v31 = vadd.f32 %v4266_v18, %v4265_v11 }
 0xd2b   :  { %v4288_v32 = vadd.f32 %v4287_v23, %v4286_v60  ;;  %v4282_v27 = vrot.slane %v4281_v19, 1  ;;  %v4408_v59 = vsel %vm1177_vm5, %v4393_v28, %v4392_v63  ;;  %v4273_v6 = vrot.slane %v4272_v43, 2 }
 0xd2c   :  { %v4268_v56 = vrot.slane %v4267_v31, 1  ;;  %v4409_v0 = vsel %vm1179_vm6, %v4394_v9, %v4408_v59 }
 0xd2d   :  { %v4289_v46 = vrot.slane %v4288_v32, 1  ;;  %v4410_v8 = vsel %vm1181_vm7, %v4395_v39, %v4409_v0  ;;  %v4274_v33 = vadd.f32 %v4273_v6, %v4272_v43  ;;  %v4283_v62 = vadd.f32 %v4282_v27, %v4281_v19 }
 0xd2e   :  { %v4269_v38 = vadd.f32 %v4268_v56, %v4267_v31 }
 0xd2f   :  { %v4290_v2 = vadd.f32 %v4289_v46, %v4288_v32  ;;  %v4275_v50 = vrot.slane %v4274_v33, 1  ;;  %v4358_v53 = vpack.c.bf16 %v4283_v62, %v4283_v62 }
 0xd30   :  { %v4356_v42 = vpack.c.bf16 %v4269_v38, %v4269_v38 }
 0xd31   :  { %v4276_v10 = vadd.f32 %v4275_v50, %v4274_v33  ;;  %v4359_v3 = vpack.c.bf16 %v4290_v2, %v4290_v2  ;;  %v4398_v29 = vunpack.c.l.b16 %v4358_v53 }
 0xd32   :  { %v4396_v5 = vunpack.c.l.b16 %v4356_v42 }
 0xd33   :  { %v8161_v4 = vpop.f32.mrb[72].mxu1  ;;  %v4357_v61 = vpack.c.bf16 %v4276_v10, %v4276_v10  ;;  %v4399_v18 = vunpack.c.l.b16 %v4359_v3 }
 0xd34   :  { %v4411_v15 = vsel %vm1183_vm8, %v4396_v5, %v4410_v8  ;;  %v4229_v58 = vmul.f32 %v8161_v4, %v9964_v47  ;;  %v4182_v48 = vpop.f32.mrb[73].mxu1 }
 0xd35   :  { %v4227_v26 = vmul.f32 %v9964_v47, %v4182_v48  ;;  %v8162_v52 = vpop.f32.mrb[74].mxu1  ;;  %v4397_v11 = vunpack.c.l.b16 %v4357_v61 }
 0xd36   :  { %v4305_v55 = vsel %vm158_vm2, %v4229_v58, 0.0  ;;  %v4230_v20 = vmul.f32 %v8162_v52, %v9964_v47  ;;  %v4185_v34 = vpop.f32.mrb[75].mxu1 }
 0xd37   :  { %v4306_v21 = vrot.slane %v4305_v55, 4  ;;  %v4291_v7 = vsel %vm158_vm2, %v4227_v26, 0.0  ;;  %v4228_v12 = vmul.f32 %v9964_v47, %v4185_v34  ;;  %v4412_v51 = vsel %vm1185_vm9, %v4397_v11, %v4411_v15 }
 0xd38   :  { %v4292_v25 = vrot.slane %v4291_v7, 4  ;;  %v4312_v35 = vsel %vm158_vm2, %v4230_v20, 0.0  ;;  %v4413_v19 = vsel %vm1187_vm10, %v4398_v29, %v4412_v51 }
 0xd39   :  { %v4307_v60 = vadd.f32 %v4306_v21, %v4305_v55  ;;  %v4313_v17 = vrot.slane %v4312_v35, 4  ;;  %v4298_v54 = vsel %vm158_vm2, %v4228_v12, 0.0  ;;  %v9978_v31 = vsel %vm1189_vm11, %v4399_v18, %v4413_v19 }
 0xd3a   :  { %v4293_v30 = vadd.f32 %v4292_v25, %v4291_v7  ;;  %v4299_v36 = vrot.slane %v4298_v54, 4 }
 0xd3b   :  { %v4308_v23 = vrot.slane %v4307_v60, 2  ;;  %v4314_v24 = vadd.f32 %v4313_v17, %v4312_v35 }
 0xd3c   :  { %v4294_v1 = vrot.slane %v4293_v30, 2  ;;  %v4300_v32 = vadd.f32 %v4299_v36, %v4298_v54 }
 0xd3d   :  { %v4309_v63 = vadd.f32 %v4308_v23, %v4307_v60  ;;  %v4315_v28 = vrot.slane %v4314_v24, 2 }
 0xd3e   :  { %v4295_v56 = vadd.f32 %v4294_v1, %v4293_v30  ;;  %v4301_v43 = vrot.slane %v4300_v32, 2 }
 0xd3f   :  { %v4310_v9 = vrot.slane %v4309_v63, 1  ;;  %v4316_v39 = vadd.f32 %v4315_v28, %v4314_v24 }
 0xd40   :  { %v4296_v27 = vrot.slane %v4295_v56, 1  ;;  %v4302_v59 = vadd.f32 %v4301_v43, %v4300_v32 }
 0xd41   :  { %v4311_v38 = vadd.f32 %v4310_v9, %v4309_v63  ;;  %v4317_v46 = vrot.slane %v4316_v39, 1 }
 0xd42   :  { %v4297_v6 = vadd.f32 %v4296_v27, %v4295_v56  ;;  %v4303_v0 = vrot.slane %v4302_v59, 1 }
 0xd43   :  { %v4318_v42 = vadd.f32 %v4317_v46, %v4316_v39  ;;  %v4362_v62 = vpack.c.bf16 %v4311_v38, %v4311_v38 }
 0xd44   :  { %v4360_v8 = vpack.c.bf16 %v4297_v6, %v4297_v6  ;;  %v4304_v33 = vadd.f32 %v4303_v0, %v4302_v59 }
 0xd45   :  { %v8165_v5 = vpop.f32.mrb[76].mxu1  ;;  %v4363_v2 = vpack.c.bf16 %v4318_v42, %v4318_v42  ;;  %v4402_v61 = vunpack.c.l.b16 %v4362_v62 }
 0xd46   :  { %v4361_v50 = vpack.c.bf16 %v4304_v33, %v4304_v33  ;;  %v4233_v4 = vmul.f32 %v8165_v5, %v9964_v47  ;;  %v4198_v15 = vpop.f32.mrb[77].mxu1  ;;  %v4400_v48 = vunpack.c.l.b16 %v4360_v8 }
 0xd47   :  { %v4231_v10 = vmul.f32 %v9964_v47, %v4198_v15  ;;  %v8166_v58 = vpop.f32.mrb[78].mxu1  ;;  %v4403_v21 = vunpack.c.l.b16 %v4363_v2 }
 0xd48   :  { %v4401_v53 = vunpack.c.l.b16 %v4361_v50  ;;  %v4333_v26 = vsel %vm158_vm2, %v4233_v4, 0.0  ;;  %v4234_v52 = vmul.f32 %v8166_v58, %v9964_v47  ;;  %v4201_v3 = vpop.f32.mrb[79].mxu1  ;;  %v7141_v58 = vld [vmem:[%s10691_s6 + $0x1] ss:$0 sm:$0xff] }
 0xd49   :  { %v4334_v55 = vrot.slane %v4333_v26, 4  ;;  %v4319_v20 = vsel %vm158_vm2, %v4231_v10, 0.0  ;;  %v4232_v34 = vmul.f32 %v9964_v47, %v4201_v3 }
 0xd4a   :  { %v4415_v7 = vsel %vm1177_vm5, %v4401_v53, %v4400_v48  ;;  %v4320_v12 = vrot.slane %v4319_v20, 4  ;;  %v4340_v11 = vsel %vm158_vm2, %v4234_v52, 0.0 }
 0xd4b   :  { %v4416_v25 = vsel %vm1179_vm6, %v4402_v61, %v4415_v7  ;;  %v4335_v35 = vadd.f32 %v4334_v55, %v4333_v26  ;;  %v4341_v29 = vrot.slane %v4340_v11, 4  ;;  %v4326_v60 = vsel %vm158_vm2, %v4232_v34, 0.0  ;;  %v7157_v7 = vld [vmem:[%s10694_s9 + $0x140] sm:$0xff] }
 0xd4c   :  { %v4321_v17 = vadd.f32 %v4320_v12, %v4319_v20  ;;  %v4417_v54 = vsel %vm1181_vm7, %v4403_v21, %v4416_v25  ;;  %v4327_v18 = vrot.slane %v4326_v60, 4  ;;  %v7149_v21 = vld [vmem:[%s10694_s9 + $0x100] sm:$0xff] }
 0xd4d   :  { %v4336_v51 = vrot.slane %v4335_v35, 2  ;;  %v4342_v30 = vadd.f32 %v4341_v29, %v4340_v11  ;;  %v7183_v12 = vcombine.low %v7149_v21, %v7157_v7  ;;  %v7184_v11 = vcombine.high %v7149_v21, %v7157_v7 }
 0xd4e   :  { %v4322_v36 = vrot.slane %v4321_v17, 2  ;;  %v4328_v47 = vadd.f32 %v4327_v18, %v4326_v60 }
 0xd4f   :  { %v4337_v19 = vadd.f32 %v4336_v51, %v4335_v35  ;;  %v4343_v23 = vrot.slane %v4342_v30, 2  ;;  %4809 = vmatprep.subr.bf16.mxu1 %v7184_v11  ;;  %v7161_v11 = vld [vmem:[%s10694_s9 + $0x160] sm:$0xff] }
 0xd50   :  { %v4323_v24 = vadd.f32 %v4322_v36, %v4321_v17  ;;  %v4329_v1 = vrot.slane %v4328_v47, 2  ;;  %4810 = vmatpush1.bf16.msra.mxu1 %v7183_v12  ;;  %v7158_v36 = vld [vmem:[%s10694_s9 + $0x148] sm:$0xff]  ;;  %v7153_v12 = vld [vmem:[%s10694_s9 + $0x120] sm:$0xff] }
 0xd51   :  { %v4338_v32 = vrot.slane %v4337_v19, 1  ;;  %v4344_v63 = vadd.f32 %v4343_v23, %v4342_v30  ;;  %v7150_v30 = vld [vmem:[%s10694_s9 + $0x108] sm:$0xff]  ;;  %v7165_v23 = vld [vmem:[%s10694_s9 + $0x180] sm:$0xff] }
 0xd52   :  { %v4324_v28 = vrot.slane %v4323_v24, 1  ;;  %v4330_v56 = vadd.f32 %v4329_v1, %v4328_v47  ;;  %v7186_v47 = vcombine.high %v7150_v30, %v7158_v36  ;;  %v7166_v1 = vld [vmem:[%s10694_s9 + $0x188] sm:$0xff] }
 0xd53   :  { %v4339_v43 = vadd.f32 %v4338_v32, %v4337_v19  ;;  %v4345_v9 = vrot.slane %v4344_v63, 1  ;;  %v7185_v19 = vcombine.low %v7150_v30, %v7158_v36  ;;  %v7191_v30 = vcombine.low %v7153_v12, %v7161_v11 }
 0xd54   :  { %v4325_v39 = vadd.f32 %v4324_v28, %v4323_v24  ;;  %v4331_v27 = vrot.slane %v4330_v56, 1  ;;  %4852 = vmatprep.subr.bf16.mxu0 %v7186_v47  ;;  %v7173_v24 = vld [vmem:[%s10694_s9 + $0x1c0] sm:$0xff] }
 0xd55   :  { %v4346_v59 = vadd.f32 %v4345_v9, %v4344_v63  ;;  %v4366_v6 = vpack.c.bf16 %v4339_v43, %v4339_v43  ;;  %v7200_v32 = vcombine.high %v7165_v23, %v7173_v24  ;;  %v7174_v63 = vld [vmem:[%s10694_s9 + $0x1c8] sm:$0xff]  ;;  %v7199_v28 = vcombine.low %v7165_v23, %v7173_v24  ;;  %v7151_v9 = vld [vmem:[%s10694_s9 + $0x110] sm:$0xff] }
 0xd56   :  { %v4364_v38 = vpack.c.bf16 %v4325_v39, %v4325_v39  ;;  %v4332_v46 = vadd.f32 %v4331_v27, %v4330_v56  ;;  %v7201_v56 = vcombine.low %v7166_v1, %v7174_v63  ;;  %v7202_v43 = vcombine.high %v7166_v1, %v7174_v63  ;;  %v7159_v39 = vld [vmem:[%s10694_s9 + $0x150] sm:$0xff]  ;;  %v7152_v27 = vld [vmem:[%s10694_s9 + $0x118] sm:$0xff] }
 0xd57   :  { %v4367_v42 = vpack.c.bf16 %v4346_v59, %v4346_v59  ;;  %v4406_v5 = vunpack.c.l.b16 %v4366_v6  ;;  %4811 = vmatprep.subr.bf16.mxu1 %v7200_v32  ;;  %v7188_v59 = vcombine.high %v7151_v9, %v7159_v39  ;;  %v7155_v23 = vld [vmem:[%s10694_s9 + $0x130] sm:$0xff]  ;;  %v7156_v1 = vld [vmem:[%s10694_s9 + $0x138] sm:$0xff] }
 0xd58   :  { %v4404_v0 = vunpack.c.l.b16 %v4364_v38  ;;  %v4365_v8 = vpack.c.bf16 %v4332_v46, %v4332_v46  ;;  %4812 = vmatpush1.bf16.msra.mxu1 %v7199_v28  ;;  %v7160_v38 = vld [vmem:[%s10694_s9 + $0x158] sm:$0xff]  ;;  %v7187_v46 = vcombine.low %v7151_v9, %v7159_v39  ;;  %v7163_v24 = vld [vmem:[%s10694_s9 + $0x170] sm:$0xff] }
 0xd59   :  { %v4407_v2 = vunpack.c.l.b16 %v4367_v42  ;;  %v7189_v6 = vcombine.low %v7152_v27, %v7160_v38  ;;  %4895 = vmatprep.subr.bf16.mxu1 %v7188_v59  ;;  %v7164_v32 = vld [vmem:[%s10694_s9 + $0x178] sm:$0xff]  ;;  %v7171_v9 = vld [vmem:[%s10694_s9 + $0x1b0] sm:$0xff] }
 0xd5a   :  { %v4418_v33 = vsel %vm1183_vm8, %v4404_v0, %v4417_v54  ;;  %v4405_v62 = vunpack.c.l.b16 %v4365_v8  ;;  %v7190_v0 = vcombine.high %v7152_v27, %v7160_v38  ;;  %v7179_v39 = vld [vmem:[%s10694_s9 + $0x1f0] sm:$0xff]  ;;  %v7172_v27 = vld [vmem:[%s10694_s9 + $0x1b8] sm:$0xff]  ;;  %v7195_v38 = vcombine.low %v7155_v23, %v7163_v24 }
 0xd5b   :  { %v7180_v59 = vld [vmem:[%s10694_s9 + $0x1f8] sm:$0xff] }
 0xd5c   :  { %v4419_v50 = vsel %vm1185_vm9, %v4405_v62, %v4418_v33 }
 0xd5d   :  { %v4420_v4 = vsel %vm1187_vm10, %v4406_v5, %v4419_v50 }
 0xd5e   :  { %v4421_v15 = vsel %vm1189_vm11, %v4407_v2, %v4420_v4 }
 0xd5f   :  { %v4422_v10 = vpack.c.b16 %v4421_v15, %v9978_v31  ;;  %v7147_v15 = vld [vmem:[%s10692_s7 + $0x1] ss:$0 sm:$0xff] }
 0xd61   :  { %8172 = vmatmul.mubr.msk.bf16.vlgmr.msra.gmra.mrb[64].mxu0 %vm158_vm2, %v4422_v10 }
 0xd62   :  { %4884 = vmatprep.mubr.bf16.mxu0 %v8653_v49  ;;  %4853 = vmatpush1.bf16.msra.mxu0 %v7185_v19 }
 0xd63   :  { %4854 = vmatprep.subr.bf16.mxu0 %v7202_v43  ;;  %v7198_v43 = vcombine.high %v7156_v1, %v7164_v32 }
 0xd66   :  { %4855 = vmatpush1.bf16.msra.mxu0 %v7201_v56  ;;  %v7196_v56 = vcombine.high %v7155_v23, %v7163_v24 }
 0xd67   :  { %4938 = vmatprep.subr.bf16.mxu0 %v7190_v0  ;;  %v7214_v0 = vcombine.high %v7172_v27, %v7180_v59 }
 0xe34   :  { %v4472_v48 = vpop.f32.mrb[64].mxu0 }
 0xe35   :  { %v4473_v53 = vadd.f32 %v7141_v58, %v4472_v48  ;;  %v8173_v26 = vpop.f32.mrb[65].mxu0 }
 0xe36   :  { %v4475_v52 = vpop.f32.mrb[66].mxu0 }
 0xe37   :  { %v4476_v3 = vadd.f32 %v7141_v58, %v4475_v52  ;;  %v8174_v61 = vpop.f32.mrb[67].mxu0  ;;  %v4479_v55 = vadd.f32 %v4473_v53, %v9752_v57  ;;  %v7148_v53 = vld [vmem:[%s10693_s8 + $0x1] ss:$0 sm:$0xff]  ;;  %v7167_v52 = vld [vmem:[%s10694_s9 + $0x190] sm:$0xff] }
 0xe38   :  { %v7168_v61 = vld [vmem:[%s10694_s9 + $0x198] sm:$0xff] }
 0xe39   :  { %v4485_v20 = vsel %vm158_vm2, %v4479_v55, 0.0  ;;  %v4480_v31 = vadd.f32 %v4476_v3, %v9754_v14  ;;  %v7175_v3 = vld [vmem:[%s10694_s9 + $0x1d0] sm:$0xff] }
 0xe3a   :  { %4486 = vadd.xlane.f32.xlu0 %v4485_v20  ;;  %v7204_v21 = vcombine.high %v7167_v52, %v7175_v3 }
 0xe3b   :  { %v4488_v34 = vsel %vm158_vm2, %v4480_v31, 0.0 }
 0xe3c   :  { %4489 = vadd.xlane.f32.xlu1 %v4488_v34 }
 0xec7   :  { %v4487_v57 = vpop.xlane.xlu0 %4486 }
 0xec8   :  { %v4491_v25 = vmul.f32 0.03125, %v4487_v57  ;;  %v7154_v57 = vld [vmem:[%s10694_s9 + $0x128] sm:$0xff] }
 0xec9   :  { %v4490_v35 = vpop.xlane.xlu1 %4489 }
 0xeca   :  { %v4493_v14 = vsub.f32 %v4479_v55, %v4491_v25  ;;  %v4492_v29 = vmul.f32 0.03125, %v4490_v35  ;;  %v7176_v55 = vld [vmem:[%s10694_s9 + $0x1d8] sm:$0xff]  ;;  %v7162_v25 = vld [vmem:[%s10694_s9 + $0x168] sm:$0xff]  ;;  %v7203_v35 = vcombine.low %v7167_v52, %v7175_v3 }
 0xecb   :  { %v7206_v7 = vcombine.high %v7168_v61, %v7176_v55  ;;  %v7193_v36 = vcombine.low %v7154_v57, %v7162_v25  ;;  %v8339_v52 = vld [vmem:[%s10696_s11 + $0x458] sm:$0xff]  }
 0xecc   :  { %v4494_v60 = vsub.f32 %v4480_v31, %v4492_v29  ;;  %v4495_v17 = vmul.f32 %v4493_v14, %v4493_v14  ;;  %v7192_v29 = vcombine.high %v7153_v12, %v7161_v11  ;;  %v8340_v3 = vld [vmem:[%s10696_s11 + $0x4d8] sm:$0xff]   ;;  %v8346_v12 = vld [vmem:[%s10696_s11 + $0x4a0] sm:$0xff]   ;;  %v8347_v11 = vld [vmem:[%s10696_s11 + $0x468] sm:$0xff]  }
 0xece   :  { %v4497_v54 = vsel %vm158_vm2, %v4495_v17, 0.0  ;;  %v4496_v18 = vmul.f32 %v4494_v60, %v4494_v60  ;;  %v7169_v17 = vld [vmem:[%s10694_s9 + $0x1a0] sm:$0xff] }
 0xecf   :  { %4498 = vadd.xlane.f32.xlu0 %v4497_v54  ;;  %v7177_v54 = vld [vmem:[%s10694_s9 + $0x1e0] sm:$0xff] }
 0xed0   :  { %v4500_v51 = vsel %vm158_vm2, %v4496_v18, 0.0  ;;  %v7170_v18 = vld [vmem:[%s10694_s9 + $0x1a8] sm:$0xff]  ;;  %v7208_v47 = vcombine.high %v7169_v17, %v7177_v54  ;;  %v7207_v63 = vcombine.low %v7169_v17, %v7177_v54  ;;  %v8354_v17 = vld [vmem:[%s10696_s11 + $0x4b0] sm:$0xff]   ;;  %v8355_v54 = vld [vmem:[%s10696_s11 + $0x478] sm:$0xff]  }
 0xed3   :  { %4501 = vadd.xlane.f32.xlu0 %v4500_v51  ;;  %v7178_v51 = vld [vmem:[%s10694_s9 + $0x1e8] sm:$0xff] }
 0xed4   :  { %v7210_v19 = vcombine.high %v7170_v18, %v7178_v51  ;;  %v7209_v28 = vcombine.low %v7170_v18, %v7178_v51  ;;  %v8356_v18 = vld [vmem:[%s10696_s11 + $0x4f8] sm:$0xff]  }
 0xed5   :  { %v8357_v51 = vld [vmem:[%s10696_s11 + $0x438] sm:$0xff]  }
 0xf5c   :  { %v4499_v42 = vpop.xlane.xlu0 %4498 }
 0xf5d   :  { %v4503_v8 = vmul.f32 0.03125, %v4499_v42  ;;  %v7211_v42 = vcombine.low %v7171_v9, %v7179_v39 }
 0xf5f   :  { %v4505_v33 = vadd.f32 1e-05, %v4503_v8  ;;  %v7213_v8 = vcombine.low %v7172_v27, %v7180_v59 }
 0xf60   :  { %v4502_v62 = vpop.xlane.xlu0 %4501 }
 0xf61   :  { %8613 = vrsqrt.f32 %v4505_v33  ;;  %v4504_v5 = vmul.f32 0.03125, %v4502_v62  ;;  %v8327_v33 = vld [vmem:[%s10696_s11 + $0x440] sm:$0xff]  }
 0xf62   :  { %v8328_v62 = vld [vmem:[%s10696_s11 + $0x4c0] sm:$0xff]  }
 0xf63   :  { %v4506_v2 = vadd.f32 1e-05, %v4504_v5  ;;  %v8329_v5 = vld [vmem:[%s10696_s11 + $0x400] sm:$0xff]  }
 0xf65   :  { %8615 = vrsqrt.f32 %v4506_v2  ;;  %v8330_v2 = vld [vmem:[%s10696_s11 + $0x480] sm:$0xff]  }
 0xf6b   :  { %v8614_v50 = vpop.eup %8613 }
 0xf6c   :  { %v4509_v4 = vmul.f32 %v8614_v50, %v4493_v14  ;;  %v7205_v14 = vcombine.low %v7168_v61, %v7176_v55  ;;  %v8331_v50 = vld [vmem:[%s10696_s11 + $0x448] sm:$0xff]   ;;  %v8341_v61 = vld [vmem:[%s10696_s11 + $0x418] sm:$0xff]  }
 0xf6d   :  { %v8342_v55 = vld [vmem:[%s10696_s11 + $0x498] sm:$0xff]  }
 0xf6e   :  { %v4517_v58 = vmul.f32 %v7147_v15, %v4509_v4  ;;  %v8332_v4 = vld [vmem:[%s10696_s11 + $0x4c8] sm:$0xff]  }
 0xf6f   :  { %v8616_v10 = vpop.eup %8615 }
 0xf70   :  { %v4510_v48 = vmul.f32 %v8616_v10, %v4494_v60  ;;  %v10061_v20 = vadd.f32 %v7148_v53, %v4517_v58  ;;  %v7194_v60 = vcombine.high %v7154_v57, %v7162_v25  ;;  %v8334_v10 = vld [vmem:[%s10696_s11 + $0x488] sm:$0xff]   ;;  %v8335_v58 = vld [vmem:[%s10696_s11 + $0x450] sm:$0xff]  }
 0xf71   :  { %v8348_v57 = vld [vmem:[%s10696_s11 + $0x4e8] sm:$0xff]  }
 0xf72   :  { %v4518_v26 = vmul.f32 %v7147_v15, %v4510_v48  ;;  %v8333_v15 = vld [vmem:[%s10696_s11 + $0x408] sm:$0xff]   ;;  %v8336_v48 = vld [vmem:[%s10696_s11 + $0x4d0] sm:$0xff]  }
 0xf73   :  { %v8349_v25 = vld [vmem:[%s10696_s11 + $0x428] sm:$0xff]  }
 0xf74   :  { %v10063_v31 = vadd.f32 %v7148_v53, %v4518_v26  ;;  %v8337_v53 = vld [vmem:[%s10696_s11 + $0x410] sm:$0xff]  }
 0xf75   :  { %v8338_v26 = vld [vmem:[%s10696_s11 + $0x490] sm:$0xff]  }
 0xf76   :  { %v10067_v34 = vpack.c.bf16 %v10063_v31, %v10061_v20 }
 0xf78   :  { %7215 = vmatmul.mubr.msk.bf16.vlgmr.msra.gmra.mrb[80].mxu1 %vm158_vm2, %v10067_v34  ;;  %7216 = vmatmul.mubr.msk.bf16.vlgmr.msra.gmra.mrb[68].mxu0 %vm158_vm2, %v10067_v34 }
 0xf79   :  { %4896 = vmatpush1.bf16.msra.mxu1 %v7187_v46  ;;  %4939 = vmatpush1.bf16.msra.mxu0 %v7189_v6  ;;  %v7197_v46 = vcombine.low %v7156_v1, %v7164_v32  ;;  %v7212_v6 = vcombine.high %v7171_v9, %v7179_v39 }
 0xf7a   :  { %4897 = vmatprep.subr.bf16.mxu1 %v7204_v21  ;;  %4940 = vmatprep.subr.bf16.mxu0 %v7206_v7  ;;  %v8344_v21 = vld [vmem:[%s10696_s11 + $0x4e0] sm:$0xff]  }
 0xf7b   :  { %4927 = vmatprep.mubr.bf16.mxu1 %v8653_v49  ;;  %4970 = vmatprep.mubr.bf16.mxu0 %v8653_v49  ;;  %v8345_v7 = vld [vmem:[%s10696_s11 + $0x420] sm:$0xff]  }
 0xf7d   :  { %4898 = vmatpush1.bf16.msra.mxu1 %v7203_v35  ;;  %4941 = vmatpush1.bf16.msra.mxu0 %v7205_v14  ;;  %v8350_v35 = vld [vmem:[%s10696_s11 + $0x4a8] sm:$0xff]   ;;  %v8351_v14 = vld [vmem:[%s10696_s11 + $0x470] sm:$0xff]  }
 0xf7e   :  { %4981 = vmatprep.subr.bf16.mxu1 %v7192_v29  ;;  %5024 = vmatprep.subr.bf16.mxu0 %v7194_v60  ;;  %v8352_v29 = vld [vmem:[%s10696_s11 + $0x4f0] sm:$0xff]  }
 0xf7f   :  { %v8353_v60 = vld [vmem:[%s10696_s11 + $0x430] sm:$0xff]  }
 0xf80   :  { %7217 = vmatmul.mubr.msk.bf16.vlgmr.msra.gmra.mrb[84].mxu1 %vm158_vm2, %v10067_v34  ;;  %7218 = vmatmul.mubr.msk.bf16.vlgmr.msra.gmra.mrb[72].mxu0 %vm158_vm2, %v10067_v34 }
 0xf81   :  { %4982 = vmatpush1.bf16.msra.mxu1 %v7191_v30  ;;  %5025 = vmatpush1.bf16.msra.mxu0 %v7193_v36  ;;  %v8358_v30 = vld [vmem:[%s10696_s11 + $0x4b8] sm:$0xff]   ;;  %v8359_v36 = vld [vmem:[%s10696_s11 + $0x540] sm:$0xff]  }
 0xf82   :  { %4983 = vmatprep.subr.bf16.mxu1 %v7208_v47  ;;  %5026 = vmatprep.subr.bf16.mxu0 %v7210_v19  ;;  %v8360_v47 = vld [vmem:[%s10696_s11 + $0x5c0] sm:$0xff]   ;;  %v7181_v19 = vld [vmem:[%s10695_s10 + $0x10] sm:$0xff] }
 0xf83   :  { %5013 = vmatprep.mubr.bf16.mxu1 %v8653_v49  ;;  %5056 = vmatprep.mubr.bf16.mxu0 %v8653_v49  ;;  %v4569_v23 = vrot.slane %v7181_v19, %v8822_v40  ;;  %v4577_v24 = vrot.slane %v7181_v19, %v9352_v41  ;;  %v4573_v1 = vrot.slane %v7181_v19, %v9358_v13 }
 0xf84   :  { %v4581_v32 = vrot.slane %v7181_v19, %v9361_v16 }
 0xf85   :  { %4984 = vmatpush1.bf16.msra.mxu1 %v7207_v63  ;;  %5027 = vmatpush1.bf16.msra.mxu0 %v7209_v28 }
 0xf86   :  { %5067 = vmatprep.subr.bf16.mxu1 %v7196_v56  ;;  %5110 = vmatprep.subr.bf16.mxu0 %v7198_v43 }
 0xf88   :  { %7219 = vmatmul.mubr.msk.bf16.vlgmr.msra.gmra.mrb[88].mxu1 %vm158_vm2, %v10067_v34  ;;  %7220 = vmatmul.mubr.msk.bf16.vlgmr.msra.gmra.mrb[76].mxu0 %vm158_vm2, %v10067_v34 }
 0xf89   :  { %5068 = vmatpush1.bf16.msra.mxu1 %v7195_v38  ;;  %5111 = vmatpush1.bf16.msra.mxu0 %v7197_v46 }
 0xf8a   :  { %5069 = vmatprep.subr.bf16.mxu1 %v7212_v6  ;;  %5112 = vmatprep.subr.bf16.mxu0 %v7214_v0 }
 0xf8b   :  { %5099 = vmatprep.mubr.bf16.mxu1 %v8653_v49  ;;  %5142 = vmatprep.mubr.bf16.mxu0 %v8653_v49 }
 0xf8d   :  { %5070 = vmatpush1.bf16.msra.mxu1 %v7211_v42  ;;  %5113 = vmatpush1.bf16.msra.mxu0 %v7213_v8 }
 0xf8e   :  { %7863 = vmatprep.subr.bf16.mxu1 %v8327_v33  ;;  %7885 = vmatprep.subr.bf16.mxu0 %v8328_v62  ;;  %v4585_v33 = vrot.slane %v7181_v19, %v9368_v22  ;;  %v4593_v62 = vrot.slane %v7181_v19, %v9371_v37 }
 0xf90   :  { %7221 = vmatmul.mubr.msk.bf16.vlgmr.msra.gmra.mrb[92].mxu1 %vm158_vm2, %v10067_v34  ;;  %7222 = vmatmul.mubr.msk.bf16.vlgmr.msra.gmra.mrb[80].mxu0 %vm158_vm2, %v10067_v34  ;;  %v8343_v34 = vld [vmem:[%s10696_s11 + $0x460] sm:$0xff]  }
 0xf91   :  { %7864 = vmatpush3.bf16.msra.mxu1 %v8329_v5  ;;  %7886 = vmatpush3.bf16.msra.mxu0 %v8330_v2 }
 0xf92   :  { %7865 = vmatprep.subr.bf16.mxu1 %v8331_v50  ;;  %7887 = vmatprep.subr.bf16.mxu0 %v8332_v4  ;;  %v4589_v50 = vrot.slane %v7181_v19, %v9374_v44  ;;  %v4597_v4 = vrot.slane %v7181_v19, %v9377_v45 }
 0xf95   :  { %7866 = vmatpush3.bf16.msra.mxu1 %v8333_v15  ;;  %7888 = vmatpush3.bf16.msra.mxu0 %v8334_v10 }
 0xf96   :  { %7867 = vmatprep.subr.bf16.mxu1 %v8335_v58  ;;  %7889 = vmatprep.subr.bf16.mxu0 %v8336_v48 }
 0xf99   :  { %7868 = vmatpush3.bf16.msra.mxu1 %v8337_v53  ;;  %7890 = vmatpush3.bf16.msra.mxu0 %v8338_v26 }
 0xf9a   :  { %7869 = vmatprep.subr.bf16.mxu1 %v8339_v52  ;;  %7891 = vmatprep.subr.bf16.mxu0 %v8340_v3 }
 0xf9d   :  { %7870 = vmatpush3.bf16.msra.mxu1 %v8341_v61  ;;  %7892 = vmatpush3.bf16.msra.mxu0 %v8342_v55  ;;  %v10255_v61 = vld [vmem:[%s10695_s10 + $0x18] sm:$0xff] }
 0xf9e   :  { %7871 = vmatprep.subr.bf16.mxu1 %v8343_v34  ;;  %7893 = vmatprep.subr.bf16.mxu0 %v8344_v21  ;;  %v4609_v19 = vrot.slane %v10255_v61, %v9352_v41  ;;  %v8366_v41 = vld [vmem:[%s10696_s11 + $0x588] sm:$0xff]  }
 0xfa1   :  { %7872 = vmatpush3.bf16.msra.mxu1 %v8345_v7  ;;  %7894 = vmatpush3.bf16.msra.mxu0 %v8346_v12 }
 0xfa2   :  { %7873 = vmatprep.subr.bf16.mxu1 %v8347_v11  ;;  %7895 = vmatprep.subr.bf16.mxu0 %v8348_v57  ;;  %v8361_v57 = vld [vmem:[%s10696_s11 + $0x500] sm:$0xff]  }
 0xfa5   :  { %7874 = vmatpush3.bf16.msra.mxu1 %v8349_v25  ;;  %7896 = vmatpush3.bf16.msra.mxu0 %v8350_v35  ;;  %v8362_v25 = vld [vmem:[%s10696_s11 + $0x580] sm:$0xff]  }
 0xfa6   :  { %7875 = vmatprep.subr.bf16.mxu1 %v8351_v14  ;;  %7897 = vmatprep.subr.bf16.mxu0 %v8352_v29 }
 0xfa9   :  { %7876 = vmatpush3.bf16.msra.mxu1 %v8353_v60  ;;  %7898 = vmatpush3.bf16.msra.mxu0 %v8354_v17  ;;  %v8363_v17 = vld [vmem:[%s10696_s11 + $0x548] sm:$0xff]  }
 0xfaa   :  { %7877 = vmatprep.subr.bf16.mxu1 %v8355_v54  ;;  %7899 = vmatprep.subr.bf16.mxu0 %v8356_v18  ;;  %v8364_v54 = vld [vmem:[%s10696_s11 + $0x5c8] sm:$0xff]   ;;  %v4601_v18 = vrot.slane %v10255_v61, %v8822_v40 }
 0xfad   :  { %7878 = vmatpush3.bf16.msra.mxu1 %v8357_v51  ;;  %7900 = vmatpush3.bf16.msra.mxu0 %v8358_v30 }
 0xfae   :  { %7907 = vmatprep.subr.bf16.mxu1 %v8359_v36  ;;  %7929 = vmatprep.subr.bf16.mxu0 %v8360_v47 }
0x104b   :  { %v4843_v63 = vpop.f32.mrb[80].mxu1  ;;  %v4886_v28 = vpop.f32.mrb[68].mxu0 }
0x104c   :  { %v4844_v56 = vadd.f32 %v4843_v63, %v4569_v23  ;;  %v4887_v43 = vadd.f32 %v4886_v28, %v4577_v24  ;;  %v4845_v9 = vpop.f32.mrb[81].mxu1  ;;  %v4888_v39 = vpop.f32.mrb[69].mxu0  ;;  %v4605_v63 = vrot.slane %v10255_v61, %v9358_v13 }
0x104d   :  { %v4846_v27 = vadd.f32 %v4845_v9, %v4573_v1  ;;  %v4889_v59 = vadd.f32 %v4888_v39, %v4581_v32  ;;  %v4847_v38 = vpop.f32.mrb[82].mxu1  ;;  %v4890_v46 = vpop.f32.mrb[70].mxu0  ;;  %v4613_v9 = vrot.slane %v10255_v61, %v9361_v16 }
0x104e   :  { %v4848_v6 = vadd.f32 %v4847_v38, %v4569_v23  ;;  %v4891_v0 = vadd.f32 %v4890_v46, %v4577_v24  ;;  %v4849_v42 = vpop.f32.mrb[83].mxu1  ;;  %v4892_v8 = vpop.f32.mrb[71].mxu0  ;;  %v5153_v15 = vmax.f32 %v4844_v56, 0.0  ;;  %v5155_v10 = vmax.f32 %v4887_v43, 0.0  ;;  %v8365_v43 = vld [vmem:[%s10696_s11 + $0x508] sm:$0xff]   ;;  %v8367_v46 = vld [vmem:[%s10696_s11 + $0x550] sm:$0xff]  }
0x104f   :  { %v4850_v5 = vadd.f32 %v4849_v42, %v4573_v1  ;;  %v4893_v2 = vadd.f32 %v4892_v8, %v4581_v32  ;;  %v5154_v53 = vmax.f32 %v4846_v27, 0.0  ;;  %v5156_v26 = vmax.f32 %v4889_v59, 0.0 }
0x1050   :  { %v5169_v58 = vmax.f32 %v4848_v6, 0.0  ;;  %v5171_v48 = vmax.f32 %v4891_v0, 0.0  ;;  %v8368_v6 = vld [vmem:[%s10696_s11 + $0x5d0] sm:$0xff]  }
0x1051   :  { %v5170_v52 = vmax.f32 %v4850_v5, 0.0  ;;  %v5172_v3 = vmax.f32 %v4893_v2, 0.0 }
0x1052   :  { %v5442_v55 = vpack.c.bf16 %v5169_v58, %v5153_v15  ;;  %v5444_v34 = vpack.c.bf16 %v5171_v48, %v5155_v10  ;;  %v8369_v15 = vld [vmem:[%s10696_s11 + $0x510] sm:$0xff]  }
0x1053   :  { %v5443_v21 = vpack.c.bf16 %v5170_v52, %v5154_v53  ;;  %v5445_v7 = vpack.c.bf16 %v5172_v3, %v5156_v26  ;;  %v4929_v12 = vpop.f32.mrb[84].mxu1  ;;  %v4972_v11 = vpop.f32.mrb[72].mxu0  ;;  %v8370_v10 = vld [vmem:[%s10696_s11 + $0x590] sm:$0xff]   ;;  %v8371_v52 = vld [vmem:[%s10696_s11 + $0x558] sm:$0xff]  }
0x1054   :  { %v4930_v35 = vadd.f32 %v4929_v12, %v4585_v33  ;;  %v4973_v14 = vadd.f32 %v4972_v11, %v4593_v62  ;;  %v4931_v29 = vpop.f32.mrb[85].mxu1  ;;  %v4974_v60 = vpop.f32.mrb[73].mxu0  ;;  %v8372_v3 = vld [vmem:[%s10696_s11 + $0x5d8] sm:$0xff]   ;;  %v4617_v12 = vrot.slane %v10255_v61, %v9368_v22 }
0x1055   :  { %v4932_v51 = vadd.f32 %v4931_v29, %v4589_v50  ;;  %v4975_v30 = vadd.f32 %v4974_v60, %v4597_v4  ;;  %v4933_v36 = vpop.f32.mrb[86].mxu1  ;;  %v4976_v47 = vpop.f32.mrb[74].mxu0  ;;  %6266 = vmatprep.mubr.bf16.mxu1 %v5443_v21  ;;  %6307 = vmatprep.mubr.bf16.mxu0 %v5445_v7  ;;  %v4621_v29 = vrot.slane %v10255_v61, %v9374_v44  ;;  %v8374_v22 = vld [vmem:[%s10696_s11 + $0x598] sm:$0xff]   ;;  %v8375_v44 = vld [vmem:[%s10696_s11 + $0x560] sm:$0xff]  }
0x1056   :  { %v4934_v23 = vadd.f32 %v4933_v36, %v4585_v33  ;;  %v4977_v24 = vadd.f32 %v4976_v47, %v4593_v62  ;;  %v4935_v1 = vpop.f32.mrb[87].mxu1  ;;  %v4978_v32 = vpop.f32.mrb[75].mxu0  ;;  %6267 = vmatmul.mubr.bf16.vlgmr.msra.gmra.mrb[96].mxu1 %v5442_v55  ;;  %6308 = vmatmul.mubr.bf16.vlgmr.msra.gmra.mrb[84].mxu0 %v5444_v34  ;;  %v5157_v39 = vmax.f32 %v4930_v35, 0.0  ;;  %v5159_v27 = vmax.f32 %v4973_v14, 0.0  ;;  %v8376_v47 = vld [vmem:[%s10696_s11 + $0x5e0] sm:$0xff]  }
0x1057   :  { %v4936_v28 = vadd.f32 %v4935_v1, %v4589_v50  ;;  %v4979_v56 = vadd.f32 %v4978_v32, %v4597_v4  ;;  %7908 = vmatpush3.bf16.msra.mxu1 %v8361_v57  ;;  %7930 = vmatpush3.bf16.msra.mxu0 %v8362_v25  ;;  %v5158_v0 = vmax.f32 %v4932_v51, 0.0  ;;  %v5160_v42 = vmax.f32 %v4975_v30, 0.0 }
0x1058   :  { %v5173_v59 = vmax.f32 %v4934_v23, 0.0  ;;  %v5175_v38 = vmax.f32 %v4977_v24, 0.0  ;;  %7909 = vmatprep.subr.bf16.mxu1 %v8363_v17  ;;  %7931 = vmatprep.subr.bf16.mxu0 %v8364_v54  ;;  %v4625_v14 = vrot.slane %v10255_v61, %v9371_v37  ;;  %v8373_v54 = vld [vmem:[%s10696_s11 + $0x518] sm:$0xff]  }
0x1059   :  { %v5174_v8 = vmax.f32 %v4936_v28, 0.0  ;;  %v5176_v33 = vmax.f32 %v4979_v56, 0.0 }
0x105a   :  { %v10289_v62 = vpack.c.bf16 %v5173_v59, %v5157_v39  ;;  %v10291_v16 = vpack.c.bf16 %v5175_v38, %v5159_v27  ;;  %v8379_v38 = vld [vmem:[%s10696_s11 + $0x568] sm:$0xff]  }
0x105b   :  { %v5447_v5 = vpack.c.bf16 %v5174_v8, %v5158_v0  ;;  %v5449_v2 = vpack.c.bf16 %v5176_v33, %v5160_v42  ;;  %7910 = vmatpush3.bf16.msra.mxu1 %v8365_v43  ;;  %7932 = vmatpush3.bf16.msra.mxu0 %v8366_v41  ;;  %v5015_v50 = vpop.f32.mrb[88].mxu1  ;;  %v5058_v4 = vpop.f32.mrb[76].mxu0  ;;  %v8377_v43 = vld [vmem:[%s10696_s11 + $0x520] sm:$0xff]  }
0x105c   :  { %v5016_v58 = vadd.f32 %v5015_v50, %v4601_v18  ;;  %v5059_v48 = vadd.f32 %v5058_v4, %v4609_v19  ;;  %v5017_v53 = vpop.f32.mrb[89].mxu1  ;;  %v5060_v26 = vpop.f32.mrb[77].mxu0  ;;  %7911 = vmatprep.subr.bf16.mxu1 %v8367_v46  ;;  %7933 = vmatprep.subr.bf16.mxu0 %v8368_v6  ;;  %v8378_v41 = vld [vmem:[%s10696_s11 + $0x5a0] sm:$0xff]   ;;  %v8380_v46 = vld [vmem:[%s10696_s11 + $0x5e8] sm:$0xff]  }
0x105d   :  { %v5018_v55 = vadd.f32 %v5017_v53, %v4605_v63  ;;  %v5061_v34 = vadd.f32 %v5060_v26, %v4613_v9  ;;  %v5019_v21 = vpop.f32.mrb[90].mxu1  ;;  %v5062_v7 = vpop.f32.mrb[78].mxu0  ;;  %6348 = vmatprep.mubr.bf16.mxu1 %v5447_v5  ;;  %6389 = vmatprep.mubr.bf16.mxu0 %v5449_v2 }
0x105e   :  { %v5020_v11 = vadd.f32 %v5019_v21, %v4601_v18  ;;  %v5063_v57 = vadd.f32 %v5062_v7, %v4609_v19  ;;  %v5021_v25 = vpop.f32.mrb[91].mxu1  ;;  %v5064_v35 = vpop.f32.mrb[79].mxu0  ;;  %v4629_v18 = vrot.slane %v10255_v61, %v9377_v45  ;;  %v5161_v51 = vmax.f32 %v5016_v58, 0.0  ;;  %v8382_v58 = vld [vmem:[%s10696_s11 + $0x5a8] sm:$0xff]  }
0x105f   :  { %v5022_v60 = vadd.f32 %v5021_v25, %v4605_v63  ;;  %v5065_v17 = vadd.f32 %v5064_v35, %v4613_v9  ;;  %7912 = vmatpush3.bf16.msra.mxu1 %v8369_v15  ;;  %7934 = vmatpush3.bf16.msra.mxu0 %v8370_v10  ;;  %v5163_v37 = vmax.f32 %v5059_v48, 0.0  ;;  %v5162_v19 = vmax.f32 %v5018_v55, 0.0  ;;  %v8381_v10 = vld [vmem:[%s10696_s11 + $0x528] sm:$0xff]   ;;  %v8384_v55 = vld [vmem:[%s10696_s11 + $0x5f0] sm:$0xff]  }
0x1060   :  { %v5177_v30 = vmax.f32 %v5020_v11, 0.0  ;;  %v5179_v36 = vmax.f32 %v5063_v57, 0.0  ;;  %7913 = vmatprep.subr.bf16.mxu1 %v8371_v52  ;;  %7935 = vmatprep.subr.bf16.mxu0 %v8372_v3  ;;  %v5164_v23 = vmax.f32 %v5061_v34, 0.0  ;;  %v8383_v3 = vld [vmem:[%s10696_s11 + $0x570] sm:$0xff]  }
0x1061   :  { %v5178_v24 = vmax.f32 %v5022_v60, 0.0  ;;  %v5180_v1 = vmax.f32 %v5065_v17, 0.0  ;;  %v8387_v60 = vld [vmem:[%s10696_s11 + $0x578] sm:$0xff]  }
0x1062   :  { %v10325_v32 = vpack.c.bf16 %v5177_v30, %v5161_v51  ;;  %v10327_v45 = vpack.c.bf16 %v5179_v36, %v5163_v37  ;;  %v8388_v17 = vld [vmem:[%s10696_s11 + $0x5f8] sm:$0xff]   ;;  %v8392_v51 = vld [vmem:[%s10696_s11 + $0x6c0] sm:$0xff]   ;;  %v8395_v36 = vld [vmem:[%s10696_s11 + $0x648] sm:$0xff]  }
0x1063   :  { %v10329_v61 = vpack.c.bf16 %v5178_v24, %v5162_v19  ;;  %v10331_v63 = vpack.c.bf16 %v5180_v1, %v5164_v23  ;;  %7914 = vmatpush3.bf16.msra.mxu1 %v8373_v54  ;;  %7936 = vmatpush3.bf16.msra.mxu0 %v8374_v22  ;;  %v5101_v28 = vpop.f32.mrb[92].mxu1  ;;  %v5144_v56 = vpop.f32.mrb[80].mxu0  ;;  %v8389_v54 = vld [vmem:[%s10696_s11 + $0x538] sm:$0xff]   ;;  %v8393_v37 = vld [vmem:[%s10696_s11 + $0x600] sm:$0xff]   ;;  %v8398_v19 = vld [vmem:[%s10696_s11 + $0x688] sm:$0xff]  }
0x1064   :  { %v5102_v9 = vadd.f32 %v5101_v28, %v4617_v12  ;;  %v5145_v39 = vadd.f32 %v5144_v56, %v4625_v14  ;;  %v5103_v27 = vpop.f32.mrb[93].mxu1  ;;  %v5146_v59 = vpop.f32.mrb[81].mxu0  ;;  %7915 = vmatprep.subr.bf16.mxu1 %v8375_v44  ;;  %7937 = vmatprep.subr.bf16.mxu0 %v8376_v47  ;;  %v8390_v22 = vld [vmem:[%s10696_s11 + $0x5b8] sm:$0xff]   ;;  %v8394_v30 = vld [vmem:[%s10696_s11 + $0x680] sm:$0xff]   ;;  %v8396_v44 = vld [vmem:[%s10696_s11 + $0x6c8] sm:$0xff]  }
0x1065   :  { %v5104_v6 = vadd.f32 %v5103_v27, %v4621_v29  ;;  %v5147_v0 = vadd.f32 %v5146_v59, %v4629_v18  ;;  %v5105_v42 = vpop.f32.mrb[94].mxu1  ;;  %v5148_v8 = vpop.f32.mrb[82].mxu0  ;;  %v8397_v47 = vld [vmem:[%s10696_s11 + $0x608] sm:$0xff]   ;;  %v8401_v23 = vld [vmem:[%s10696_s11 + $0x610] sm:$0xff]   ;;  %v8403_v1 = vld [vmem:[%s10696_s11 + $0x658] sm:$0xff]  }
0x1066   :  { %v5106_v33 = vadd.f32 %v5105_v42, %v4617_v12  ;;  %v5149_v5 = vadd.f32 %v5148_v8, %v4625_v14  ;;  %v5107_v2 = vpop.f32.mrb[95].mxu1  ;;  %v5150_v50 = vpop.f32.mrb[83].mxu0  ;;  %v5165_v48 = vmax.f32 %v5102_v9, 0.0  ;;  %v5167_v53 = vmax.f32 %v5145_v39, 0.0  ;;  %v8385_v14 = vld [vmem:[%s10696_s11 + $0x530] sm:$0xff]   ;;  %v8406_v28 = vld [vmem:[%s10696_s11 + $0x698] sm:$0xff]  }
0x1067   :  { %v5108_v4 = vadd.f32 %v5107_v2, %v4621_v29  ;;  %v5151_v15 = vadd.f32 %v5150_v50, %v4629_v18  ;;  %7916 = vmatpush3.bf16.msra.mxu1 %v8377_v43  ;;  %7938 = vmatpush3.bf16.msra.mxu0 %v8378_v41  ;;  %v5166_v34 = vmax.f32 %v5104_v6, 0.0  ;;  %v5168_v21 = vmax.f32 %v5147_v0, 0.0  ;;  %v8386_v29 = vld [vmem:[%s10696_s11 + $0x5b0] sm:$0xff]   ;;  %v8391_v18 = vld [vmem:[%s10696_s11 + $0x640] sm:$0xff]   ;;  %v8411_v39 = vld [vmem:[%s10696_s11 + $0x668] sm:$0xff]  }
0x1068   :  { %v5181_v26 = vmax.f32 %v5106_v33, 0.0  ;;  %v5183_v52 = vmax.f32 %v5149_v5, 0.0  ;;  %7917 = vmatprep.subr.bf16.mxu1 %v8379_v38  ;;  %7939 = vmatprep.subr.bf16.mxu0 %v8380_v46  ;;  %v8402_v24 = vld [vmem:[%s10696_s11 + $0x690] sm:$0xff]   ;;  %v8407_v56 = vld [vmem:[%s10696_s11 + $0x660] sm:$0xff]   ;;  %v8412_v27 = vld [vmem:[%s10696_s11 + $0x6e8] sm:$0xff]  }
0x1069   :  { %v5182_v7 = vmax.f32 %v5108_v4, 0.0  ;;  %v5184_v12 = vmax.f32 %v5151_v15, 0.0  ;;  %v8408_v43 = vld [vmem:[%s10696_s11 + $0x6e0] sm:$0xff]   ;;  %v8413_v59 = vld [vmem:[%s10696_s11 + $0x628] sm:$0xff]   ;;  %v8415_v46 = vld [vmem:[%s10696_s11 + $0x670] sm:$0xff]  }
0x106a   :  { %v10357_v11 = vpack.c.bf16 %v5181_v26, %v5165_v48  ;;  %v10359_v57 = vpack.c.bf16 %v5183_v52, %v5167_v53  ;;  %v8409_v41 = vld [vmem:[%s10696_s11 + $0x620] sm:$0xff]   ;;  %v8414_v38 = vld [vmem:[%s10696_s11 + $0x6a8] sm:$0xff]   ;;  %v8416_v6 = vld [vmem:[%s10696_s11 + $0x6f0] sm:$0xff]  }
0x106b   :  { %v10361_v25 = vpack.c.bf16 %v5182_v7, %v5166_v34  ;;  %v10363_v35 = vpack.c.bf16 %v5184_v12, %v5168_v21  ;;  %7918 = vmatpush3.bf16.msra.mxu1 %v8381_v10  ;;  %7940 = vmatpush3.bf16.msra.mxu0 %v8382_v58  ;;  %v8410_v9 = vld [vmem:[%s10696_s11 + $0x6a0] sm:$0xff]   ;;  %v8417_v0 = vld [vmem:[%s10696_s11 + $0x630] sm:$0xff]   ;;  %v8419_v8 = vld [vmem:[%s10696_s11 + $0x678] sm:$0xff]  }
0x106c   :  { %7919 = vmatprep.subr.bf16.mxu1 %v8383_v3  ;;  %7941 = vmatprep.subr.bf16.mxu0 %v8384_v55  ;;  %v8418_v42 = vld [vmem:[%s10696_s11 + $0x6b0] sm:$0xff]   ;;  %v8420_v33 = vld [vmem:[%s10696_s11 + $0x6f8] sm:$0xff]   ;;  %v8423_v50 = vld [vmem:[%s10696_s11 + $0x740] sm:$0xff]  }
0x106d   :  { %v8421_v5 = vld [vmem:[%s10696_s11 + $0x638] sm:$0xff]   ;;  %v8424_v4 = vld [vmem:[%s10696_s11 + $0x7c0] sm:$0xff]   ;;  %v8427_v58 = vld [vmem:[%s10696_s11 + $0x748] sm:$0xff]  }
0x106e   :  { %v8422_v2 = vld [vmem:[%s10696_s11 + $0x6b8] sm:$0xff]   ;;  %v8425_v15 = vld [vmem:[%s10696_s11 + $0x700] sm:$0xff]   ;;  %v8428_v48 = vld [vmem:[%s10696_s11 + $0x7c8] sm:$0xff]  }
0x106f   :  { %7920 = vmatpush3.bf16.msra.mxu1 %v8385_v14  ;;  %7942 = vmatpush3.bf16.msra.mxu0 %v8386_v29  ;;  %v8426_v10 = vld [vmem:[%s10696_s11 + $0x780] sm:$0xff]   ;;  %v8429_v53 = vld [vmem:[%s10696_s11 + $0x708] sm:$0xff]   ;;  %v8433_v52 = vld [vmem:[%s10696_s11 + $0x710] sm:$0xff]  }
0x1070   :  { %7921 = vmatprep.subr.bf16.mxu1 %v8387_v60  ;;  %7943 = vmatprep.subr.bf16.mxu0 %v8388_v17  ;;  %v8430_v26 = vld [vmem:[%s10696_s11 + $0x788] sm:$0xff]   ;;  %v8434_v3 = vld [vmem:[%s10696_s11 + $0x790] sm:$0xff]   ;;  %v8435_v55 = vld [vmem:[%s10696_s11 + $0x758] sm:$0xff]  }
0x1071   :  { %v8436_v34 = vld [vmem:[%s10696_s11 + $0x7d8] sm:$0xff]   ;;  %v8439_v12 = vld [vmem:[%s10696_s11 + $0x760] sm:$0xff]   ;;  %v8443_v29 = vld [vmem:[%s10696_s11 + $0x768] sm:$0xff]  }
0x1072   :  { %v8437_v21 = vld [vmem:[%s10696_s11 + $0x718] sm:$0xff]   ;;  %v8442_v14 = vld [vmem:[%s10696_s11 + $0x7a0] sm:$0xff]   ;;  %v8444_v60 = vld [vmem:[%s10696_s11 + $0x7e8] sm:$0xff]  }
0x1073   :  { %7922 = vmatpush3.bf16.msra.mxu1 %v8389_v54  ;;  %7944 = vmatpush3.bf16.msra.mxu0 %v8390_v22  ;;  %v8438_v7 = vld [vmem:[%s10696_s11 + $0x798] sm:$0xff]   ;;  %v8445_v17 = vld [vmem:[%s10696_s11 + $0x728] sm:$0xff]   ;;  %v8447_v22 = vld [vmem:[%s10696_s11 + $0x770] sm:$0xff]  }
0x1074   :  { %7951 = vmatprep.subr.bf16.mxu1 %v8391_v18  ;;  %7973 = vmatprep.subr.bf16.mxu0 %v8392_v51  ;;  %v8446_v54 = vld [vmem:[%s10696_s11 + $0x7a8] sm:$0xff]   ;;  %v8448_v18 = vld [vmem:[%s10696_s11 + $0x7f0] sm:$0xff]  }
0x1075   :  { %v8449_v51 = vld [vmem:[%s10696_s11 + $0x730] sm:$0xff]  }
0x1076   :  { %6349 = vmatmul.mubr.bf16.vlgmr.msra.gmra.mrb[100].mxu1 %v10289_v62  ;;  %6390 = vmatmul.mubr.bf16.vlgmr.msra.gmra.mrb[88].mxu0 %v10291_v16  ;;  %v8399_v62 = vld [vmem:[%s10696_s11 + $0x650] sm:$0xff]  }
0x1077   :  { %7952 = vmatpush3.bf16.msra.mxu1 %v8393_v37  ;;  %6430 = vmatprep.mubr.bf16.mxu1 %v10329_v61  ;;  %v8400_v16 = vld [vmem:[%s10696_s11 + $0x6d0] sm:$0xff]   ;;  %v8404_v61 = vld [vmem:[%s10696_s11 + $0x6d8] sm:$0xff]  }
0x1078   :  { %7974 = vmatpush3.bf16.msra.mxu0 %v8394_v30  ;;  %6471 = vmatprep.mubr.bf16.mxu0 %v10331_v63  ;;  %v8405_v63 = vld [vmem:[%s10696_s11 + $0x618] sm:$0xff]   ;;  %v8450_v37 = vld [vmem:[%s10696_s11 + $0x7b0] sm:$0xff]  }
0x1079   :  { %7953 = vmatprep.subr.bf16.mxu1 %v8395_v36  ;;  %7975 = vmatprep.subr.bf16.mxu0 %v8396_v44  ;;  %v8451_v30 = vld [vmem:[%s10696_s11 + $0x778] sm:$0xff]  }
0x107a   :  { %v8452_v36 = vld [vmem:[%s10696_s11 + $0x7f8] sm:$0xff]  }
0x107b   :  { %7954 = vmatpush3.bf16.msra.mxu1 %v8397_v47  ;;  %v8453_v44 = vld [vmem:[%s10696_s11 + $0x738] sm:$0xff]  }
0x107c   :  { %7976 = vmatpush3.bf16.msra.mxu0 %v8398_v19  ;;  %7955 = vmatprep.subr.bf16.mxu1 %v8399_v62  ;;  %v8454_v47 = vld [vmem:[%s10696_s11 + $0x7b8] sm:$0xff]  }
0x107d   :  { %7977 = vmatprep.subr.bf16.mxu0 %v8400_v16  ;;  %v7480_v16 = vld [vmem:[%s10697_s12 + $0x1] ss:$0 sm:$0xff] }
0x107f   :  { %7956 = vmatpush3.bf16.msra.mxu1 %v8401_v23 }
0x1080   :  { %7978 = vmatpush3.bf16.msra.mxu0 %v8402_v24  ;;  %7957 = vmatprep.subr.bf16.mxu1 %v8403_v1 }
0x1081   :  { %7979 = vmatprep.subr.bf16.mxu0 %v8404_v61 }
0x1083   :  { %7958 = vmatpush3.bf16.msra.mxu1 %v8405_v63 }
0x1084   :  { %7980 = vmatpush3.bf16.msra.mxu0 %v8406_v28  ;;  %7959 = vmatprep.subr.bf16.mxu1 %v8407_v56 }
0x1085   :  { %7981 = vmatprep.subr.bf16.mxu0 %v8408_v43 }
0x1087   :  { %7960 = vmatpush3.bf16.msra.mxu1 %v8409_v41 }
0x1088   :  { %7982 = vmatpush3.bf16.msra.mxu0 %v8410_v9  ;;  %7961 = vmatprep.subr.bf16.mxu1 %v8411_v39 }
0x1089   :  { %7983 = vmatprep.subr.bf16.mxu0 %v8412_v27 }
0x108b   :  { %7962 = vmatpush3.bf16.msra.mxu1 %v8413_v59 }
0x108c   :  { %7984 = vmatpush3.bf16.msra.mxu0 %v8414_v38  ;;  %7963 = vmatprep.subr.bf16.mxu1 %v8415_v46 }
0x108d   :  { %7985 = vmatprep.subr.bf16.mxu0 %v8416_v6 }
0x108f   :  { %7964 = vmatpush3.bf16.msra.mxu1 %v8417_v0 }
0x1090   :  { %7986 = vmatpush3.bf16.msra.mxu0 %v8418_v42  ;;  %7965 = vmatprep.subr.bf16.mxu1 %v8419_v8 }
0x1091   :  { %7987 = vmatprep.subr.bf16.mxu0 %v8420_v33 }
0x1093   :  { %7966 = vmatpush3.bf16.msra.mxu1 %v8421_v5 }
0x1094   :  { %7988 = vmatpush3.bf16.msra.mxu0 %v8422_v2  ;;  %7995 = vmatprep.subr.bf16.mxu1 %v8423_v50 }
0x1095   :  { %8017 = vmatprep.subr.bf16.mxu0 %v8424_v4 }
0x1096   :  { %6431 = vmatmul.mubr.bf16.vlgmr.msra.gmra.mrb[104].mxu1 %v10325_v32  ;;  %v8431_v32 = vld [vmem:[%s10696_s11 + $0x750] sm:$0xff]  }
0x1097   :  { %6472 = vmatmul.mubr.bf16.vlgmr.msra.gmra.mrb[92].mxu0 %v10327_v45  ;;  %7996 = vmatpush3.bf16.msra.mxu1 %v8425_v15  ;;  %v8432_v45 = vld [vmem:[%s10696_s11 + $0x7d0] sm:$0xff]  }
0x1098   :  { %6512 = vmatprep.mubr.bf16.mxu1 %v10361_v25  ;;  %8018 = vmatpush3.bf16.msra.mxu0 %v8426_v10  ;;  %v8440_v25 = vld [vmem:[%s10696_s11 + $0x7e0] sm:$0xff]  }
0x1099   :  { %6553 = vmatprep.mubr.bf16.mxu0 %v10363_v35  ;;  %7997 = vmatprep.subr.bf16.mxu1 %v8427_v58  ;;  %v8441_v35 = vld [vmem:[%s10696_s11 + $0x720] sm:$0xff]  }
0x109a   :  { %8019 = vmatprep.subr.bf16.mxu0 %v8428_v48 }
0x109b   :  { %7998 = vmatpush3.bf16.msra.mxu1 %v8429_v53 }
0x109c   :  { %8020 = vmatpush3.bf16.msra.mxu0 %v8430_v26  ;;  %7999 = vmatprep.subr.bf16.mxu1 %v8431_v32 }
0x109d   :  { %8021 = vmatprep.subr.bf16.mxu0 %v8432_v45 }
0x109f   :  { %8000 = vmatpush3.bf16.msra.mxu1 %v8433_v52 }
0x10a0   :  { %8022 = vmatpush3.bf16.msra.mxu0 %v8434_v3  ;;  %8001 = vmatprep.subr.bf16.mxu1 %v8435_v55 }
0x10a1   :  { %8023 = vmatprep.subr.bf16.mxu0 %v8436_v34 }
0x10a3   :  { %8002 = vmatpush3.bf16.msra.mxu1 %v8437_v21 }
0x10a4   :  { %8024 = vmatpush3.bf16.msra.mxu0 %v8438_v7  ;;  %8003 = vmatprep.subr.bf16.mxu1 %v8439_v12 }
0x10a5   :  { %8025 = vmatprep.subr.bf16.mxu0 %v8440_v25 }
0x10a7   :  { %8004 = vmatpush3.bf16.msra.mxu1 %v8441_v35 }
0x10a8   :  { %8026 = vmatpush3.bf16.msra.mxu0 %v8442_v14  ;;  %8005 = vmatprep.subr.bf16.mxu1 %v8443_v29 }
0x10a9   :  { %8027 = vmatprep.subr.bf16.mxu0 %v8444_v60 }
0x10ab   :  { %8006 = vmatpush3.bf16.msra.mxu1 %v8445_v17 }
0x10ac   :  { %8028 = vmatpush3.bf16.msra.mxu0 %v8446_v54  ;;  %8007 = vmatprep.subr.bf16.mxu1 %v8447_v22 }
0x10ad   :  { %8029 = vmatprep.subr.bf16.mxu0 %v8448_v18 }
0x10af   :  { %8008 = vmatpush3.bf16.msra.mxu1 %v8449_v51 }
0x10b0   :  { %8030 = vmatpush3.bf16.msra.mxu0 %v8450_v37  ;;  %8009 = vmatprep.subr.bf16.mxu1 %v8451_v30 }
0x10b1   :  { %8031 = vmatprep.subr.bf16.mxu0 %v8452_v36 }
0x10b3   :  { %8010 = vmatpush3.bf16.msra.mxu1 %v8453_v44 }
0x10b4   :  { %8032 = vmatpush3.bf16.msra.mxu0 %v8454_v47 }
0x10b6   :  { %6513 = vmatmul.mubr.bf16.vlgmr.msra.gmra.mrb[108].mxu1 %v10357_v11 }
0x10b7   :  { %6554 = vmatmul.mubr.bf16.vlgmr.msra.gmra.mrb[96].mxu0 %v10359_v57  ;;  %6706 = vmatprep.mubr.bf16.mxu1 %v8653_v49 }
0x1129   :  { %v7879_v19 = vpop.f32.mrb[96].mxu1  ;;  %v7901_v62 = vpop.f32.mrb[84].mxu0 }
0x112a   :  { %v7880_v23 = vpop.f32.mrb[97].mxu1  ;;  %v7902_v24 = vpop.f32.mrb[85].mxu0 }
0x112b   :  { %v7881_v1 = vadd.f32 %v7880_v23, %v7879_v19  ;;  %v7903_v61 = vadd.f32 %v7902_v24, %v7901_v62  ;;  %v7882_v63 = vpop.f32.mrb[98].mxu1  ;;  %v7904_v28 = vpop.f32.mrb[86].mxu0 }
0x112c   :  { %v7883_v56 = vpop.f32.mrb[99].mxu1  ;;  %v7905_v43 = vpop.f32.mrb[87].mxu0 }
0x112d   :  { %v6269_v41 = vadd.f32 %v7881_v1, %v7480_v16  ;;  %v7884_v11 = vadd.f32 %v7883_v56, %v7882_v63  ;;  %v7906_v9 = vadd.f32 %v7905_v43, %v7904_v28 }
0x112f   :  { %v6310_v57 = vadd.f32 %v7903_v61, %v6269_v41  ;;  %v6272_v39 = vadd.f32 %v7884_v11, %v7480_v16 }
0x1131   :  { %v6313_v49 = vadd.f32 %v7906_v9, %v6272_v39 }
0x1149   :  { %v7923_v27 = vpop.f32.mrb[100].mxu1  ;;  %v7945_v59 = vpop.f32.mrb[88].mxu0 }
0x114a   :  { %v7924_v38 = vpop.f32.mrb[101].mxu1  ;;  %v7946_v46 = vpop.f32.mrb[89].mxu0 }
0x114b   :  { %v7925_v6 = vadd.f32 %v7924_v38, %v7923_v27  ;;  %v7947_v0 = vadd.f32 %v7946_v46, %v7945_v59  ;;  %v7926_v42 = vpop.f32.mrb[102].mxu1  ;;  %v7948_v8 = vpop.f32.mrb[90].mxu0  ;;  %v8457_v59 = vld [vmem:[%s10700_s15 + $0x4] ss:$8 sps:$4 sm:$0xff]   ;;  %v8460_v38 = vld [vmem:[%s10700_s15 + $0x14] ss:$8 sps:$4 sm:$0xff]  }
0x114c   :  { %v7927_v33 = vpop.f32.mrb[103].mxu1  ;;  %v7949_v5 = vpop.f32.mrb[91].mxu0  ;;  %6674 = vmatprep.subr.bf16.mxu1 %v8457_v59  ;;  %v8458_v46 = vld [vmem:[%s10700_s15 + $0x10] ss:$8 sps:$4 sm:$0xff]  }
0x114d   :  { %v6351_v2 = vadd.f32 %v7925_v6, %v6310_v57  ;;  %v7928_v50 = vadd.f32 %v7927_v33, %v7926_v42  ;;  %v7950_v4 = vadd.f32 %v7949_v5, %v7948_v8  ;;  %v8461_v6 = vld [vmem:[%s10702_s17 + $0x40] sm:$0xff]   ;;  %v8463_v42 = vld [vmem:[%s10702_s17 + $0x48] sm:$0xff]   ;;  %v8465_v33 = vld [vmem:[%s10702_s17 + $0x50] sm:$0xff]  }
0x114e   :  { %8039 = vmatprep.subr.bf16.mxu0 %v8461_v6  ;;  %v8464_v8 = vld [vmem:[%s10702_s17 + $0x8] sm:$0xff]   ;;  %v8466_v5 = vld [vmem:[%s10702_s17 + $0x10] sm:$0xff]  }
0x114f   :  { %v6392_v15 = vadd.f32 %v7947_v0, %v6351_v2  ;;  %v6354_v10 = vadd.f32 %v7928_v50, %v6313_v49  ;;  %v8462_v0 = vld [vmem:[%s10702_s17] sm:$0xff]   ;;  %v8467_v2 = vld [vmem:[%s10702_s17 + $0x58] sm:$0xff]  }
0x1150   :  { %8040 = vmatpush3.bf16.msra.mxu0 %v8462_v0  ;;  %v8468_v50 = vld [vmem:[%s10702_s17 + $0x18] sm:$0xff]  }
0x1151   :  { %v6395_v58 = vadd.f32 %v7950_v4, %v6354_v10  ;;  %8041 = vmatprep.subr.bf16.mxu0 %v8463_v42  ;;  %v8469_v4 = vld [vmem:[%s10702_s17 + $0x60] sm:$0xff]   ;;  %v8471_v10 = vld [vmem:[%s10702_s17 + $0x68] sm:$0xff]  }
0x1154   :  { %8042 = vmatpush3.bf16.msra.mxu0 %v8464_v8 }
0x1155   :  { %8043 = vmatprep.subr.bf16.mxu0 %v8465_v33 }
0x1158   :  { %8044 = vmatpush3.bf16.msra.mxu0 %v8466_v5 }
0x1159   :  { %8045 = vmatprep.subr.bf16.mxu0 %v8467_v2  ;;  %v7618_v2 = vld [vmem:[%s10703_s18] ss:$0 sm:$0xff] }
0x115c   :  { %8046 = vmatpush3.bf16.msra.mxu0 %v8468_v50 }
0x115d   :  { %8047 = vmatprep.subr.bf16.mxu0 %v8469_v4 }
0x1169   :  { %v7967_v48 = vpop.f32.mrb[104].mxu1 }
0x116a   :  { %v7989_v53 = vpop.f32.mrb[92].mxu0  ;;  %v7968_v26 = vpop.f32.mrb[105].mxu1 }
0x116b   :  { %v7969_v32 = vadd.f32 %v7968_v26, %v7967_v48  ;;  %v7990_v45 = vpop.f32.mrb[93].mxu0  ;;  %v7970_v52 = vpop.f32.mrb[106].mxu1 }
0x116c   :  { %v7991_v3 = vadd.f32 %v7990_v45, %v7989_v53  ;;  %v7992_v55 = vpop.f32.mrb[94].mxu0  ;;  %v7971_v34 = vpop.f32.mrb[107].mxu1 }
0x116d   :  { %v6433_v21 = vadd.f32 %v7969_v32, %v6392_v15  ;;  %v7972_v7 = vadd.f32 %v7971_v34, %v7970_v52  ;;  %v7993_v12 = vpop.f32.mrb[95].mxu0  ;;  %v8470_v15 = vld [vmem:[%s10702_s17 + $0x20] sm:$0xff]  }
0x116e   :  { %v7994_v25 = vadd.f32 %v7993_v12, %v7992_v55  ;;  %8048 = vmatpush3.bf16.msra.mxu0 %v8470_v15  ;;  %v7611_v55 = vld [vmem:[%s10698_s13 + $0x1] ss:$0 sm:$0xff] }
0x116f   :  { %v6474_v35 = vadd.f32 %v7991_v3, %v6433_v21  ;;  %v6436_v14 = vadd.f32 %v7972_v7, %v6395_v58  ;;  %v8472_v58 = vld [vmem:[%s10702_s17 + $0x28] sm:$0xff]   ;;  %8049 = vmatprep.subr.bf16.mxu0 %v8471_v10  ;;  %v7612_v7 = vld [vmem:[%s10699_s14 + $0x1] ss:$0 sm:$0xff] }
0x1171   :  { %v6477_v29 = vadd.f32 %v7994_v25, %v6436_v14 }
0x1172   :  { %8050 = vmatpush3.bf16.msra.mxu0 %v8472_v58 }
0x1189   :  { %v8011_v60 = vpop.f32.mrb[108].mxu1 }
0x118a   :  { %v8033_v17 = vpop.f32.mrb[96].mxu0  ;;  %v8012_v54 = vpop.f32.mrb[109].mxu1 }
0x118b   :  { %v8013_v22 = vadd.f32 %v8012_v54, %v8011_v60  ;;  %v8034_v18 = vpop.f32.mrb[97].mxu0  ;;  %v8014_v51 = vpop.f32.mrb[110].mxu1 }
0x118c   :  { %v8035_v37 = vadd.f32 %v8034_v18, %v8033_v17  ;;  %v8036_v30 = vpop.f32.mrb[98].mxu0  ;;  %v8015_v36 = vpop.f32.mrb[111].mxu1 }
0x118d   :  { %v6515_v44 = vadd.f32 %v8013_v22, %v6474_v35  ;;  %v8016_v47 = vadd.f32 %v8015_v36, %v8014_v51  ;;  %v8037_v19 = vpop.f32.mrb[99].mxu0 }
0x118e   :  { %v8038_v62 = vadd.f32 %v8037_v19, %v8036_v30 }
0x118f   :  { %v6556_v16 = vadd.f32 %v8035_v37, %v6515_v44  ;;  %v6518_v23 = vadd.f32 %v8016_v47, %v6477_v29 }
0x1191   :  { %v6559_v24 = vadd.f32 %v8038_v62, %v6518_v23  ;;  %v6562_v1 = vadd.f32 %v6556_v16, %v10061_v20 }
0x1193   :  { %v6568_v61 = vsel %vm158_vm2, %v6562_v1, 0.0  ;;  %v6563_v63 = vadd.f32 %v6559_v24, %v10063_v31  ;;  %v8455_v31 = vld [vmem:[%s10700_s15] ss:$8 sps:$4 sm:$0xff]  }
0x1194   :  { %6569 = vadd.xlane.f32.xlu1 %v6568_v61  ;;  %6675 = vmatpush1.bf16.msra.mxu1 %v8455_v31 }
0x1195   :  { %v6571_v28 = vsel %vm158_vm2, %v6563_v63, 0.0  ;;  %6676 = vmatprep.subr.bf16.mxu1 %v8460_v38 }
0x1196   :  { %6572 = vadd.xlane.f32.xlu0 %v6571_v28 }
0x1198   :  { %6677 = vmatpush1.bf16.msra.mxu1 %v8458_v46 }
0x1221   :  { %v6570_v56 = vpop.xlane.xlu1 %6569 }
0x1222   :  { %v6574_v43 = vmul.f32 0.03125, %v6570_v56 }
0x1223   :  { %v6573_v41 = vpop.xlane.xlu0 %6572 }
0x1224   :  { %v6576_v11 = vsub.f32 %v6562_v1, %v6574_v43  ;;  %v6575_v9 = vmul.f32 0.03125, %v6573_v41  ;;  %v8473_v41 = vld [vmem:[%s10702_s17 + $0x70] sm:$0xff]  }
0x1225   :  { %8051 = vmatprep.subr.bf16.mxu0 %v8473_v41 }
0x1226   :  { %v6577_v57 = vsub.f32 %v6563_v63, %v6575_v9  ;;  %v6578_v39 = vmul.f32 %v6576_v11, %v6576_v11  ;;  %v8475_v9 = vld [vmem:[%s10702_s17 + $0x78] sm:$0xff]  }
0x1228   :  { %v6580_v49 = vsel %vm158_vm2, %v6578_v39, 0.0  ;;  %v6579_v27 = vmul.f32 %v6577_v57, %v6577_v57  ;;  %v6633_v39 = vld [vmem:[%s10701_s16] sm:$0x3]  ;;  %s8654_s16 = smov [#allocation2]  }
0x1229   :  { %6581 = vadd.xlane.f32.xlu1 %v6580_v49  ;;  %v6638_v49 = vrot.slane %v6633_v39, %v8822_v40  ;;  %s6902_s3 = sshll.u32 %s8654_s16, 4  ;;  %s6903_s3 = int_to_ptr.vmem [resolvable:$true] %s6902_s3 }
0x122a   :  { %v6583_v20 = vsel %vm158_vm2, %v6579_v27, 0.0  ;;  %v6642_v27 = vrot.slane %v6633_v39, %v9358_v13  ;;  %s8624_s5 = scalar_lea.vmem %s6903_s3, 32  ;;  %p8629_p1 = scmp.lt.s32.totalorder %s6903_s3, %s6903_s3 }
0x122b   :  { %6584 = vadd.xlane.f32.xlu0 %v6583_v20  ;;  %p8625_p0 = scmp.ne.s32.totalorder %s6903_s3, %s8624_s5  ;;  %p8630_p2 = scmp.lt.s32.totalorder %s8624_s5, %s8624_s5 }
0x122d   :  { %p8631_p3 = por %p8630_p2, %p8629_p1 }
0x122f   :  { %p8632_p4 = pnand %p8631_p3, %p8625_p0 }
0x12b6   :  { %v6582_v48 = vpop.xlane.xlu1 %6581 }
0x12b7   :  { %v6586_v53 = vmul.f32 0.03125, %v6582_v48 }
0x12b8   :  { %v6585_v26 = vpop.xlane.xlu0 %6584 }
0x12b9   :  { %v6588_v32 = vadd.f32 1e-05, %v6586_v53  ;;  %v6587_v45 = vmul.f32 0.03125, %v6585_v26 }
0x12bb   :  { %8617 = vrsqrt.f32 %v6588_v32  ;;  %v6589_v52 = vadd.f32 1e-05, %v6587_v45 }
0x12bd   :  { %8619 = vrsqrt.f32 %v6589_v52 }
0x12c5   :  { %v8618_v3 = vpop.eup %8617 }
0x12c6   :  { %v6592_v34 = vmul.f32 %v8618_v3, %v6576_v11  ;;  %v8474_v11 = vld [vmem:[%s10702_s17 + $0x30] sm:$0xff]  }
0x12c7   :  { %v8620_v21 = vpop.eup %8619  ;;  %8052 = vmatpush3.bf16.msra.mxu0 %v8474_v11 }
0x12c8   :  { %v6600_v12 = vmul.f32 %v7611_v55, %v6592_v34  ;;  %v6593_v25 = vmul.f32 %v8620_v21, %v6577_v57  ;;  %v8476_v57 = vld [vmem:[%s10702_s17 + $0x38] sm:$0xff]   ;;  %8053 = vmatprep.subr.bf16.mxu0 %v8475_v9 }
0x12ca   :  { %v6608_v35 = vadd.f32 %v7612_v7, %v6600_v12  ;;  %v6601_v14 = vmul.f32 %v7611_v55, %v6593_v25 }
0x12cb   :  { %8054 = vmatpush3.bf16.msra.mxu0 %v8476_v57 }
0x12cc   :  { %v6610_v29 = vsel %vm158_vm2, %v6608_v35, 0.0  ;;  %v6609_v60 = vadd.f32 %v7612_v7, %v6601_v14 }
0x12cd   :  { %v6611_v17 = vrot.slane %v6610_v29, 4 }
0x12ce   :  { %v6617_v54 = vsel %vm158_vm2, %v6609_v60, 0.0 }
0x12cf   :  { %v6612_v22 = vadd.f32 %v6611_v17, %v6610_v29  ;;  %v6618_v18 = vrot.slane %v6617_v54, 4 }
0x12d1   :  { %v6613_v51 = vrot.slane %v6612_v22, 2  ;;  %v6619_v37 = vadd.f32 %v6618_v18, %v6617_v54 }
0x12d3   :  { %v6620_v30 = vrot.slane %v6619_v37, 2  ;;  %v6614_v36 = vadd.f32 %v6613_v51, %v6612_v22 }
0x12d5   :  { %v6615_v44 = vrot.slane %v6614_v36, 1  ;;  %v6621_v47 = vadd.f32 %v6620_v30, %v6619_v37 }
0x12d7   :  { %v6616_v19 = vadd.f32 %v6615_v44, %v6614_v36  ;;  %v6622_v62 = vrot.slane %v6621_v47, 1 }
0x12d9   :  { %v6623_v16 = vadd.f32 %v6622_v62, %v6621_v47  ;;  %v6625_v23 = vmul.f32 0.125, %v6616_v19 }
0x12db   :  { %v6626_v24 = vmul.f32 0.125, %v6623_v16  ;;  %v6631_v1 = vpack.c.bf16 %v6625_v23, %v6625_v23 }
0x12dd   :  { %v6632_v61 = vpack.c.bf16 %v6626_v24, %v6626_v24  ;;  %v6647_v63 = vunpack.c.l.b16 %v6631_v1 }
0x12df   :  { %v6648_v28 = vunpack.c.l.b16 %v6632_v61 }
0x12e1   :  { %v6649_v56 = vsel %vm1177_vm5, %v6648_v28, %v6647_v63 }
0x12e2   :  { %v6650_v43 = vpack.c.b16 %v6649_v56, %v6649_v56 }
0x12e4   :  { %7617 = vmatmul.mubr.msk.bf16.vlgmr.msra.gmra.mrb[112].mxu1 %vm158_vm2, %v6650_v43 }
0x13b7   :  { %v6708_v20 = vpop.f32.mrb[112].mxu1 }
0x13b8   :  { %v6709_v31 = vadd.f32 %v6708_v20, %v6638_v49  ;;  %v6710_v59 = vpop.f32.mrb[113].mxu1 }
0x13b9   :  { %v6711_v38 = vadd.f32 %v6710_v59, %v6642_v27  ;;  %v6712_v46 = vpop.f32.mrb[114].mxu1 }
0x13ba   :  { %v6715_v6 = vmax.f32 %v6709_v31, 0.0  ;;  %v6713_v0 = vpop.f32.mrb[115].mxu1 }
0x13bb   :  { %v6716_v42 = vmax.f32 %v6711_v38, 0.0 }
0x13bc   :  { %v6749_v33 = vpack.c.bf16 %v6715_v6, %v6715_v6 }
0x13bd   :  { %v6750_v8 = vpack.c.bf16 %v6716_v42, %v6716_v42 }
0x13bf   :  { %6886 = vmatprep.mubr.bf16.mxu0 %v6750_v8 }
0x13c0   :  { %6887 = vmatmul.mubr.bf16.vlgmr.msra.gmra.mrb[100].mxu0 %v6749_v33 }
0x1493   :  { %v8055_v5 = vpop.f32.mrb[100].mxu0 }
0x1494   :  { %v8056_v40 = vpop.f32.mrb[101].mxu0 }
0x1495   :  { %v8057_v13 = vadd.f32 %v8056_v40, %v8055_v5  ;;  %v8058_v50 = vpop.f32.mrb[102].mxu0 }
0x1496   :  { %v8059_v4 = vpop.f32.mrb[103].mxu0 }
0x1497   :  { %v6889_v15 = vadd.f32 %v8057_v13, %v7618_v2 }
0x1499   :  { %6895 = vst.msk [vmem:[#allocation2] sm:$0x3] %vm6894_vm12, %v6889_v15 }
0x149a   :  { %8635 = shalt.err (!%p8632_p4)
}
0x149b   :  { %s8636_s18 = scalar_lea.hbm %s10706_s21, 32 }
0x149c   :  { %p8637_p5 = scmp.ne.s32.totalorder %s10706_s21, %s8636_s18  ;;  %p8640_p6 = scmp.lt.u32.totalorder %s8636_s18, %s10706_s21 }
0x149e   :  { %p8642_p7 = pnand %p8640_p6, %p8637_p5 }
0x14a0   :  { %8645 = shalt.err (!%p8642_p7)
}
0x14a1   :  { %6905 = dma.vmem_to_hbm [thread:$0]  %s6903_s3, 32, %s10706_s21, [#allocation3]  }
0x14a2   :  { %8646 = dma.done.wait [#allocation3], 32  }
0x14a3   :  { %8647 = vsyncadd [#allocation3], 4294967264 }
0x14a4   :  { %6909 = vsyncpa [#allocation3], 1 }

</bundles_post_ra>
